<compile_context>
chip_gen: v5e
topology: v5e:2x2
jax: 0.10.0
libtpu: 0.0.40
codegen_flags: <defaults>
</compile_context>

<pallas_src>
import functools

import jax
import jax.numpy as jnp
from jax.experimental import pallas as pl
from jax.experimental.pallas import tpu as pltpu


def _shared_kernel(x_ref, w_ref, o_ref, *, H, W):
    # x_ref: (1, Cp, H*W) f32  lane-dense activations for one batch element
    # w_ref: (3, 9, Cp, Cp) f32 per-layer, per-tap weights (tap k = (ky*3+kx))
    # o_ref: (1, Cp, H*W) f32
    Cp = x_ref.shape[1]
    HW = H * W

    # Flat spatial position -> (h, w), computed once on full (Cp, HW) vregs and
    # reused by all 3 layers. W is a power of two at this shape -> shift/and.
    pos = jax.lax.broadcasted_iota(jnp.int32, (Cp, HW), 1)
    if W & (W - 1) == 0:
        row = pos >> (W.bit_length() - 1)
        col = pos & (W - 1)
    else:  # fallback for non-power-of-two widths
        row = pos // W
        col = pos % W

    # f32 validity masks for the four edge directions; corners are products.
    top = (row >= 1).astype(jnp.float32)        # tap dy = -1 needs h >= 1
    bot = (row <= H - 2).astype(jnp.float32)    # tap dy = +1 needs h <= H-2
    lft = (col >= 1).astype(jnp.float32)        # tap dx = -1 needs w >= 1
    rgt = (col <= W - 2).astype(jnp.float32)    # tap dx = +1 needs w <= W-2

    row_masks = {-1: top, 0: None, 1: bot}
    col_masks = {-1: lft, 0: None, 1: rgt}
    masks = []  # indexed by k = (dy+1)*3 + (dx+1); None == always valid
    for dy in (-1, 0, 1):
        for dx in (-1, 0, 1):
            mh, mw = row_masks[dy], col_masks[dx]
            if mh is None:
                masks.append(mw)
            elif mw is None:
                masks.append(mh)
            else:
                masks.append(mh * mw)

    def conv3x3_relu(a, layer):
        # a: (Cp, HW) activations. 9 small MXU dots accumulated in f32.
        acc = None
        for k in range(9):
            dy, dx = k // 3 - 1, k % 3 - 1
            s = dy * W + dx                         # flat source offset
            # tap[:, p] = a[:, p + s]  (wrap positions are zeroed by the mask)
            t = a if s == 0 else pltpu.roll(a, shift=(-s) % HW, axis=1)
            m = masks[k]
            if m is not None:
                t = t * m                           # zero-pad halo (one vmul)
            part = jnp.dot(w_ref[layer, k], t,
                           preferred_element_type=jnp.float32,
                           precision=jax.lax.Precision.HIGHEST)
            acc = part if acc is None else acc + part
        return jnp.maximum(acc, 0.0)

    a = x_ref[0]                                    # (Cp, HW)
    a = conv3x3_relu(a, 0)
    a = conv3x3_relu(a, 1)
    a = conv3x3_relu(a, 2)
    o_ref[0] = a                                    # lane-dense, unmasked store


def shared_forward(x, weights):
    """x: (B, C, H, W) f32; weights: (3, C_out, C_in, 3, 3) f32 (OIHW per layer)."""
    B, C, H, W = x.shape
    HW = H * W
    Cp = max(8, ((C + 7) // 8) * 8)                 # pad channels to a sublane tile

    x_flat = jnp.zeros((B, Cp, HW), jnp.float32).at[:, :C, :].set(
        x.reshape(B, C, HW).astype(jnp.float32))
    w_pad = jnp.zeros((3, Cp, Cp, 3, 3), jnp.float32).at[:, :C, :C].set(
        weights.astype(jnp.float32))
    # (layer, o, i, ky, kx) -> (layer, k=ky*3+kx, o, i) so w_ref[l, k] is (Cp, Cp).
    w_k = jnp.transpose(w_pad, (0, 3, 4, 1, 2)).reshape(3, 9, Cp, Cp)

    kernel = functools.partial(_shared_kernel, H=H, W=W)
    out = pl.pallas_call(
        kernel,
        out_shape=jax.ShapeDtypeStruct((B, Cp, HW), jnp.float32),
        grid_spec=pltpu.PrefetchScalarGridSpec(
            num_scalar_prefetch=0,
            grid=(B,),
            in_specs=[
                pl.BlockSpec((1, Cp, HW), lambda b: (b, 0, 0)),
                pl.BlockSpec((3, 9, Cp, Cp), lambda b: (0, 0, 0, 0)),
            ],
            out_specs=pl.BlockSpec((1, Cp, HW), lambda b: (b, 0, 0)),
        ),
        compiler_params=pltpu.CompilerParams(
            dimension_semantics=("parallel",)),      # batch -> v7x TC sharding
    )(x_flat, w_k)
    return out[:, :C, :].reshape(B, C, H, W)


def _reference(x, weights):
    y = x
    for l in range(3):
        y = jax.lax.conv_general_dilated(
            y, weights[l], window_strides=(1, 1), padding="SAME",
            dimension_numbers=("NCHW", "OIHW", "NCHW"),
            precision=jax.lax.Precision.HIGHEST)
        y = jax.nn.relu(y)
    return y


if __name__ == "__main__":
    key = jax.random.PRNGKey(0)
    kx, kw = jax.random.split(key)

    B, C, H, W = 2, 4, 16, 16          # input_shape = 4 channels
    x = jax.random.normal(kx, (B, C, H, W), dtype=jnp.float32)
    # Deterministic synthetic weights for block_1/2/3 (Conv2d(C, C, 3, bias=False))
    weights = 0.2 * jax.random.normal(kw, (3, C, C, 3, 3), dtype=jnp.float32)

    out = jax.block_until_ready(shared_forward(x, weights))
    ref = _reference(x, weights)

    assert out.shape == (B, C, H, W), out.shape
    # In-kernel dots run at HIGHEST precision (exact f32 MXU passes), so the
    # result matches the HIGHEST-precision XLA conv to float rounding error.
    assert jnp.allclose(out, ref, atol=1e-4, rtol=1e-4), float(jnp.max(jnp.abs(out - ref)))
    print("KERNEL_OK")
</pallas_src>

<mosaic_0001>
module attributes {stable_mosaic.version = 11 : i64} {
  func.func @_shared_kernel(%arg0: i32, %arg1: memref<1x8x256xf32, #tpu.memory_space<vmem>>, %arg2: memref<3x9x8x8xf32, #tpu.memory_space<vmem>>, %arg3: memref<1x8x256xf32, #tpu.memory_space<vmem>>) attributes {dimension_semantics = [#tpu.dimension_semantics<parallel>], iteration_bounds = array<i64: 2>, scalar_prefetch = 0 : i64, scratch_operands = 0 : i64, tpu.core_type = #tpu.core_type<tc>, window_params = [{transform_indices = @transform_0, window_bounds = array<i64: 1, 8, 256>}, {pipeline_mode = #tpu.pipeline_mode<synchronous>, transform_indices = @transform_1, window_bounds = array<i64: 3, 9, 8, 8>}, {transform_indices = @transform_2, window_bounds = array<i64: 1, 8, 256>}]} {
    %0 = tpu.iota {dimensions = array<i32: 1>} : vector<8x256xi32>
    %c4_i32 = arith.constant 4 : i32
    %1 = vector.broadcast %c4_i32 : i32 to vector<8x256xi32>
    %2 = arith.shrsi %0, %1 : vector<8x256xi32>
    %c15_i32 = arith.constant 15 : i32
    %3 = vector.broadcast %c15_i32 : i32 to vector<8x256xi32>
    %4 = arith.andi %0, %3 : vector<8x256xi32>
    %c1_i32 = arith.constant 1 : i32
    %5 = vector.broadcast %c1_i32 : i32 to vector<8x256xi32>
    %6 = arith.cmpi sge, %2, %5 : vector<8x256xi32>
    %7 = arith.extui %6 : vector<8x256xi1> to vector<8x256xi32>
    %8 = arith.sitofp %7 : vector<8x256xi32> to vector<8x256xf32>
    %c14_i32 = arith.constant 14 : i32
    %9 = vector.broadcast %c14_i32 : i32 to vector<8x256xi32>
    %10 = arith.cmpi sle, %2, %9 : vector<8x256xi32>
    %11 = arith.extui %10 : vector<8x256xi1> to vector<8x256xi32>
    %12 = arith.sitofp %11 : vector<8x256xi32> to vector<8x256xf32>
    %c1_i32_0 = arith.constant 1 : i32
    %13 = vector.broadcast %c1_i32_0 : i32 to vector<8x256xi32>
    %14 = arith.cmpi sge, %4, %13 : vector<8x256xi32>
    %15 = arith.extui %14 : vector<8x256xi1> to vector<8x256xi32>
    %16 = arith.sitofp %15 : vector<8x256xi32> to vector<8x256xf32>
    %c14_i32_1 = arith.constant 14 : i32
    %17 = vector.broadcast %c14_i32_1 : i32 to vector<8x256xi32>
    %18 = arith.cmpi sle, %4, %17 : vector<8x256xi32>
    %19 = arith.extui %18 : vector<8x256xi1> to vector<8x256xi32>
    %20 = arith.sitofp %19 : vector<8x256xi32> to vector<8x256xf32>
    %21 = arith.mulf %8, %16 : vector<8x256xf32>
    %22 = arith.mulf %8, %20 : vector<8x256xf32>
    %23 = arith.mulf %12, %16 : vector<8x256xf32>
    %24 = arith.mulf %12, %20 : vector<8x256xf32>
    %c0 = arith.constant 0 : index
    %c0_2 = arith.constant 0 : index
    %c0_3 = arith.constant 0 : index
    %25 = vector.load %arg1[%c0, %c0_2, %c0_3] : memref<1x8x256xf32, #tpu.memory_space<vmem>>, vector<1x8x256xf32>
    %26 = vector.shape_cast %25 : vector<1x8x256xf32> to vector<8x256xf32>
    %c17_i32 = arith.constant 17 : i32
    %27 = tpu.dynamic_rotate %26 by %c17_i32 dim 1 : vector<8x256xf32>, i32 -> vector<8x256xf32>
    %28 = arith.mulf %27, %21 : vector<8x256xf32>
    %c0_4 = arith.constant 0 : index
    %c0_5 = arith.constant 0 : index
    %c0_6 = arith.constant 0 : index
    %c0_7 = arith.constant 0 : index
    %29 = vector.load %arg2[%c0_4, %c0_5, %c0_6, %c0_7] : memref<3x9x8x8xf32, #tpu.memory_space<vmem>>, vector<1x1x8x8xf32>
    %30 = vector.shape_cast %29 : vector<1x1x8x8xf32> to vector<8x8xf32>
    %cst = arith.constant dense<0.000000e+00> : vector<8x256xf32>
    %31 = tpu.matmul %30, %28, %cst {dimension_numbers = #tpu.dot_dimension_numbers<[1], [0], [0], [1], [0, 0, 1, 1], [], []>, precision = #tpu.contract_precision<fp32>} : vector<8x8xf32>, vector<8x256xf32>, vector<8x256xf32> -> vector<8x256xf32>
    %c16_i32 = arith.constant 16 : i32
    %32 = tpu.dynamic_rotate %26 by %c16_i32 dim 1 : vector<8x256xf32>, i32 -> vector<8x256xf32>
    %33 = arith.mulf %32, %8 : vector<8x256xf32>
    %c0_8 = arith.constant 0 : index
    %c1 = arith.constant 1 : index
    %c0_9 = arith.constant 0 : index
    %c0_10 = arith.constant 0 : index
    %34 = vector.load %arg2[%c0_8, %c1, %c0_9, %c0_10] : memref<3x9x8x8xf32, #tpu.memory_space<vmem>>, vector<1x1x8x8xf32>
    %35 = vector.shape_cast %34 : vector<1x1x8x8xf32> to vector<8x8xf32>
    %cst_11 = arith.constant dense<0.000000e+00> : vector<8x256xf32>
    %36 = tpu.matmul %35, %33, %cst_11 {dimension_numbers = #tpu.dot_dimension_numbers<[1], [0], [0], [1], [0, 0, 1, 1], [], []>, precision = #tpu.contract_precision<fp32>} : vector<8x8xf32>, vector<8x256xf32>, vector<8x256xf32> -> vector<8x256xf32>
    %37 = arith.addf %31, %36 : vector<8x256xf32>
    %c15_i32_12 = arith.constant 15 : i32
    %38 = tpu.dynamic_rotate %26 by %c15_i32_12 dim 1 : vector<8x256xf32>, i32 -> vector<8x256xf32>
    %39 = arith.mulf %38, %22 : vector<8x256xf32>
    %c0_13 = arith.constant 0 : index
    %c2 = arith.constant 2 : index
    %c0_14 = arith.constant 0 : index
    %c0_15 = arith.constant 0 : index
    %40 = vector.load %arg2[%c0_13, %c2, %c0_14, %c0_15] : memref<3x9x8x8xf32, #tpu.memory_space<vmem>>, vector<1x1x8x8xf32>
    %41 = vector.shape_cast %40 : vector<1x1x8x8xf32> to vector<8x8xf32>
    %cst_16 = arith.constant dense<0.000000e+00> : vector<8x256xf32>
    %42 = tpu.matmul %41, %39, %cst_16 {dimension_numbers = #tpu.dot_dimension_numbers<[1], [0], [0], [1], [0, 0, 1, 1], [], []>, precision = #tpu.contract_precision<fp32>} : vector<8x8xf32>, vector<8x256xf32>, vector<8x256xf32> -> vector<8x256xf32>
    %43 = arith.addf %37, %42 : vector<8x256xf32>
    %c1_i32_17 = arith.constant 1 : i32
    %44 = tpu.dynamic_rotate %26 by %c1_i32_17 dim 1 : vector<8x256xf32>, i32 -> vector<8x256xf32>
    %45 = arith.mulf %44, %16 : vector<8x256xf32>
    %c0_18 = arith.constant 0 : index
    %c3 = arith.constant 3 : index
    %c0_19 = arith.constant 0 : index
    %c0_20 = arith.constant 0 : index
    %46 = vector.load %arg2[%c0_18, %c3, %c0_19, %c0_20] : memref<3x9x8x8xf32, #tpu.memory_space<vmem>>, vector<1x1x8x8xf32>
    %47 = vector.shape_cast %46 : vector<1x1x8x8xf32> to vector<8x8xf32>
    %cst_21 = arith.constant dense<0.000000e+00> : vector<8x256xf32>
    %48 = tpu.matmul %47, %45, %cst_21 {dimension_numbers = #tpu.dot_dimension_numbers<[1], [0], [0], [1], [0, 0, 1, 1], [], []>, precision = #tpu.contract_precision<fp32>} : vector<8x8xf32>, vector<8x256xf32>, vector<8x256xf32> -> vector<8x256xf32>
    %49 = arith.addf %43, %48 : vector<8x256xf32>
    %c0_22 = arith.constant 0 : index
    %c4 = arith.constant 4 : index
    %c0_23 = arith.constant 0 : index
    %c0_24 = arith.constant 0 : index
    %50 = vector.load %arg2[%c0_22, %c4, %c0_23, %c0_24] : memref<3x9x8x8xf32, #tpu.memory_space<vmem>>, vector<1x1x8x8xf32>
    %51 = vector.shape_cast %50 : vector<1x1x8x8xf32> to vector<8x8xf32>
    %cst_25 = arith.constant dense<0.000000e+00> : vector<8x256xf32>
    %52 = tpu.matmul %51, %26, %cst_25 {dimension_numbers = #tpu.dot_dimension_numbers<[1], [0], [0], [1], [0, 0, 1, 1], [], []>, precision = #tpu.contract_precision<fp32>} : vector<8x8xf32>, vector<8x256xf32>, vector<8x256xf32> -> vector<8x256xf32>
    %53 = arith.addf %49, %52 : vector<8x256xf32>
    %c255_i32 = arith.constant 255 : i32
    %54 = tpu.dynamic_rotate %26 by %c255_i32 dim 1 : vector<8x256xf32>, i32 -> vector<8x256xf32>
    %55 = arith.mulf %54, %20 : vector<8x256xf32>
    %c0_26 = arith.constant 0 : index
    %c5 = arith.constant 5 : index
    %c0_27 = arith.constant 0 : index
    %c0_28 = arith.constant 0 : index
    %56 = vector.load %arg2[%c0_26, %c5, %c0_27, %c0_28] : memref<3x9x8x8xf32, #tpu.memory_space<vmem>>, vector<1x1x8x8xf32>
    %57 = vector.shape_cast %56 : vector<1x1x8x8xf32> to vector<8x8xf32>
    %cst_29 = arith.constant dense<0.000000e+00> : vector<8x256xf32>
    %58 = tpu.matmul %57, %55, %cst_29 {dimension_numbers = #tpu.dot_dimension_numbers<[1], [0], [0], [1], [0, 0, 1, 1], [], []>, precision = #tpu.contract_precision<fp32>} : vector<8x8xf32>, vector<8x256xf32>, vector<8x256xf32> -> vector<8x256xf32>
    %59 = arith.addf %53, %58 : vector<8x256xf32>
    %c241_i32 = arith.constant 241 : i32
    %60 = tpu.dynamic_rotate %26 by %c241_i32 dim 1 : vector<8x256xf32>, i32 -> vector<8x256xf32>
    %61 = arith.mulf %60, %23 : vector<8x256xf32>
    %c0_30 = arith.constant 0 : index
    %c6 = arith.constant 6 : index
    %c0_31 = arith.constant 0 : index
    %c0_32 = arith.constant 0 : index
    %62 = vector.load %arg2[%c0_30, %c6, %c0_31, %c0_32] : memref<3x9x8x8xf32, #tpu.memory_space<vmem>>, vector<1x1x8x8xf32>
    %63 = vector.shape_cast %62 : vector<1x1x8x8xf32> to vector<8x8xf32>
    %cst_33 = arith.constant dense<0.000000e+00> : vector<8x256xf32>
    %64 = tpu.matmul %63, %61, %cst_33 {dimension_numbers = #tpu.dot_dimension_numbers<[1], [0], [0], [1], [0, 0, 1, 1], [], []>, precision = #tpu.contract_precision<fp32>} : vector<8x8xf32>, vector<8x256xf32>, vector<8x256xf32> -> vector<8x256xf32>
    %65 = arith.addf %59, %64 : vector<8x256xf32>
    %c240_i32 = arith.constant 240 : i32
    %66 = tpu.dynamic_rotate %26 by %c240_i32 dim 1 : vector<8x256xf32>, i32 -> vector<8x256xf32>
    %67 = arith.mulf %66, %12 : vector<8x256xf32>
    %c0_34 = arith.constant 0 : index
    %c7 = arith.constant 7 : index
    %c0_35 = arith.constant 0 : index
    %c0_36 = arith.constant 0 : index
    %68 = vector.load %arg2[%c0_34, %c7, %c0_35, %c0_36] : memref<3x9x8x8xf32, #tpu.memory_space<vmem>>, vector<1x1x8x8xf32>
    %69 = vector.shape_cast %68 : vector<1x1x8x8xf32> to vector<8x8xf32>
    %cst_37 = arith.constant dense<0.000000e+00> : vector<8x256xf32>
    %70 = tpu.matmul %69, %67, %cst_37 {dimension_numbers = #tpu.dot_dimension_numbers<[1], [0], [0], [1], [0, 0, 1, 1], [], []>, precision = #tpu.contract_precision<fp32>} : vector<8x8xf32>, vector<8x256xf32>, vector<8x256xf32> -> vector<8x256xf32>
    %71 = arith.addf %65, %70 : vector<8x256xf32>
    %c239_i32 = arith.constant 239 : i32
    %72 = tpu.dynamic_rotate %26 by %c239_i32 dim 1 : vector<8x256xf32>, i32 -> vector<8x256xf32>
    %73 = arith.mulf %72, %24 : vector<8x256xf32>
    %c0_38 = arith.constant 0 : index
    %c8 = arith.constant 8 : index
    %c0_39 = arith.constant 0 : index
    %c0_40 = arith.constant 0 : index
    %74 = vector.load %arg2[%c0_38, %c8, %c0_39, %c0_40] : memref<3x9x8x8xf32, #tpu.memory_space<vmem>>, vector<1x1x8x8xf32>
    %75 = vector.shape_cast %74 : vector<1x1x8x8xf32> to vector<8x8xf32>
    %cst_41 = arith.constant dense<0.000000e+00> : vector<8x256xf32>
    %76 = tpu.matmul %75, %73, %cst_41 {dimension_numbers = #tpu.dot_dimension_numbers<[1], [0], [0], [1], [0, 0, 1, 1], [], []>, precision = #tpu.contract_precision<fp32>} : vector<8x8xf32>, vector<8x256xf32>, vector<8x256xf32> -> vector<8x256xf32>
    %77 = arith.addf %71, %76 : vector<8x256xf32>
    %cst_42 = arith.constant 0.000000e+00 : f32
    %78 = vector.broadcast %cst_42 : f32 to vector<8x256xf32>
    %79 = arith.maximumf %77, %78 : vector<8x256xf32>
    %c17_i32_43 = arith.constant 17 : i32
    %80 = tpu.dynamic_rotate %79 by %c17_i32_43 dim 1 : vector<8x256xf32>, i32 -> vector<8x256xf32>
    %81 = arith.mulf %80, %21 : vector<8x256xf32>
    %c1_44 = arith.constant 1 : index
    %c0_45 = arith.constant 0 : index
    %c0_46 = arith.constant 0 : index
    %c0_47 = arith.constant 0 : index
    %82 = vector.load %arg2[%c1_44, %c0_45, %c0_46, %c0_47] : memref<3x9x8x8xf32, #tpu.memory_space<vmem>>, vector<1x1x8x8xf32>
    %83 = vector.shape_cast %82 : vector<1x1x8x8xf32> to vector<8x8xf32>
    %cst_48 = arith.constant dense<0.000000e+00> : vector<8x256xf32>
    %84 = tpu.matmul %83, %81, %cst_48 {dimension_numbers = #tpu.dot_dimension_numbers<[1], [0], [0], [1], [0, 0, 1, 1], [], []>, precision = #tpu.contract_precision<fp32>} : vector<8x8xf32>, vector<8x256xf32>, vector<8x256xf32> -> vector<8x256xf32>
    %c16_i32_49 = arith.constant 16 : i32
    %85 = tpu.dynamic_rotate %79 by %c16_i32_49 dim 1 : vector<8x256xf32>, i32 -> vector<8x256xf32>
    %86 = arith.mulf %85, %8 : vector<8x256xf32>
    %c1_50 = arith.constant 1 : index
    %c1_51 = arith.constant 1 : index
    %c0_52 = arith.constant 0 : index
    %c0_53 = arith.constant 0 : index
    %87 = vector.load %arg2[%c1_50, %c1_51, %c0_52, %c0_53] : memref<3x9x8x8xf32, #tpu.memory_space<vmem>>, vector<1x1x8x8xf32>
    %88 = vector.shape_cast %87 : vector<1x1x8x8xf32> to vector<8x8xf32>
    %cst_54 = arith.constant dense<0.000000e+00> : vector<8x256xf32>
    %89 = tpu.matmul %88, %86, %cst_54 {dimension_numbers = #tpu.dot_dimension_numbers<[1], [0], [0], [1], [0, 0, 1, 1], [], []>, precision = #tpu.contract_precision<fp32>} : vector<8x8xf32>, vector<8x256xf32>, vector<8x256xf32> -> vector<8x256xf32>
    %90 = arith.addf %84, %89 : vector<8x256xf32>
    %c15_i32_55 = arith.constant 15 : i32
    %91 = tpu.dynamic_rotate %79 by %c15_i32_55 dim 1 : vector<8x256xf32>, i32 -> vector<8x256xf32>
    %92 = arith.mulf %91, %22 : vector<8x256xf32>
    %c1_56 = arith.constant 1 : index
    %c2_57 = arith.constant 2 : index
    %c0_58 = arith.constant 0 : index
    %c0_59 = arith.constant 0 : index
    %93 = vector.load %arg2[%c1_56, %c2_57, %c0_58, %c0_59] : memref<3x9x8x8xf32, #tpu.memory_space<vmem>>, vector<1x1x8x8xf32>
    %94 = vector.shape_cast %93 : vector<1x1x8x8xf32> to vector<8x8xf32>
    %cst_60 = arith.constant dense<0.000000e+00> : vector<8x256xf32>
    %95 = tpu.matmul %94, %92, %cst_60 {dimension_numbers = #tpu.dot_dimension_numbers<[1], [0], [0], [1], [0, 0, 1, 1], [], []>, precision = #tpu.contract_precision<fp32>} : vector<8x8xf32>, vector<8x256xf32>, vector<8x256xf32> -> vector<8x256xf32>
    %96 = arith.addf %90, %95 : vector<8x256xf32>
    %c1_i32_61 = arith.constant 1 : i32
    %97 = tpu.dynamic_rotate %79 by %c1_i32_61 dim 1 : vector<8x256xf32>, i32 -> vector<8x256xf32>
    %98 = arith.mulf %97, %16 : vector<8x256xf32>
    %c1_62 = arith.constant 1 : index
    %c3_63 = arith.constant 3 : index
    %c0_64 = arith.constant 0 : index
    %c0_65 = arith.constant 0 : index
    %99 = vector.load %arg2[%c1_62, %c3_63, %c0_64, %c0_65] : memref<3x9x8x8xf32, #tpu.memory_space<vmem>>, vector<1x1x8x8xf32>
    %100 = vector.shape_cast %99 : vector<1x1x8x8xf32> to vector<8x8xf32>
    %cst_66 = arith.constant dense<0.000000e+00> : vector<8x256xf32>
    %101 = tpu.matmul %100, %98, %cst_66 {dimension_numbers = #tpu.dot_dimension_numbers<[1], [0], [0], [1], [0, 0, 1, 1], [], []>, precision = #tpu.contract_precision<fp32>} : vector<8x8xf32>, vector<8x256xf32>, vector<8x256xf32> -> vector<8x256xf32>
    %102 = arith.addf %96, %101 : vector<8x256xf32>
    %c1_67 = arith.constant 1 : index
    %c4_68 = arith.constant 4 : index
    %c0_69 = arith.constant 0 : index
    %c0_70 = arith.constant 0 : index
    %103 = vector.load %arg2[%c1_67, %c4_68, %c0_69, %c0_70] : memref<3x9x8x8xf32, #tpu.memory_space<vmem>>, vector<1x1x8x8xf32>
    %104 = vector.shape_cast %103 : vector<1x1x8x8xf32> to vector<8x8xf32>
    %cst_71 = arith.constant dense<0.000000e+00> : vector<8x256xf32>
    %105 = tpu.matmul %104, %79, %cst_71 {dimension_numbers = #tpu.dot_dimension_numbers<[1], [0], [0], [1], [0, 0, 1, 1], [], []>, precision = #tpu.contract_precision<fp32>} : vector<8x8xf32>, vector<8x256xf32>, vector<8x256xf32> -> vector<8x256xf32>
    %106 = arith.addf %102, %105 : vector<8x256xf32>
    %c255_i32_72 = arith.constant 255 : i32
    %107 = tpu.dynamic_rotate %79 by %c255_i32_72 dim 1 : vector<8x256xf32>, i32 -> vector<8x256xf32>
    %108 = arith.mulf %107, %20 : vector<8x256xf32>
    %c1_73 = arith.constant 1 : index
    %c5_74 = arith.constant 5 : index
    %c0_75 = arith.constant 0 : index
    %c0_76 = arith.constant 0 : index
    %109 = vector.load %arg2[%c1_73, %c5_74, %c0_75, %c0_76] : memref<3x9x8x8xf32, #tpu.memory_space<vmem>>, vector<1x1x8x8xf32>
    %110 = vector.shape_cast %109 : vector<1x1x8x8xf32> to vector<8x8xf32>
    %cst_77 = arith.constant dense<0.000000e+00> : vector<8x256xf32>
    %111 = tpu.matmul %110, %108, %cst_77 {dimension_numbers = #tpu.dot_dimension_numbers<[1], [0], [0], [1], [0, 0, 1, 1], [], []>, precision = #tpu.contract_precision<fp32>} : vector<8x8xf32>, vector<8x256xf32>, vector<8x256xf32> -> vector<8x256xf32>
    %112 = arith.addf %106, %111 : vector<8x256xf32>
    %c241_i32_78 = arith.constant 241 : i32
    %113 = tpu.dynamic_rotate %79 by %c241_i32_78 dim 1 : vector<8x256xf32>, i32 -> vector<8x256xf32>
    %114 = arith.mulf %113, %23 : vector<8x256xf32>
    %c1_79 = arith.constant 1 : index
    %c6_80 = arith.constant 6 : index
    %c0_81 = arith.constant 0 : index
    %c0_82 = arith.constant 0 : index
    %115 = vector.load %arg2[%c1_79, %c6_80, %c0_81, %c0_82] : memref<3x9x8x8xf32, #tpu.memory_space<vmem>>, vector<1x1x8x8xf32>
    %116 = vector.shape_cast %115 : vector<1x1x8x8xf32> to vector<8x8xf32>
    %cst_83 = arith.constant dense<0.000000e+00> : vector<8x256xf32>
    %117 = tpu.matmul %116, %114, %cst_83 {dimension_numbers = #tpu.dot_dimension_numbers<[1], [0], [0], [1], [0, 0, 1, 1], [], []>, precision = #tpu.contract_precision<fp32>} : vector<8x8xf32>, vector<8x256xf32>, vector<8x256xf32> -> vector<8x256xf32>
    %118 = arith.addf %112, %117 : vector<8x256xf32>
    %c240_i32_84 = arith.constant 240 : i32
    %119 = tpu.dynamic_rotate %79 by %c240_i32_84 dim 1 : vector<8x256xf32>, i32 -> vector<8x256xf32>
    %120 = arith.mulf %119, %12 : vector<8x256xf32>
    %c1_85 = arith.constant 1 : index
    %c7_86 = arith.constant 7 : index
    %c0_87 = arith.constant 0 : index
    %c0_88 = arith.constant 0 : index
    %121 = vector.load %arg2[%c1_85, %c7_86, %c0_87, %c0_88] : memref<3x9x8x8xf32, #tpu.memory_space<vmem>>, vector<1x1x8x8xf32>
    %122 = vector.shape_cast %121 : vector<1x1x8x8xf32> to vector<8x8xf32>
    %cst_89 = arith.constant dense<0.000000e+00> : vector<8x256xf32>
    %123 = tpu.matmul %122, %120, %cst_89 {dimension_numbers = #tpu.dot_dimension_numbers<[1], [0], [0], [1], [0, 0, 1, 1], [], []>, precision = #tpu.contract_precision<fp32>} : vector<8x8xf32>, vector<8x256xf32>, vector<8x256xf32> -> vector<8x256xf32>
    %124 = arith.addf %118, %123 : vector<8x256xf32>
    %c239_i32_90 = arith.constant 239 : i32
    %125 = tpu.dynamic_rotate %79 by %c239_i32_90 dim 1 : vector<8x256xf32>, i32 -> vector<8x256xf32>
    %126 = arith.mulf %125, %24 : vector<8x256xf32>
    %c1_91 = arith.constant 1 : index
    %c8_92 = arith.constant 8 : index
    %c0_93 = arith.constant 0 : index
    %c0_94 = arith.constant 0 : index
    %127 = vector.load %arg2[%c1_91, %c8_92, %c0_93, %c0_94] : memref<3x9x8x8xf32, #tpu.memory_space<vmem>>, vector<1x1x8x8xf32>
    %128 = vector.shape_cast %127 : vector<1x1x8x8xf32> to vector<8x8xf32>
    %cst_95 = arith.constant dense<0.000000e+00> : vector<8x256xf32>
    %129 = tpu.matmul %128, %126, %cst_95 {dimension_numbers = #tpu.dot_dimension_numbers<[1], [0], [0], [1], [0, 0, 1, 1], [], []>, precision = #tpu.contract_precision<fp32>} : vector<8x8xf32>, vector<8x256xf32>, vector<8x256xf32> -> vector<8x256xf32>
    %130 = arith.addf %124, %129 : vector<8x256xf32>
    %cst_96 = arith.constant 0.000000e+00 : f32
    %131 = vector.broadcast %cst_96 : f32 to vector<8x256xf32>
    %132 = arith.maximumf %130, %131 : vector<8x256xf32>
    %c17_i32_97 = arith.constant 17 : i32
    %133 = tpu.dynamic_rotate %132 by %c17_i32_97 dim 1 : vector<8x256xf32>, i32 -> vector<8x256xf32>
    %134 = arith.mulf %133, %21 : vector<8x256xf32>
    %c2_98 = arith.constant 2 : index
    %c0_99 = arith.constant 0 : index
    %c0_100 = arith.constant 0 : index
    %c0_101 = arith.constant 0 : index
    %135 = vector.load %arg2[%c2_98, %c0_99, %c0_100, %c0_101] : memref<3x9x8x8xf32, #tpu.memory_space<vmem>>, vector<1x1x8x8xf32>
    %136 = vector.shape_cast %135 : vector<1x1x8x8xf32> to vector<8x8xf32>
    %cst_102 = arith.constant dense<0.000000e+00> : vector<8x256xf32>
    %137 = tpu.matmul %136, %134, %cst_102 {dimension_numbers = #tpu.dot_dimension_numbers<[1], [0], [0], [1], [0, 0, 1, 1], [], []>, precision = #tpu.contract_precision<fp32>} : vector<8x8xf32>, vector<8x256xf32>, vector<8x256xf32> -> vector<8x256xf32>
    %c16_i32_103 = arith.constant 16 : i32
    %138 = tpu.dynamic_rotate %132 by %c16_i32_103 dim 1 : vector<8x256xf32>, i32 -> vector<8x256xf32>
    %139 = arith.mulf %138, %8 : vector<8x256xf32>
    %c2_104 = arith.constant 2 : index
    %c1_105 = arith.constant 1 : index
    %c0_106 = arith.constant 0 : index
    %c0_107 = arith.constant 0 : index
    %140 = vector.load %arg2[%c2_104, %c1_105, %c0_106, %c0_107] : memref<3x9x8x8xf32, #tpu.memory_space<vmem>>, vector<1x1x8x8xf32>
    %141 = vector.shape_cast %140 : vector<1x1x8x8xf32> to vector<8x8xf32>
    %cst_108 = arith.constant dense<0.000000e+00> : vector<8x256xf32>
    %142 = tpu.matmul %141, %139, %cst_108 {dimension_numbers = #tpu.dot_dimension_numbers<[1], [0], [0], [1], [0, 0, 1, 1], [], []>, precision = #tpu.contract_precision<fp32>} : vector<8x8xf32>, vector<8x256xf32>, vector<8x256xf32> -> vector<8x256xf32>
    %143 = arith.addf %137, %142 : vector<8x256xf32>
    %c15_i32_109 = arith.constant 15 : i32
    %144 = tpu.dynamic_rotate %132 by %c15_i32_109 dim 1 : vector<8x256xf32>, i32 -> vector<8x256xf32>
    %145 = arith.mulf %144, %22 : vector<8x256xf32>
    %c2_110 = arith.constant 2 : index
    %c2_111 = arith.constant 2 : index
    %c0_112 = arith.constant 0 : index
    %c0_113 = arith.constant 0 : index
    %146 = vector.load %arg2[%c2_110, %c2_111, %c0_112, %c0_113] : memref<3x9x8x8xf32, #tpu.memory_space<vmem>>, vector<1x1x8x8xf32>
    %147 = vector.shape_cast %146 : vector<1x1x8x8xf32> to vector<8x8xf32>
    %cst_114 = arith.constant dense<0.000000e+00> : vector<8x256xf32>
    %148 = tpu.matmul %147, %145, %cst_114 {dimension_numbers = #tpu.dot_dimension_numbers<[1], [0], [0], [1], [0, 0, 1, 1], [], []>, precision = #tpu.contract_precision<fp32>} : vector<8x8xf32>, vector<8x256xf32>, vector<8x256xf32> -> vector<8x256xf32>
    %149 = arith.addf %143, %148 : vector<8x256xf32>
    %c1_i32_115 = arith.constant 1 : i32
    %150 = tpu.dynamic_rotate %132 by %c1_i32_115 dim 1 : vector<8x256xf32>, i32 -> vector<8x256xf32>
    %151 = arith.mulf %150, %16 : vector<8x256xf32>
    %c2_116 = arith.constant 2 : index
    %c3_117 = arith.constant 3 : index
    %c0_118 = arith.constant 0 : index
    %c0_119 = arith.constant 0 : index
    %152 = vector.load %arg2[%c2_116, %c3_117, %c0_118, %c0_119] : memref<3x9x8x8xf32, #tpu.memory_space<vmem>>, vector<1x1x8x8xf32>
    %153 = vector.shape_cast %152 : vector<1x1x8x8xf32> to vector<8x8xf32>
    %cst_120 = arith.constant dense<0.000000e+00> : vector<8x256xf32>
    %154 = tpu.matmul %153, %151, %cst_120 {dimension_numbers = #tpu.dot_dimension_numbers<[1], [0], [0], [1], [0, 0, 1, 1], [], []>, precision = #tpu.contract_precision<fp32>} : vector<8x8xf32>, vector<8x256xf32>, vector<8x256xf32> -> vector<8x256xf32>
    %155 = arith.addf %149, %154 : vector<8x256xf32>
    %c2_121 = arith.constant 2 : index
    %c4_122 = arith.constant 4 : index
    %c0_123 = arith.constant 0 : index
    %c0_124 = arith.constant 0 : index
    %156 = vector.load %arg2[%c2_121, %c4_122, %c0_123, %c0_124] : memref<3x9x8x8xf32, #tpu.memory_space<vmem>>, vector<1x1x8x8xf32>
    %157 = vector.shape_cast %156 : vector<1x1x8x8xf32> to vector<8x8xf32>
    %cst_125 = arith.constant dense<0.000000e+00> : vector<8x256xf32>
    %158 = tpu.matmul %157, %132, %cst_125 {dimension_numbers = #tpu.dot_dimension_numbers<[1], [0], [0], [1], [0, 0, 1, 1], [], []>, precision = #tpu.contract_precision<fp32>} : vector<8x8xf32>, vector<8x256xf32>, vector<8x256xf32> -> vector<8x256xf32>
    %159 = arith.addf %155, %158 : vector<8x256xf32>
    %c255_i32_126 = arith.constant 255 : i32
    %160 = tpu.dynamic_rotate %132 by %c255_i32_126 dim 1 : vector<8x256xf32>, i32 -> vector<8x256xf32>
    %161 = arith.mulf %160, %20 : vector<8x256xf32>
    %c2_127 = arith.constant 2 : index
    %c5_128 = arith.constant 5 : index
    %c0_129 = arith.constant 0 : index
    %c0_130 = arith.constant 0 : index
    %162 = vector.load %arg2[%c2_127, %c5_128, %c0_129, %c0_130] : memref<3x9x8x8xf32, #tpu.memory_space<vmem>>, vector<1x1x8x8xf32>
    %163 = vector.shape_cast %162 : vector<1x1x8x8xf32> to vector<8x8xf32>
    %cst_131 = arith.constant dense<0.000000e+00> : vector<8x256xf32>
    %164 = tpu.matmul %163, %161, %cst_131 {dimension_numbers = #tpu.dot_dimension_numbers<[1], [0], [0], [1], [0, 0, 1, 1], [], []>, precision = #tpu.contract_precision<fp32>} : vector<8x8xf32>, vector<8x256xf32>, vector<8x256xf32> -> vector<8x256xf32>
    %165 = arith.addf %159, %164 : vector<8x256xf32>
    %c241_i32_132 = arith.constant 241 : i32
    %166 = tpu.dynamic_rotate %132 by %c241_i32_132 dim 1 : vector<8x256xf32>, i32 -> vector<8x256xf32>
    %167 = arith.mulf %166, %23 : vector<8x256xf32>
    %c2_133 = arith.constant 2 : index
    %c6_134 = arith.constant 6 : index
    %c0_135 = arith.constant 0 : index
    %c0_136 = arith.constant 0 : index
    %168 = vector.load %arg2[%c2_133, %c6_134, %c0_135, %c0_136] : memref<3x9x8x8xf32, #tpu.memory_space<vmem>>, vector<1x1x8x8xf32>
    %169 = vector.shape_cast %168 : vector<1x1x8x8xf32> to vector<8x8xf32>
    %cst_137 = arith.constant dense<0.000000e+00> : vector<8x256xf32>
    %170 = tpu.matmul %169, %167, %cst_137 {dimension_numbers = #tpu.dot_dimension_numbers<[1], [0], [0], [1], [0, 0, 1, 1], [], []>, precision = #tpu.contract_precision<fp32>} : vector<8x8xf32>, vector<8x256xf32>, vector<8x256xf32> -> vector<8x256xf32>
    %171 = arith.addf %165, %170 : vector<8x256xf32>
    %c240_i32_138 = arith.constant 240 : i32
    %172 = tpu.dynamic_rotate %132 by %c240_i32_138 dim 1 : vector<8x256xf32>, i32 -> vector<8x256xf32>
    %173 = arith.mulf %172, %12 : vector<8x256xf32>
    %c2_139 = arith.constant 2 : index
    %c7_140 = arith.constant 7 : index
    %c0_141 = arith.constant 0 : index
    %c0_142 = arith.constant 0 : index
    %174 = vector.load %arg2[%c2_139, %c7_140, %c0_141, %c0_142] : memref<3x9x8x8xf32, #tpu.memory_space<vmem>>, vector<1x1x8x8xf32>
    %175 = vector.shape_cast %174 : vector<1x1x8x8xf32> to vector<8x8xf32>
    %cst_143 = arith.constant dense<0.000000e+00> : vector<8x256xf32>
    %176 = tpu.matmul %175, %173, %cst_143 {dimension_numbers = #tpu.dot_dimension_numbers<[1], [0], [0], [1], [0, 0, 1, 1], [], []>, precision = #tpu.contract_precision<fp32>} : vector<8x8xf32>, vector<8x256xf32>, vector<8x256xf32> -> vector<8x256xf32>
    %177 = arith.addf %171, %176 : vector<8x256xf32>
    %c239_i32_144 = arith.constant 239 : i32
    %178 = tpu.dynamic_rotate %132 by %c239_i32_144 dim 1 : vector<8x256xf32>, i32 -> vector<8x256xf32>
    %179 = arith.mulf %178, %24 : vector<8x256xf32>
    %c2_145 = arith.constant 2 : index
    %c8_146 = arith.constant 8 : index
    %c0_147 = arith.constant 0 : index
    %c0_148 = arith.constant 0 : index
    %180 = vector.load %arg2[%c2_145, %c8_146, %c0_147, %c0_148] : memref<3x9x8x8xf32, #tpu.memory_space<vmem>>, vector<1x1x8x8xf32>
    %181 = vector.shape_cast %180 : vector<1x1x8x8xf32> to vector<8x8xf32>
    %cst_149 = arith.constant dense<0.000000e+00> : vector<8x256xf32>
    %182 = tpu.matmul %181, %179, %cst_149 {dimension_numbers = #tpu.dot_dimension_numbers<[1], [0], [0], [1], [0, 0, 1, 1], [], []>, precision = #tpu.contract_precision<fp32>} : vector<8x8xf32>, vector<8x256xf32>, vector<8x256xf32> -> vector<8x256xf32>
    %183 = arith.addf %177, %182 : vector<8x256xf32>
    %cst_150 = arith.constant 0.000000e+00 : f32
    %184 = vector.broadcast %cst_150 : f32 to vector<8x256xf32>
    %185 = arith.maximumf %183, %184 : vector<8x256xf32>
    %c0_151 = arith.constant 0 : index
    %c0_152 = arith.constant 0 : index
    %c0_153 = arith.constant 0 : index
    %186 = vector.load %arg3[%c0_151, %c0_152, %c0_153] : memref<1x8x256xf32, #tpu.memory_space<vmem>>, vector<1x8x256xf32>
    %187 = vector.shape_cast %186 : vector<1x8x256xf32> to vector<8x256xf32>
    %188 = vector.shape_cast %185 : vector<8x256xf32> to vector<1x8x256xf32>
    tpu.vector_store %arg3[%c0_151, %c0_152, %c0_153], %188 {strides = array<i32>} : memref<1x8x256xf32, #tpu.memory_space<vmem>>, vector<1x8x256xf32>,
    return
  }
  func.func @transform_0(%arg0: i32) -> (i32, i32, i32) {
    %c0_i32 = arith.constant 0 : i32
    %c0_i32_0 = arith.constant 0 : i32
    %c0_i32_1 = arith.constant 0 : i32
    return %arg0, %c0_i32, %c0_i32_0 : i32, i32, i32
  }
  func.func @transform_1(%arg0: i32) -> (i32, i32, i32, i32) {
    %c0_i32 = arith.constant 0 : i32
    %c0_i32_0 = arith.constant 0 : i32
    %c0_i32_1 = arith.constant 0 : i32
    %c0_i32_2 = arith.constant 0 : i32
    %c0_i32_3 = arith.constant 0 : i32
    return %c0_i32, %c0_i32_0, %c0_i32_1, %c0_i32_2 : i32, i32, i32, i32
  }
  func.func @transform_2(%arg0: i32) -> (i32, i32, i32) {
    %c0_i32 = arith.constant 0 : i32
    %c0_i32_0 = arith.constant 0 : i32
    %c0_i32_1 = arith.constant 0 : i32
    return %arg0, %c0_i32, %c0_i32_0 : i32, i32, i32
  }
}

</mosaic_0001>

<bundles_post_ra>
// kernel: tpu_custom_call.1
= control target key start
LH: loop header
LB: loop body
LE: loop exit
PB: predicated region body
PF: predicated region fallthrough
CT: control target
= control target key end

     0   :  { %7 = vsyncpa [#allocation3], 0  ;;  %s10278_s0 = inlined_call_operand.vmem [shape: f32[2,8,256], index: 0, kind: input, shape index: {}]   ;;  %s10279_s1 = inlined_call_operand.vmem [shape: f32[3,9,8,8], index: 1, kind: input, shape index: {}]   ;;  %s10280_s2 = inlined_call_operand.hbm [shape: f32[2,8,256], index: 2, kind: output, shape index: {}]  }
   0x1   :  { %9 = vsyncpa [#allocation3 + $0x1], 0  ;;  %s8712_s9 = smov 0   ;;  %s8714_s10 = smov 0  }
   0x2   :  { %s8716_s11 = smov 0   ;;  %s8718_s12 = smov 0  }
   0x3 LB: > { %s8733_s13 = sadd.s32 4294967295, %s8686_s12   ;;  %s8528_s14 = sadd.s32 4294967294, %s8686_s12   ;;  %s8686_s12 = sphi %s8718_s12, %s10476_s12   ;;  %s8682_s11 = sphi %s8716_s11, %s10475_s11   ;;  %s8678_s10 = sphi %s8714_s10, %s10474_s10   ;;  %s8674_s9 = sphi %s8712_s9, %s10473_s9  }
   0x4   : > { %s8737_s15 = sadd.s32 1, %s8686_s12   ;;  %s69_s16 = sadd.s32 1, %s8682_s11 }
   0x5   : > { %s66_s17 = ssub.s32 %s8686_s12, %s8737_s15  ;;  %p79_p0 = scmp.ne.s32.totalorder %s8682_s11, %s8678_s10 }
   0x6   : > { %p67_p1 = scmp.eq.s32.totalorder %s66_s17, 0  ;;  %p80_p2 = scmp.eq.s32.totalorder %s8733_s13, 1 }
   0x7   : > { %p85_p3 = scmp.ne.s32.totalorder %s8678_s10, %s8674_s9  ;;  %p86_p4 = scmp.eq.s32.totalorder %s8528_s14, 1 }
   0x8   : > { %s8748_s18 = scalar_select %p67_p1, %s8682_s11, %s69_s16  }
   0x9   : > { %p8750_p5 = por %p80_p2, %p79_p0  ;;  %p8754_p6 = por %p86_p4, %p85_p3 }
   0xa   : > { %p8531_p7 = scmp.ge.s32.totalorder %s8686_s12, 1  ;;  %p115_p8 = scmp.lt.s32.totalorder %s8686_s12, 3 }
   0xc   : > { %p116_p9 = pnand %p8531_p7, %p115_p8 }
   0xe   : > { %119 = sbr.rel (%p116_p9) target bundleno = 1444 (0x5a4), region = 28 }
  0x13   : > { %p137_p10 = scmp.lt.s32.totalorder %s8733_s13, 1  ;;  %s8688_s26 = smov 16   ;;  %v142_v2 = vlaneseq  ;;  %v8543_v3 = vld [vmem:[%s10279_s1 + $0x8] sm:$0xff]  ;;  %vm204_vm0 = vcmask 64512   ;;  %v8696_v16 = vmov 0.0   ;;  %v192_v39 = vld [vmem:[%s10279_s1] sm:$0xff] }
  0x14   : > { %s8689_s27 = smov 17   ;;  %s8690_s28 = smov 15   ;;  %v206_v5 = vsel %vm204_vm0, %v8543_v3, 0  ;;  %v501_v44 = vsel %vm204_vm0, %v192_v39, 0 }
  0x15   : > { %s138_s21 = scalar_select %p137_p10, %s8733_s13, 1  ;;  %v8804_v4 = vand.u32 127, %v142_v2  ;;  %v8810_v7 = vand.u32 4294901760, %v206_v5  ;;  %v8880_v50 = vand.u32 4294901760, %v501_v44 }
  0x16   : > { %s8691_s29 = smov 1   ;;  %s8692_s30 = smov 127  }
  0x17   : > { %s8574_s22 = sshll.u32 %s138_s21, 4  ;;  %s8693_s3 = smov 113   ;;  %10318 = vst [vmem:[#allocation5_spill] sm:$0xff] %v8804_v4  ;;  %v8808_v6 = vadd.s32 128, %v8804_v4  ;;  %v147_v9 = vand.u32 15, %v8804_v4  ;;  %v145_v10 = vshra.s32 %v8804_v4, 4  ;;  %v8817_v12 = vsub.f32 %v206_v5, %v8810_v7 }
  0x18   : > { %s141_s25 = scalar_lea.vmem %s10278_s0, %s8574_s22  ;;  %s8694_s4 = smov 112   ;;  %vm197_vm5 = vcmp.lt.s32.totalorder %v8804_v4, 16  ;;  %vm187_vm6 = vcmp.lt.s32.totalorder %v8804_v4, 17  ;;  %v8886_v55 = vsub.f32 %v501_v44, %v8880_v50  ;;  %vm799_vm9 = vcmp.lt.s32.totalorder %v8804_v4, 15 }
  0x19   : > { %v8765_v0 = vld [vmem:[%s141_s25] sm:$0xff]  ;;  %v8773_v1 = vld [vmem:[%s141_s25 + $0x8] sm:$0xff]  ;;  %s8695_s5 = smov 111   ;;  %v148_v8 = vand.u32 15, %v8808_v6  ;;  %v146_v11 = vshra.s32 %v8808_v6, 4  ;;  %vm161_vm1 = vcmp.ge.s32.totalorder %v147_v9, 1 }
  0x1a   : > { %193 = vrot.lane.b32.xlu0 %v8765_v0, %s8688_s26  ;;  %183 = vrot.lane.b32.xlu1 %v8765_v0, %s8689_s27  ;;  %vm149_vm3 = vcmp.ge.s32.totalorder %v145_v10, 1  ;;  %v8828_v15 = vand.u32 4294901760, %v8817_v12  ;;  %v8831_v17 = vsel %vm161_vm1, 1.0, %v8696_v16  ;;  %vm167_vm7 = vcmp.le.s32.totalorder %v147_v9, 14  ;;  %s134_s8 = sand.u32 1, %s8678_s10   ;;  %s8644_s22 = scalar_lea.hbm %s10280_s2, 32 }
  0x1b   : > { %795 = vrot.lane.b32.xlu2 %v8765_v0, %s8690_s28  ;;  %vm162_vm2 = vcmp.ge.s32.totalorder %v148_v8, 1  ;;  %vm150_vm4 = vcmp.ge.s32.totalorder %v146_v11, 1  ;;  %10319 = vst [vmem:[#allocation6_spill] sm:$0xff] %v8831_v17  ;;  %v8837_v19 = vsel %vm149_vm3, 1.0, %v8696_v16  ;;  %vm168_vm8 = vcmp.le.s32.totalorder %v148_v8, 14 }
  0x1c   : > { %v8834_v18 = vsel %vm162_vm2, 1.0, %v8696_v16  ;;  %10321 = vst [vmem:[#allocation8_spill] sm:$0xff] %v8837_v19  ;;  %v8840_v20 = vsel %vm150_vm4, 1.0, %v8696_v16  ;;  %v8845_v21 = vmul.f32 %v8831_v17, %v8837_v19  ;;  %v228_v23 = vsub.f32 %v8817_v12, %v8828_v15 }
  0x1d   : > { %10320 = vst [vmem:[#allocation7_spill] sm:$0xff] %v8834_v18  ;;  %v8849_v22 = vmul.f32 %v8834_v18, %v8840_v20  ;;  %v8896_v58 = vsel %vm167_vm7, 1.0, %v8696_v16  ;;  %v8899_v59 = vsel %vm168_vm8, 1.0, %v8696_v16  ;;  %v8903_v60 = vand.u32 4294901760, %v8886_v55 }
  0x1e   : > { %10322 = vst [vmem:[#allocation9_spill] sm:$0xff] %v8840_v20  ;;  %v229_v34 = vand.u32 4294901760, %v228_v23  ;;  %v8908_v2 = vmul.f32 %v8896_v58, %v8837_v19  ;;  %v8912_v3 = vmul.f32 %v8899_v59, %v8840_v20  ;;  %vm1107_vm10 = vcmp.lt.s32.totalorder %v8804_v4, 1 }
  0x1f   : > { %10323 = vst [vmem:[#allocation10_spill] sm:$0xff] %v8845_v21  ;;  %v523_v9 = vsub.f32 %v8886_v55, %v8903_v60  ;;  %vm1714_vm11 = vcmp.lt.s32.totalorder %v8804_v4, 127  ;;  %vm155_vm12 = vcmp.le.s32.totalorder %v145_v10, 14  ;;  %vm156_vm13 = vcmp.le.s32.totalorder %v146_v11, 14 }
  0x20   : > { %10324 = vst [vmem:[#allocation11_spill] sm:$0xff] %v8849_v22  ;;  %v9039_v10 = vsel %vm155_vm12, 1.0, %v8696_v16  ;;  %v9042_v11 = vsel %vm156_vm13, 1.0, %v8696_v16  ;;  %vm2022_vm14 = vcmp.lt.s32.totalorder %v8804_v4, 113  ;;  %vm2330_vm15 = vcmp.lt.s32.totalorder %v8804_v4, 112 }
  0x21   : > { %10325 = vst [vmem:[#allocation12_spill] sm:$0xff] %v8896_v58  ;;  %v524_v23 = vand.u32 4294901760, %v523_v9  ;;  %vm2638_vm1 = vcmp.lt.s32.totalorder %v8804_v4, 111 }
  0x22   : > { %195 = vrot.lane.b32.xlu0 %v8773_v1, %s8688_s26  ;;  %185 = vrot.lane.b32.xlu1 %v8773_v1, %s8689_s27  ;;  %10326 = vst [vmem:[#allocation13_spill] sm:$0xff] %v8899_v59 }
  0x23   : > { %797 = vrot.lane.b32.xlu2 %v8773_v1, %s8690_s28  ;;  %10327 = vst [vmem:[#allocation14_spill] sm:$0xff] %v8908_v2 }
  0x24   : > { %10328 = vst [vmem:[#allocation15_spill] sm:$0xff] %v8912_v3 }
  0x25   : > { %10329 = vst [vmem:[#allocation16_spill] sm:$0xff] %v9039_v10 }
  0x26   : > { %10330 = vst [vmem:[#allocation17_spill] sm:$0xff] %v9042_v11 }
  0x2a   : > { %1105 = vrot.lane.b32.xlu1 %v8773_v1, %s8691_s29  ;;  %1103 = vrot.lane.b32.xlu0 %v8765_v0, %s8691_s29 }
  0x2b   : > { %1710 = vrot.lane.b32.xlu2 %v8765_v0, %s8692_s30 }
  0x32   : > { %1712 = vrot.lane.b32.xlu0 %v8773_v1, %s8692_s30  ;;  %2018 = vrot.lane.b32.xlu1 %v8765_v0, %s8693_s3 }
  0x33   : > { %2020 = vrot.lane.b32.xlu2 %v8773_v1, %s8693_s3 }
  0x3a   : > { %2328 = vrot.lane.b32.xlu1 %v8773_v1, %s8694_s4  ;;  %2326 = vrot.lane.b32.xlu0 %v8765_v0, %s8694_s4 }
  0x3b   : > { %2634 = vrot.lane.b32.xlu2 %v8765_v0, %s8695_s5 }
  0x42   : > { %2636 = vrot.lane.b32.xlu0 %v8773_v1, %s8695_s5 }
  0x75   : > { %v796_v47 = vpop.permute.xlu2 %795 }
  0x7d   : > { %v798_v61 = vpop.permute.xlu2 %797 }
  0x7e   : > { %v800_v5 = vsel %vm799_vm9, %v796_v47, %v798_v61  ;;  %v801_v8 = vsel %vm799_vm9, %v798_v61, %v796_v47 }
  0x8c   : > { %v194_v13 = vpop.permute.xlu0 %193  ;;  %v184_v14 = vpop.permute.xlu1 %183 }
  0x94   : > { %v196_v24 = vpop.permute.xlu0 %195  ;;  %v186_v25 = vpop.permute.xlu1 %185 }
  0x95   : > { %v198_v26 = vsel %vm197_vm5, %v194_v13, %v196_v24  ;;  %v199_v27 = vsel %vm197_vm5, %v196_v24, %v194_v13  ;;  %v188_v28 = vsel %vm187_vm6, %v184_v14, %v186_v25  ;;  %v189_v29 = vsel %vm187_vm6, %v186_v25, %v184_v14 }
  0x96   : > { %v200_v30 = vmul.f32 %v8837_v19, %v199_v27  ;;  %v201_v31 = vmul.f32 %v8840_v20, %v198_v26  ;;  %v190_v32 = vmul.f32 %v189_v29, %v8845_v21  ;;  %v191_v33 = vmul.f32 %v188_v28, %v8849_v22 }
  0x97   : > { %v802_v13 = vmul.f32 %v801_v8, %v8908_v2  ;;  %v803_v14 = vmul.f32 %v800_v5, %v8912_v3  ;;  %v8546_v5 = vld [vmem:[%s10279_s1 + $0x20] sm:$0xff]  ;;  %v8983_v8 = vand.u32 4294901760, %v8773_v1 }
  0x98   : > { %v223_v35 = vand.u32 4294901760, %v200_v30  ;;  %v369_v36 = vand.u32 4294901760, %v201_v31  ;;  %v8866_v37 = vand.u32 4294901760, %v190_v32  ;;  %v8868_v38 = vand.u32 4294901760, %v191_v33 }
  0x99   : > { %v824_v24 = vand.u32 4294901760, %v802_v13  ;;  %v8927_v25 = vand.u32 4294901760, %v803_v14  ;;  %v1414_v9 = vsel %vm204_vm0, %v8546_v5, 0 }
  0x9a   : > { %v396_v40 = vsub.f32 %v201_v31, %v369_v36  ;;  %224 = vmatpush.msra.mxu0 %v223_v35  ;;  %300 = vmatpush.msra.mxu3 %v223_v35  ;;  %v250_v41 = vsub.f32 %v200_v30, %v223_v35  ;;  %v545_v45 = vsub.f32 %v190_v32, %v8866_v37 }
  0x9b   : > { %230 = vmatmul.f32.vlgmr.msra.gmra.mxu0 %v229_v34  ;;  %304 = vmatmul.f32.vlgmr.msra.gmra.mxu3 %v8828_v15  ;;  %v8878_v46 = vsub.f32 %v191_v33, %v8868_v38  ;;  %v997_v27 = vsub.f32 %v803_v14, %v8927_v25  ;;  %v1604_v14 = vsub.f32 %v8773_v1, %v8983_v8 }
  0x9c   : > { %277 = vmatpush.msra.mxu2 %v250_v41  ;;  %v251_v42 = vand.u32 4294901760, %v250_v41  ;;  %v397_v43 = vand.u32 4294901760, %v396_v40  ;;  %v546_v54 = vand.u32 4294901760, %v545_v45  ;;  %v1106_v33 = vpop.permute.xlu1 %1105 }
  0x9d   : > { %280 = vmatmul.f32.vlgmr.msra.gmra.mxu2 %v8817_v12  ;;  %v692_v53 = vand.u32 4294901760, %v8878_v46 }
  0x9e   : > { %370 = vmatpush.msrb.mxu2 %v369_v36  ;;  %326 = vmatpush.msrb.mxu0 %v251_v42  ;;  %v252_v48 = vsub.f32 %v250_v41, %v251_v42  ;;  %v398_v49 = vsub.f32 %v396_v40, %v397_v43  ;;  %v547_v56 = vsub.f32 %v545_v45, %v546_v54 }
  0x9f   : > { %v693_v57 = vsub.f32 %v8878_v46, %v692_v53 }
  0xa0   : > { %472 = vmatpush.msra.mxu2 %v397_v43  ;;  %423 = vmatpush.msra.mxu0 %v396_v40  ;;  %v253_v51 = vand.u32 4294901760, %v252_v48  ;;  %v399_v52 = vand.u32 4294901760, %v398_v49  ;;  %v548_v62 = vand.u32 4294901760, %v547_v56 }
  0xa1   : > { %v694_v63 = vand.u32 4294901760, %v693_v57 }
  0xa2   : > { %254 = vmatpush.msra.mxu1 %v253_v51  ;;  %400 = vmatpush.msrb.mxu3 %v399_v52 }
  0xa3   : > { %256 = vmatmul.f32.vlgmr.msra.gmra.mxu1 %v8810_v7  ;;  %328 = vmatmul.f32.vlgmr.msrb.gmra.mxu0 %v8810_v7 }
  0xa4   : > { %348 = vmatpush.msrb.mxu1 %v223_v35  ;;  %402 = vmatmul.f32.vlgmr.msrb.gmra.mxu3 %v8810_v7 }
  0xa5   : > { %494 = vmatpush.msra.mxu3 %v369_v36  ;;  %376 = vmatmul.f32.vlgmr.msrb.gmra.mxu2 %v229_v34  ;;  %v1104_v34 = vpop.permute.xlu0 %1103 }
  0xa6   : > { %446 = vmatpush.msra.mxu1 %v369_v36  ;;  %519 = vmatpush.msrb.mxu0 %v8866_v37  ;;  %v1109_v39 = vsel %vm1107_vm10, %v1106_v33, %v1104_v34  ;;  %v1108_v40 = vsel %vm1107_vm10, %v1104_v34, %v1106_v33 }
  0xa7   : > { %572 = vmatpush.msrb.mxu2 %v545_v45  ;;  %595 = vmatpush.msrb.mxu3 %v8866_v37  ;;  %v1110_v41 = vmul.f32 %v8831_v17, %v1109_v39  ;;  %v1111_v42 = vmul.f32 %v8834_v18, %v1108_v40 }
  0xa9   : > { %v1132_v44 = vand.u32 4294901760, %v1110_v41  ;;  %v1278_v45 = vand.u32 4294901760, %v1111_v42 }
  0xab   : > { %350 = vmatmul.f32.vlgmr.msrb.gmra.mxu1 %v8810_v7  ;;  %426 = vmatmul.f32.vlgmr.msra.gmra.mxu0 %v8817_v12  ;;  %v8544_v12 = vld [vmem:[%s10279_s1 + $0x10] sm:$0xff]  ;;  %v1159_v47 = vsub.f32 %v1110_v41, %v1132_v44  ;;  %v1305_v49 = vsub.f32 %v1111_v42, %v1278_v45 }
  0xac   : > { %496 = vmatmul.f32.vlgmr.msra.gmra.mxu3 %v8810_v7  ;;  %621 = vmatpush.msra.mxu0 %v546_v54  ;;  %v807_v26 = vsel %vm204_vm0, %v8544_v12, 0 }
  0xad   : > { %549 = vmatpush.msrb.mxu1 %v548_v62  ;;  %695 = vmatpush.msra.mxu3 %v694_v63  ;;  %v8940_v28 = vand.u32 4294901760, %v807_v26  ;;  %v1160_v51 = vand.u32 4294901760, %v1159_v47  ;;  %v1306_v52 = vand.u32 4294901760, %v1305_v49  ;;  %v1431_v63 = vand.u32 4294901760, %v8765_v0 }
  0xae   : > { %474 = vmatmul.f32.vlgmr.msra.gmra.mxu2 %v8810_v7  ;;  %v851_v7 = vsub.f32 %v802_v13, %v824_v24 }
  0xaf   : > { %665 = vmatpush.msra.mxu2 %v8868_v38  ;;  %v827_v30 = vsub.f32 %v807_v26, %v8940_v28  ;;  %v1161_v54 = vsub.f32 %v1159_v47, %v1160_v51  ;;  %v1458_v13 = vsub.f32 %v8765_v0, %v1431_v63  ;;  %v1711_v26 = vpop.permute.xlu2 %1710 }
  0xb0   : > { %v852_v29 = vand.u32 4294901760, %v851_v7 }
  0xb1   : > { %v828_v35 = vand.u32 4294901760, %v827_v30  ;;  %v1162_v57 = vand.u32 4294901760, %v1161_v54 }
  0xb2   : > { %v853_v31 = vsub.f32 %v851_v7, %v852_v29 }
  0xb3   : > { %450 = vmatmul.f32.vlgmr.msra.gmra.mxu1 %v8828_v15  ;;  %525 = vmatmul.f32.vlgmr.msrb.gmra.mxu0 %v524_v23  ;;  %v998_v15 = vand.u32 4294901760, %v997_v27 }
  0xb4   : > { %599 = vmatmul.f32.vlgmr.msrb.gmra.mxu3 %v8903_v60  ;;  %643 = vmatpush.msra.mxu1 %v8866_v37  ;;  %v854_v36 = vand.u32 4294901760, %v853_v31 }
  0xb5   : > { %718 = vmatpush.msrb.mxu0 %v8878_v46  ;;  %789 = vmatpush.msrb.mxu3 %v8868_v38  ;;  %v999_v32 = vsub.f32 %v997_v27, %v998_v15  ;;  %v8545_v46 = vld [vmem:[%s10279_s1 + $0x18] sm:$0xff] }
  0xb6   : > { %575 = vmatmul.f32.vlgmr.msrb.gmra.mxu2 %v8886_v55  ;;  %v1115_v48 = vsel %vm204_vm0, %v8545_v46, 0 }
  0xb7   : > { %767 = vmatpush.msrb.mxu2 %v692_v53  ;;  %v1000_v37 = vand.u32 4294901760, %v999_v32  ;;  %v2021_v6 = vpop.permute.xlu2 %2020 }
  0xbb   : > { %551 = vmatmul.f32.vlgmr.msrb.gmra.mxu1 %v8880_v50  ;;  %623 = vmatmul.f32.vlgmr.msra.gmra.mxu0 %v8880_v50 }
  0xbc   : > { %697 = vmatmul.f32.vlgmr.msra.gmra.mxu3 %v8880_v50  ;;  %741 = vmatpush.msrb.mxu1 %v8868_v38  ;;  %v829_v38 = vsub.f32 %v827_v30, %v828_v35 }
  0xbd   : > { %825 = vmatpush.msra.mxu0 %v824_v24  ;;  %901 = vmatpush.msra.mxu3 %v824_v24 }
  0xbe   : > { %671 = vmatmul.f32.vlgmr.msra.gmra.mxu2 %v524_v23  ;;  %v830_v43 = vand.u32 4294901760, %v829_v38  ;;  %v8990_v23 = vand.u32 4294901760, %v1414_v9 }
  0xbf   : > { %878 = vmatpush.msra.mxu2 %v851_v7  ;;  %v1713_v7 = vpop.permute.xlu0 %1712 }
  0xc0   : > { %v8995_v12 = vsub.f32 %v1414_v9, %v8990_v23 }
  0xc3   : > { %645 = vmatmul.f32.vlgmr.msra.gmra.mxu1 %v8880_v50  ;;  %721 = vmatmul.f32.vlgmr.msrb.gmra.mxu0 %v8886_v55  ;;  %v1307_v55 = vsub.f32 %v1305_v49, %v1306_v52 }
  0xc4   : > { %791 = vmatmul.f32.vlgmr.msrb.gmra.mxu3 %v8880_v50  ;;  %927 = vmatpush.msrb.mxu0 %v852_v29  ;;  %v1715_v29 = vsel %vm1714_vm11, %v1711_v26, %v1713_v7 }
  0xc5   : > { %855 = vmatpush.msra.mxu1 %v854_v36  ;;  %1001 = vmatpush.msrb.mxu3 %v1000_v37  ;;  %v1717_v32 = vmul.f32 %v8896_v58, %v1715_v29  ;;  %v8547_v37 = vld [vmem:[%s10279_s1 + $0x28] sm:$0xff] }
  0xc6   : > { %769 = vmatmul.f32.vlgmr.msrb.gmra.mxu2 %v8880_v50  ;;  %v8965_v50 = vand.u32 4294901760, %v1115_v48  ;;  %v1722_v40 = vsel %vm204_vm0, %v8547_v37, 0 }
  0xc7   : > { %971 = vmatpush.msrb.mxu2 %v8927_v25  ;;  %v9025_v41 = vand.u32 4294901760, %v1722_v40 }
  0xc8   : > { %v1135_v53 = vsub.f32 %v1115_v48, %v8965_v50 }
  0xca   : > { %v8972_v56 = vand.u32 4294901760, %v1135_v53 }
  0xcb   : > { %745 = vmatmul.f32.vlgmr.msrb.gmra.mxu1 %v8903_v60  ;;  %831 = vmatmul.f32.vlgmr.msra.gmra.mxu0 %v830_v43  ;;  %v1308_v60 = vand.u32 4294901760, %v1307_v55 }
  0xcc   : > { %905 = vmatmul.f32.vlgmr.msra.gmra.mxu3 %v828_v35  ;;  %949 = vmatpush.msrb.mxu1 %v824_v24  ;;  %v1137_v61 = vsub.f32 %v1135_v53, %v8972_v56  ;;  %v1459_v24 = vand.u32 4294901760, %v1458_v13 }
  0xcd   : > { %1024 = vmatpush.msra.mxu0 %v997_v27  ;;  %1095 = vmatpush.msra.mxu3 %v8927_v25  ;;  %v9000_v27 = vand.u32 4294901760, %v8995_v12 }
  0xce   : > { %881 = vmatmul.f32.vlgmr.msra.gmra.mxu2 %v827_v30  ;;  %v1138_v62 = vand.u32 4294901760, %v1137_v61  ;;  %v1460_v0 = vsub.f32 %v1458_v13, %v1459_v24 }
  0xcf   : > { %1073 = vmatpush.msra.mxu2 %v998_v15  ;;  %v1436_v31 = vsub.f32 %v8995_v12, %v9000_v27 }
  0xd1   : > { %v1437_v34 = vand.u32 4294901760, %v1436_v31 }
  0xd3   : > { %857 = vmatmul.f32.vlgmr.msra.gmra.mxu1 %v8940_v28  ;;  %929 = vmatmul.f32.vlgmr.msrb.gmra.mxu0 %v8940_v28 }
  0xd4   : > { %1003 = vmatmul.f32.vlgmr.msrb.gmra.mxu3 %v8940_v28  ;;  %1047 = vmatpush.msra.mxu1 %v8927_v25  ;;  %v1605_v25 = vand.u32 4294901760, %v1604_v14 }
  0xd5   : > { %1133 = vmatpush.msrb.mxu0 %v1132_v44  ;;  %1209 = vmatpush.msrb.mxu3 %v1132_v44 }
  0xd6   : > { %977 = vmatmul.f32.vlgmr.msrb.gmra.mxu2 %v830_v43  ;;  %v1606_v1 = vsub.f32 %v1604_v14, %v1605_v25 }
  0xd7   : > { %1186 = vmatpush.msrb.mxu2 %v1159_v47  ;;  %v2019_v47 = vpop.permute.xlu1 %2018 }
  0xd8   : > { %v1607_v15 = vand.u32 4294901760, %v1606_v1  ;;  %v2023_v16 = vsel %vm2022_vm14, %v2019_v47, %v2021_v6 }
  0xdb   : > { %951 = vmatmul.f32.vlgmr.msrb.gmra.mxu1 %v8940_v28  ;;  %1027 = vmatmul.f32.vlgmr.msra.gmra.mxu0 %v827_v30  ;;  %v1716_v30 = vsel %vm1714_vm11, %v1713_v7, %v1711_v26  ;;  %v2327_v26 = vpop.permute.xlu0 %2326 }
  0xdc   : > { %1097 = vmatmul.f32.vlgmr.msra.gmra.mxu3 %v8940_v28  ;;  %1163 = vmatpush.msrb.mxu1 %v1162_v57  ;;  %v1718_v33 = vmul.f32 %v8899_v59, %v1716_v30 }
  0xdd   : > { %1235 = vmatpush.msra.mxu0 %v1160_v51  ;;  %1309 = vmatpush.msra.mxu3 %v1308_v60 }
  0xde   : > { %1075 = vmatmul.f32.vlgmr.msra.gmra.mxu2 %v8940_v28  ;;  %v1461_v28 = vand.u32 4294901760, %v1460_v0  ;;  %v9014_v36 = vand.u32 4294901760, %v1718_v33 }
  0xdf   : > { %1279 = vmatpush.msra.mxu2 %v1278_v45  ;;  %v2329_v0 = vpop.permute.xlu1 %2328 }
  0xe0   : > { %v1912_v38 = vsub.f32 %v1718_v33, %v9014_v36  ;;  %v2332_v33 = vsel %vm2330_vm15, %v2329_v0, %v2327_v26 }
  0xe2   : > { %v1913_v43 = vand.u32 4294901760, %v1912_v38 }
  0xe3   : > { %1051 = vmatmul.f32.vlgmr.msra.gmra.mxu1 %v828_v35  ;;  %1139 = vmatmul.f32.vlgmr.msrb.gmra.mxu0 %v1138_v62  ;;  %v1739_v35 = vand.u32 4294901760, %v1717_v32 }
  0xe4   : > { %1213 = vmatmul.f32.vlgmr.msrb.gmra.mxu3 %v8972_v56  ;;  %1257 = vmatpush.msra.mxu1 %v1132_v44  ;;  %v9034_v44 = vsub.f32 %v1722_v40, %v9025_v41  ;;  %v1914_v46 = vsub.f32 %v1912_v38, %v1913_v43 }
  0xe5   : > { %1332 = vmatpush.msrb.mxu0 %v1305_v49  ;;  %1403 = vmatpush.msrb.mxu3 %v1278_v45  ;;  %v1766_v39 = vsub.f32 %v1717_v32, %v1739_v35  ;;  %v2331_v32 = vsel %vm2330_vm15, %v2327_v26, %v2329_v0 }
  0xe6   : > { %1189 = vmatmul.f32.vlgmr.msrb.gmra.mxu2 %v1135_v53  ;;  %v9046_v48 = vand.u32 4294901760, %v9034_v44  ;;  %v1915_v51 = vand.u32 4294901760, %v1914_v46 }
  0xe7   : > { %1381 = vmatpush.msrb.mxu2 %v1306_v52  ;;  %v1767_v42 = vand.u32 4294901760, %v1766_v39  ;;  %v9054_v52 = vmul.f32 %v8834_v18, %v9042_v11 }
  0xe8   : > { %v1744_v54 = vsub.f32 %v9034_v44, %v9046_v48 }
  0xe9   : > { %10332 = vst [vmem:[#allocation19_spill] sm:$0xff] %v9054_v52 }
  0xea   : > { %v1745_v57 = vand.u32 4294901760, %v1744_v54 }
  0xeb   : > { %1165 = vmatmul.f32.vlgmr.msrb.gmra.mxu1 %v8965_v50  ;;  %1237 = vmatmul.f32.vlgmr.msra.gmra.mxu0 %v8965_v50 }
  0xec   : > { %1311 = vmatmul.f32.vlgmr.msra.gmra.mxu3 %v8965_v50  ;;  %1355 = vmatpush.msrb.mxu1 %v1278_v45  ;;  %v1768_v45 = vsub.f32 %v1766_v39, %v1767_v42 }
  0xed   : > { %1432 = vmatpush.msra.mxu0 %v1431_v63  ;;  %1508 = vmatpush.msra.mxu3 %v1431_v63 }
  0xee   : > { %1285 = vmatmul.f32.vlgmr.msra.gmra.mxu2 %v1138_v62  ;;  %v1769_v49 = vand.u32 4294901760, %v1768_v45  ;;  %v8548_v62 = vld [vmem:[%s10279_s1 + $0x30] sm:$0xff] }
  0xef   : > { %1485 = vmatpush.msra.mxu2 %v1458_v13  ;;  %v2030_v5 = vsel %vm204_vm0, %v8548_v62, 0 }
  0xf0   : > { %v9085_v9 = vand.u32 4294901760, %v2030_v5 }
  0xf3   : > { %1259 = vmatmul.f32.vlgmr.msra.gmra.mxu1 %v8965_v50  ;;  %1335 = vmatmul.f32.vlgmr.msrb.gmra.mxu0 %v1135_v53  ;;  %v2024_v53 = vsel %vm2022_vm14, %v2021_v6, %v2019_v47  ;;  %v8549_v47 = vld [vmem:[%s10279_s1 + $0x38] sm:$0xff] }
  0xf4   : > { %1405 = vmatmul.f32.vlgmr.msrb.gmra.mxu3 %v8965_v50  ;;  %1462 = vmatpush.msra.mxu1 %v1461_v28 }
  0xf5   : > { %1534 = vmatpush.msrb.mxu0 %v1459_v24  ;;  %1608 = vmatpush.msrb.mxu3 %v1607_v15  ;;  %v9091_v24 = vsub.f32 %v2030_v5, %v9085_v9 }
  0xf6   : > { %1383 = vmatmul.f32.vlgmr.msrb.gmra.mxu2 %v8965_v50  ;;  %v9050_v50 = vmul.f32 %v8831_v17, %v9039_v10 }
  0xf7   : > { %1578 = vmatpush.msrb.mxu2 %v8983_v8  ;;  %v9100_v7 = vand.u32 4294901760, %v9091_v24 }
  0xf8   : > { %10331 = vst [vmem:[#allocation18_spill] sm:$0xff] %v9050_v50  ;;  %v2025_v55 = vmul.f32 %v2023_v16, %v9050_v50  ;;  %v2338_v16 = vsel %vm204_vm0, %v8549_v47, 0 }
  0xf9   : > { %v9137_v54 = vand.u32 4294901760, %v2338_v16 }
  0xfa   : > { %v9069_v60 = vand.u32 4294901760, %v2025_v55 }
  0xfb   : > { %1359 = vmatmul.f32.vlgmr.msrb.gmra.mxu1 %v8972_v56  ;;  %1438 = vmatmul.f32.vlgmr.msra.gmra.mxu0 %v1437_v34  ;;  %v2026_v56 = vmul.f32 %v2024_v53, %v9054_v52 }
  0xfc   : > { %1512 = vmatmul.f32.vlgmr.msra.gmra.mxu3 %v9000_v27  ;;  %1556 = vmatpush.msrb.mxu1 %v1431_v63  ;;  %v2074_v63 = vsub.f32 %v2025_v55, %v9069_v60 }
  0xfd   : > { %1631 = vmatpush.msra.mxu0 %v1604_v14  ;;  %1702 = vmatpush.msra.mxu3 %v8983_v8  ;;  %v9071_v61 = vand.u32 4294901760, %v2026_v56 }
  0xfe   : > { %1488 = vmatmul.f32.vlgmr.msra.gmra.mxu2 %v8995_v12  ;;  %v2075_v14 = vand.u32 4294901760, %v2074_v63 }
  0xff   : > { %1680 = vmatpush.msra.mxu2 %v1605_v25 }
 0x100   : > { %v2076_v25 = vsub.f32 %v2074_v63, %v2075_v14 }
 0x102   : > { %v2077_v15 = vand.u32 4294901760, %v2076_v25  ;;  %v2635_v25 = vpop.permute.xlu2 %2634 }
 0x103   : > { %1464 = vmatmul.f32.vlgmr.msra.gmra.mxu1 %v8990_v23  ;;  %1536 = vmatmul.f32.vlgmr.msrb.gmra.mxu0 %v8990_v23 }
 0x104   : > { %1610 = vmatmul.f32.vlgmr.msrb.gmra.mxu3 %v8990_v23  ;;  %1654 = vmatpush.msra.mxu1 %v8983_v8  ;;  %v9082_v8 = vsub.f32 %v2026_v56, %v9071_v61 }
 0x105   : > { %1740 = vmatpush.msrb.mxu0 %v1739_v35  ;;  %1816 = vmatpush.msrb.mxu3 %v1739_v35 }
 0x106   : > { %1584 = vmatmul.f32.vlgmr.msrb.gmra.mxu2 %v1437_v34 }
 0x107   : > { %1793 = vmatpush.msrb.mxu2 %v1766_v39  ;;  %v2334_v39 = vmul.f32 %v9042_v11, %v2332_v33 }
 0x109   : > { %v9121_v6 = vand.u32 4294901760, %v2334_v39 }
 0x10b   : > { %1558 = vmatmul.f32.vlgmr.msrb.gmra.mxu1 %v8990_v23  ;;  %1634 = vmatmul.f32.vlgmr.msra.gmra.mxu0 %v8995_v12  ;;  %v9134_v53 = vsub.f32 %v2334_v39, %v9121_v6 }
 0x10c   : > { %1704 = vmatmul.f32.vlgmr.msra.gmra.mxu3 %v8990_v23  ;;  %1770 = vmatpush.msrb.mxu1 %v1769_v49 }
 0x10d   : > { %1842 = vmatpush.msra.mxu0 %v1767_v42  ;;  %1916 = vmatpush.msra.mxu3 %v1915_v51 }
 0x10e   : > { %1682 = vmatmul.f32.vlgmr.msra.gmra.mxu2 %v8990_v23  ;;  %v2221_v23 = vand.u32 4294901760, %v9082_v8 }
 0x10f   : > { %1886 = vmatpush.msra.mxu2 %v9014_v36 }
 0x110   : > { %v2222_v12 = vsub.f32 %v9082_v8, %v2221_v23 }
 0x112   : > { %v2223_v31 = vand.u32 4294901760, %v2222_v12  ;;  %v2637_v12 = vpop.permute.xlu0 %2636 }
 0x113   : > { %1658 = vmatmul.f32.vlgmr.msra.gmra.mxu1 %v9000_v27  ;;  %1746 = vmatmul.f32.vlgmr.msrb.gmra.mxu0 %v1745_v57 }
 0x114   : > { %1820 = vmatmul.f32.vlgmr.msrb.gmra.mxu3 %v9046_v48  ;;  %1864 = vmatpush.msra.mxu1 %v1739_v35  ;;  %v2052_v35 = vsub.f32 %v9091_v24, %v9100_v7 }
 0x115   : > { %1939 = vmatpush.msrb.mxu0 %v1912_v38  ;;  %2010 = vmatpush.msrb.mxu3 %v9014_v36 }
 0x116   : > { %1796 = vmatmul.f32.vlgmr.msrb.gmra.mxu2 %v9034_v44  ;;  %v2053_v42 = vand.u32 4294901760, %v2052_v35 }
 0x117   : > { %1988 = vmatpush.msrb.mxu2 %v1913_v43 }
 0x118   : > { %v231_v13 = vpop.f32.mrf.mxu0 }
 0x11b   : > { %1772 = vmatmul.f32.vlgmr.msrb.gmra.mxu1 %v9025_v41  ;;  %1844 = vmatmul.f32.vlgmr.msra.gmra.mxu0 %v9025_v41 }
 0x11c   : > { %1918 = vmatmul.f32.vlgmr.msra.gmra.mxu3 %v9025_v41  ;;  %1962 = vmatpush.msrb.mxu1 %v9014_v36  ;;  %v2333_v36 = vmul.f32 %v9039_v10, %v2331_v32  ;;  %v2640_v32 = vsel %vm2638_vm1, %v2637_v12, %v2635_v25 }
 0x11d   : > { %2048 = vmatpush.msra.mxu0 %v9069_v60  ;;  %2124 = vmatpush.msra.mxu3 %v9069_v60 }
 0x11e   : > { %1892 = vmatmul.f32.vlgmr.msra.gmra.mxu2 %v1745_v57  ;;  %v305_v1 = vpop.f32.mrf.mxu3 }
 0x11f   : > { %2101 = vmatpush.msra.mxu2 %v2074_v63  ;;  %v2529_v63 = vand.u32 4294901760, %v9134_v53 }
 0x120   : > { %v257_v27 = vpop.f32.mrf.mxu1  ;;  %v281_v28 = vpop.f32.mrf.mxu2 }
 0x121   : > { %v258_v29 = vadd.f32 %v257_v27, %v231_v13  ;;  %v329_v30 = vpop.f32.mrf.mxu0  ;;  %v9164_v27 = vmul.f32 %v8896_v58, %v9039_v10 }
 0x123   : > { %v282_v34 = vadd.f32 %v281_v28, %v258_v29  ;;  %1866 = vmatmul.f32.vlgmr.msra.gmra.mxu1 %v9025_v41  ;;  %1942 = vmatmul.f32.vlgmr.msrb.gmra.mxu0 %v9034_v44  ;;  %v9119_v44 = vand.u32 4294901760, %v2333_v36  ;;  %10333 = vst [vmem:[#allocation20_spill] sm:$0xff] %v9164_v27 }
 0x124   : > { %2012 = vmatmul.f32.vlgmr.msrb.gmra.mxu3 %v9025_v41  ;;  %2078 = vmatpush.msra.mxu1 %v2077_v15 }
 0x125   : > { %v306_v37 = vadd.f32 %v305_v1, %v282_v34  ;;  %2150 = vmatpush.msrb.mxu0 %v2075_v14  ;;  %2224 = vmatpush.msrb.mxu3 %v2223_v31  ;;  %v2382_v51 = vsub.f32 %v2333_v36, %v9119_v44  ;;  %v2639_v31 = vsel %vm2638_vm1, %v2635_v25, %v2637_v12 }
 0x126   : > { %1990 = vmatmul.f32.vlgmr.msrb.gmra.mxu2 %v9025_v41  ;;  %v2641_v34 = vmul.f32 %v2639_v31, %v9164_v27 }
 0x127   : > { %v9114_v40 = vadd.f32 %v329_v30, %v306_v37  ;;  %v403_v38 = vpop.f32.mrf.mxu3  ;;  %2194 = vmatpush.msrb.mxu2 %v9071_v61  ;;  %v2383_v56 = vand.u32 4294901760, %v2382_v51  ;;  %v9172_v30 = vmul.f32 %v8899_v59, %v9042_v11 }
 0x128   : > { %v9117_v43 = vpop.f32.mrf.mxu1  ;;  %v377_v45 = vpop.f32.mrf.mxu2  ;;  %v2663_v39 = vand.u32 4294901760, %v2641_v34 }
 0x129   : > { %v427_v46 = vpop.f32.mrf.mxu0  ;;  %v404_v49 = vadd.f32 %v403_v38, %v377_v45  ;;  %v2384_v13 = vsub.f32 %v2382_v51, %v2383_v56  ;;  %10334 = vst [vmem:[#allocation21_spill] sm:$0xff] %v9172_v30  ;;  %v2642_v35 = vmul.f32 %v2640_v32, %v9172_v30 }
 0x12b   : > { %1966 = vmatmul.f32.vlgmr.msrb.gmra.mxu1 %v9046_v48  ;;  %2054 = vmatmul.f32.vlgmr.msra.gmra.mxu0 %v2053_v42  ;;  %v428_v41 = vadd.f32 %v427_v46, %v404_v49  ;;  %v2385_v26 = vand.u32 4294901760, %v2384_v13  ;;  %v9195_v45 = vand.u32 4294901760, %v2642_v35  ;;  %v8550_v46 = vld [vmem:[%s10279_s1 + $0x40] sm:$0xff] }
 0x12c   : > { %2128 = vmatmul.f32.vlgmr.msra.gmra.mxu3 %v9100_v7  ;;  %2172 = vmatpush.msrb.mxu1 %v9069_v60  ;;  %v2646_v47 = vsel %vm204_vm0, %v8550_v46, 0 }
 0x12d   : > { %2247 = vmatpush.msra.mxu0 %v9082_v8  ;;  %2318 = vmatpush.msra.mxu3 %v9071_v61  ;;  %v9145_v8 = vsub.f32 %v2338_v16, %v9137_v54  ;;  %v2836_v49 = vsub.f32 %v2642_v35, %v9195_v45 }
 0x12e   : > { %2104 = vmatmul.f32.vlgmr.msra.gmra.mxu2 %v9091_v24 }
 0x12f   : > { %2296 = vmatpush.msra.mxu2 %v2221_v23  ;;  %v497_v48 = vpop.f32.mrf.mxu3  ;;  %v2530_v23 = vsub.f32 %v9134_v53, %v2529_v63  ;;  %v9158_v1 = vand.u32 4294901760, %v9145_v8 }
 0x130   : > { %v451_v55 = vpop.f32.mrf.mxu1 }
 0x131   : > { %v452_v57 = vadd.f32 %v451_v55, %v428_v41  ;;  %v475_v60 = vpop.f32.mrf.mxu2  ;;  %v9139_v62 = vpop.f32.mrf.mxu0  ;;  %v2531_v29 = vand.u32 4294901760, %v2530_v23  ;;  %v2360_v33 = vsub.f32 %v9145_v8, %v9158_v1  ;;  %v2837_v55 = vand.u32 4294901760, %v2836_v49 }
 0x133   : > { %v476_v5 = vadd.f32 %v475_v60, %v452_v57  ;;  %2080 = vmatmul.f32.vlgmr.msra.gmra.mxu1 %v9085_v9  ;;  %2152 = vmatmul.f32.vlgmr.msrb.gmra.mxu0 %v9085_v9  ;;  %v2361_v37 = vand.u32 4294901760, %v2360_v33  ;;  %v2838_v57 = vsub.f32 %v2836_v49, %v2837_v55 }
 0x134   : > { %2226 = vmatmul.f32.vlgmr.msrb.gmra.mxu3 %v9085_v9  ;;  %2270 = vmatpush.msra.mxu1 %v9071_v61 }
 0x135   : > { %v9149_v14 = vadd.f32 %v497_v48, %v476_v5  ;;  %2356 = vmatpush.msrb.mxu0 %v9119_v44  ;;  %2432 = vmatpush.msrb.mxu3 %v9119_v44  ;;  %v2839_v12 = vand.u32 4294901760, %v2838_v57 }
 0x136   : > { %2200 = vmatmul.f32.vlgmr.msrb.gmra.mxu2 %v2053_v42 }
 0x137   : > { %v9155_v0 = vpop.f32.mrf.mxu3  ;;  %2409 = vmatpush.msrb.mxu2 %v2382_v51 }
 0x138   : > { %v9160_v61 = vpop.f32.mrf.mxu1 }
 0x139   : > { %v9166_v28 = vpop.f32.mrf.mxu2  ;;  %v9168_v15 = vpop.f32.mrf.mxu0 }
 0x13b   : > { %2174 = vmatmul.f32.vlgmr.msrb.gmra.mxu1 %v9085_v9  ;;  %2250 = vmatmul.f32.vlgmr.msra.gmra.mxu0 %v9091_v24 }
 0x13c   : > { %2320 = vmatmul.f32.vlgmr.msra.gmra.mxu3 %v9085_v9  ;;  %2386 = vmatpush.msrb.mxu1 %v2385_v26 }
 0x13d   : > { %2458 = vmatpush.msra.mxu0 %v2383_v56  ;;  %2532 = vmatpush.msra.mxu3 %v2531_v29 }
 0x13e   : > { %2298 = vmatmul.f32.vlgmr.msra.gmra.mxu2 %v9085_v9  ;;  %v2690_v9 = vsub.f32 %v2641_v34, %v2663_v39 }
 0x13f   : > { %v9186_v36 = vpop.f32.mrf.mxu3  ;;  %2502 = vmatpush.msra.mxu2 %v9121_v6 }
 0x140   : > { %v9189_v24 = vpop.f32.mrf.mxu1  ;;  %v2691_v16 = vand.u32 4294901760, %v2690_v9 }
 0x141   : > { %v9191_v38 = vpop.f32.mrf.mxu2  ;;  %v9193_v42 = vpop.f32.mrf.mxu0 }
 0x142   : > { %v2692_v56 = vsub.f32 %v2690_v9, %v2691_v16 }
 0x143   : > { %2274 = vmatmul.f32.vlgmr.msra.gmra.mxu1 %v9100_v7  ;;  %2362 = vmatmul.f32.vlgmr.msrb.gmra.mxu0 %v2361_v37  ;;  %v2665_v7 = vand.u32 4294901760, %v2646_v47 }
 0x144   : > { %2436 = vmatmul.f32.vlgmr.msrb.gmra.mxu3 %v9158_v1  ;;  %2480 = vmatpush.msra.mxu1 %v9119_v44  ;;  %v2693_v13 = vand.u32 4294901760, %v2692_v56 }
 0x145   : > { %2555 = vmatpush.msrb.mxu0 %v9134_v53  ;;  %2626 = vmatpush.msrb.mxu3 %v9121_v6  ;;  %v2666_v53 = vsub.f32 %v2646_v47, %v2665_v7 }
 0x146   : > { %2412 = vmatmul.f32.vlgmr.msrb.gmra.mxu2 %v9145_v8 }
 0x147   : > { %2604 = vmatpush.msrb.mxu2 %v2529_v63  ;;  %v9208_v41 = vpop.f32.mrf.mxu3  ;;  %v2667_v63 = vand.u32 4294901760, %v2666_v53 }
 0x148   : > { %10335 = vst [vmem:[#allocation22_spill] sm:$0xff] %v9208_v41  ;;  %v9210_v51 = vpop.f32.mrf.mxu1 }
 0x149   : > { %v9212_v48 = vpop.f32.mrf.mxu2  ;;  %v9214_v44 = vpop.f32.mrf.mxu0 }
 0x14a   : > { %10336 = vst [vmem:[#allocation23_spill] sm:$0xff] %v9212_v48 }
 0x14b   : > { %2388 = vmatmul.f32.vlgmr.msrb.gmra.mxu1 %v9137_v54  ;;  %2460 = vmatmul.f32.vlgmr.msra.gmra.mxu0 %v9137_v54 }
 0x14c   : > { %2534 = vmatmul.f32.vlgmr.msra.gmra.mxu3 %v9137_v54  ;;  %2578 = vmatpush.msrb.mxu1 %v9121_v6  ;;  %v2668_v6 = vsub.f32 %v2666_v53, %v2667_v63 }
 0x14d   : > { %2664 = vmatpush.msra.mxu0 %v2663_v39  ;;  %2740 = vmatpush.msra.mxu3 %v2663_v39 }
 0x14e   : > { %2508 = vmatmul.f32.vlgmr.msra.gmra.mxu2 %v2361_v37  ;;  %v2669_v29 = vand.u32 4294901760, %v2668_v6 }
 0x14f   : > { %v9220_v60 = vpop.f32.mrf.mxu3  ;;  %2717 = vmatpush.msra.mxu2 %v2690_v9 }
 0x150   : > { %v9222_v5 = vpop.f32.mrf.mxu1 }
 0x151   : > { %v9224_v23 = vpop.f32.mrf.mxu2  ;;  %v9226_v25 = vpop.f32.mrf.mxu0 }
 0x153   : > { %2482 = vmatmul.f32.vlgmr.msra.gmra.mxu1 %v9137_v54  ;;  %2558 = vmatmul.f32.vlgmr.msrb.gmra.mxu0 %v9145_v8 }
 0x154   : > { %2628 = vmatmul.f32.vlgmr.msrb.gmra.mxu3 %v9137_v54  ;;  %2694 = vmatpush.msra.mxu1 %v2693_v13 }
 0x155   : > { %2766 = vmatpush.msrb.mxu0 %v2691_v16  ;;  %2840 = vmatpush.msrb.mxu3 %v2839_v12 }
 0x156   : > { %2606 = vmatmul.f32.vlgmr.msrb.gmra.mxu2 %v9137_v54 }
 0x157   : > { %v9232_v26 = vpop.f32.mrf.mxu3  ;;  %2810 = vmatpush.msrb.mxu2 %v9195_v45 }
 0x158   : > { %v9235_v31 = vpop.f32.mrf.mxu1 }
 0x159   : > { %v9237_v32 = vpop.f32.mrf.mxu2  ;;  %v9239_v33 = vpop.f32.mrf.mxu0 }
 0x15b   : > { %2582 = vmatmul.f32.vlgmr.msrb.gmra.mxu1 %v9158_v1  ;;  %2670 = vmatmul.f32.vlgmr.msra.gmra.mxu0 %v2669_v29 }
 0x15c   : > { %2744 = vmatmul.f32.vlgmr.msra.gmra.mxu3 %v2667_v63  ;;  %2788 = vmatpush.msrb.mxu1 %v2663_v39 }
 0x15d   : > { %2863 = vmatpush.msra.mxu0 %v2836_v49  ;;  %2934 = vmatpush.msra.mxu3 %v9195_v45 }
 0x15e   : > { %2720 = vmatmul.f32.vlgmr.msra.gmra.mxu2 %v2666_v53 }
 0x15f   : > { %2912 = vmatpush.msra.mxu2 %v2837_v55  ;;  %v9243_v54 = vpop.f32.mrf.mxu3 }
 0x160   : > { %10337 = vst [vmem:[#allocation24_spill] sm:$0xff] %v9243_v54  ;;  %v9245_v8 = vpop.f32.mrf.mxu1 }
 0x161   : > { %v9247_v34 = vpop.f32.mrf.mxu2  ;;  %v9249_v35 = vpop.f32.mrf.mxu0 }
 0x162   : > { %10338 = vst [vmem:[#allocation25_spill] sm:$0xff] %v9247_v34  ;;  %v352_v34 = vadd.f32 %v9117_v43, %v9114_v40 }
 0x163   : > { %2696 = vmatmul.f32.vlgmr.msra.gmra.mxu1 %v2665_v7  ;;  %2768 = vmatmul.f32.vlgmr.msrb.gmra.mxu0 %v2665_v7 }
 0x164   : > { %2886 = vmatpush.msra.mxu1 %v9195_v45  ;;  %2842 = vmatmul.f32.vlgmr.msrb.gmra.mxu3 %v2665_v7 }
 0x166   : > { %2816 = vmatmul.f32.vlgmr.msrb.gmra.mxu2 %v2669_v29 }
 0x167   : > { %v9252_v1 = vpop.f32.mrf.mxu3 }
 0x168   : > { %v1166_v37 = vpop.f32.mrf.mxu1 }
 0x169   : > { %v9254_v39 = vpop.f32.mrf.mxu2  ;;  %v9256_v46 = vpop.f32.mrf.mxu0 }
 0x16b   : > { %2790 = vmatmul.f32.vlgmr.msrb.gmra.mxu1 %v2665_v7  ;;  %2866 = vmatmul.f32.vlgmr.msra.gmra.mxu0 %v2666_v53 }
 0x16c   : > { %2936 = vmatmul.f32.vlgmr.msra.gmra.mxu3 %v2665_v7 }
 0x16e   : > { %2914 = vmatmul.f32.vlgmr.msra.gmra.mxu2 %v2665_v7 }
 0x16f   : > { %v9258_v9 = vpop.f32.mrf.mxu3 }
 0x170   : > { %v9260_v47 = vpop.f32.mrf.mxu1 }
 0x171   : > { %v9262_v49 = vpop.f32.mrf.mxu2  ;;  %v9264_v45 = vpop.f32.mrf.mxu0 }
 0x173   : > { %2890 = vmatmul.f32.vlgmr.msra.gmra.mxu1 %v2667_v63 }
 0x177   : > { %v9266_v16 = vpop.f32.mrf.mxu3 }
 0x178   : > { %10339 = vst [vmem:[#allocation26_spill] sm:$0xff] %v9266_v16  ;;  %v9268_v55 = vpop.f32.mrf.mxu1 }
 0x179   : > { %10340 = vst [vmem:[#allocation27_spill] sm:$0xff] %v9268_v55  ;;  %v9270_v56 = vpop.f32.mrf.mxu2  ;;  %v1439_v57 = vpop.f32.mrf.mxu0 }
 0x17a   : > { %10341 = vst [vmem:[#allocation28_spill] sm:$0xff] %v9270_v56 }
 0x17f   : > { %v9272_v13 = vpop.f32.mrf.mxu3 }
 0x180   : > { %v1465_v53 = vpop.f32.mrf.mxu1 }
 0x181   : > { %v1489_v7 = vpop.f32.mrf.mxu2  ;;  %v9274_v12 = vpop.f32.mrf.mxu0 }
 0x187   : > { %v9276_v6 = vpop.f32.mrf.mxu3 }
 0x188   : > { %v9278_v29 = vpop.f32.mrf.mxu1 }
 0x189   : > { %v9280_v30 = vpop.f32.mrf.mxu2  ;;  %v9282_v63 = vpop.f32.mrf.mxu0 }
 0x18a   : > { %10342 = vst [vmem:[#allocation29_spill] sm:$0xff] %v9282_v63 }
 0x18f   : > { %v9284_v27 = vpop.f32.mrf.mxu3 }
 0x190   : > { %10343 = vst [vmem:[#allocation30_spill] sm:$0xff] %v9284_v27  ;;  %v9286_v11 = vpop.f32.mrf.mxu1 }
 0x191   : > { %10344 = vst [vmem:[#allocation31_spill] sm:$0xff] %v9286_v11  ;;  %v9288_v10 = vpop.f32.mrf.mxu2  ;;  %v1747_v52 = vpop.f32.mrf.mxu0 }
 0x192   : > { %10345 = vst [vmem:[#allocation32_spill] sm:$0xff] %v9288_v10 }
 0x197   : > { %v1821_v50 = vpop.f32.mrf.mxu3 }
 0x198   : > { %v1773_v59 = vpop.f32.mrf.mxu1 }
 0x199   : > { %v1797_v58 = vpop.f32.mrf.mxu2  ;;  %v9290_v18 = vpop.f32.mrf.mxu0  ;;  %v1774_v43 = vadd.f32 %v1773_v59, %v1747_v52 }
 0x19f   : > { %v9292_v17 = vpop.f32.mrf.mxu3 }
 0x1a0   : > { %10346 = vst [vmem:[#allocation33_spill] sm:$0xff] %v9292_v17  ;;  %v9294_v3 = vpop.f32.mrf.mxu1 }
 0x1a1   : > { %10347 = vst [vmem:[#allocation34_spill] sm:$0xff] %v9294_v3  ;;  %v9296_v2 = vpop.f32.mrf.mxu2  ;;  %v9298_v22 = vpop.f32.mrf.mxu0 }
 0x1a2   : > { %10348 = vst [vmem:[#allocation35_spill] sm:$0xff] %v9296_v2 }
 0x1a3   : > { %10349 = vst [vmem:[#allocation36_spill] sm:$0xff] %v9298_v22 }
 0x1a7   : > { %v9300_v21 = vpop.f32.mrf.mxu3 }
 0x1a8   : > { %10350 = vst [vmem:[#allocation37_spill] sm:$0xff] %v9300_v21  ;;  %v9302_v20 = vpop.f32.mrf.mxu1 }
 0x1a9   : > { %10351 = vst [vmem:[#allocation38_spill] sm:$0xff] %v9302_v20  ;;  %v9304_v19 = vpop.f32.mrf.mxu2  ;;  %v2055_v4 = vpop.f32.mrf.mxu0 }
 0x1aa   : > { %10352 = vst [vmem:[#allocation39_spill] sm:$0xff] %v9304_v19 }
 0x1af   : > { %v2129_v27 = vpop.f32.mrf.mxu3 }
 0x1b0   : > { %v2081_v16 = vpop.f32.mrf.mxu1 }
 0x1b1   : > { %v2105_v41 = vpop.f32.mrf.mxu2  ;;  %v9306_v10 = vpop.f32.mrf.mxu0 }
 0x1b2   : > { %10353 = vst [vmem:[#allocation40_spill] sm:$0xff] %v9306_v10 }
 0x1b7   : > { %v9308_v54 = vpop.f32.mrf.mxu3 }
 0x1b8   : > { %10354 = vst [vmem:[#allocation41_spill] sm:$0xff] %v9308_v54  ;;  %v9310_v56 = vpop.f32.mrf.mxu1  ;;  %v527_v54 = vadd.f32 %v9139_v62, %v352_v34 }
 0x1b9   : > { %10355 = vst [vmem:[#allocation42_spill] sm:$0xff] %v9310_v56  ;;  %v9312_v48 = vpop.f32.mrf.mxu2  ;;  %v9314_v11 = vpop.f32.mrf.mxu0 }
 0x1ba   : > { %10356 = vst [vmem:[#allocation43_spill] sm:$0xff] %v9312_v48  ;;  %v859_v48 = vadd.f32 %v9222_v5, %v9214_v44 }
 0x1bb   : > { %10357 = vst [vmem:[#allocation44_spill] sm:$0xff] %v9314_v11  ;;  %v553_v11 = vadd.f32 %v9160_v61, %v527_v54  ;;  %v2082_v54 = vadd.f32 %v2081_v16, %v2055_v4  ;;  %v10363_v16 = vld [vmem:[#allocation40_spill] sm:$0xff] }
 0x1bd   : > { %v577_v10 = vadd.f32 %v9166_v28, %v553_v11  ;;  %v673_v11 = vadd.f32 %v9191_v38, %v9149_v14 }
 0x1bf   : > { %v9316_v22 = vpop.f32.mrf.mxu3  ;;  %v601_v61 = vadd.f32 %v9155_v0, %v577_v10  ;;  %v699_v10 = vadd.f32 %v9186_v36, %v673_v11  ;;  %v1612_v36 = vadd.f32 %v9276_v6, %v9280_v30 }
 0x1c0   : > { %10358 = vst [vmem:[#allocation45_spill] sm:$0xff] %v9316_v22  ;;  %v9318_v21 = vpop.f32.mrf.mxu1  ;;  %v1167_v22 = vadd.f32 %v1166_v37, %v9249_v35  ;;  %v2106_v35 = vadd.f32 %v2105_v41, %v2082_v54  ;;  %v10372_v11 = vld [vmem:[#allocation42_spill] sm:$0xff] }
 0x1c1   : > { %10359 = vst [vmem:[#allocation46_spill] sm:$0xff] %v9318_v21  ;;  %v9320_v20 = vpop.f32.mrf.mxu2  ;;  %v2363_v19 = vpop.f32.mrf.mxu0  ;;  %v883_v21 = vadd.f32 %v9224_v23, %v859_v48  ;;  %v1798_v23 = vadd.f32 %v1797_v58, %v1774_v43  ;;  %v625_v52 = vadd.f32 %v9168_v15, %v601_v61  ;;  %v1313_v15 = vadd.f32 %v9258_v9, %v9262_v49  ;;  %v10362_v49 = vld [vmem:[#allocation33_spill] sm:$0xff]  ;;  %v10370_v61 = vld [vmem:[#allocation31_spill] sm:$0xff] }
 0x1c2   : > { %10360 = vst [vmem:[#allocation47_spill] sm:$0xff] %v9320_v20  ;;  %v1466_v20 = vadd.f32 %v1465_v53, %v1439_v57  ;;  %v1191_v40 = vadd.f32 %v9254_v39, %v1167_v22  ;;  %v10366_v53 = vld [vmem:[#allocation34_spill] sm:$0xff]  ;;  %v10369_v43 = vld [vmem:[#allocation25_spill] sm:$0xff] }
 0x1c3   : > { %v907_v44 = vadd.f32 %v9220_v60, %v883_v21  ;;  %v1822_v21 = vadd.f32 %v1821_v50, %v1798_v23  ;;  %v647_v60 = vadd.f32 %v9189_v24, %v625_v52  ;;  %v1337_v9 = vadd.f32 %v9264_v45, %v1313_v15  ;;  %v10368_v45 = vld [vmem:[#allocation41_spill] sm:$0xff]  ;;  %v10373_v52 = vld [vmem:[#allocation23_spill] sm:$0xff] }
 0x1c4   : > { %v1490_v5 = vadd.f32 %v1489_v7, %v1466_v20  ;;  %v1215_v48 = vadd.f32 %v9252_v1, %v1191_v40  ;;  %v1005_v20 = vadd.f32 %v9232_v26, %v9237_v32  ;;  %v723_v1 = vadd.f32 %v9193_v42, %v699_v10  ;;  %v10365_v42 = vld [vmem:[#allocation29_spill] sm:$0xff] }
 0x1c5   : > { %v931_v22 = vadd.f32 %v9226_v25, %v907_v44  ;;  %v2130_v25 = vadd.f32 %v2129_v27, %v2106_v35  ;;  %v1846_v32 = vadd.f32 %v9290_v18, %v1822_v21  ;;  %v10364_v18 = vld [vmem:[#allocation27_spill] sm:$0xff] }
 0x1c6   : > { %v1514_v59 = vadd.f32 %v9272_v13, %v1490_v5  ;;  %v1239_v4 = vadd.f32 %v9256_v46, %v1215_v48  ;;  %v1029_v26 = vadd.f32 %v9239_v33, %v1005_v20  ;;  %v747_v27 = vadd.f32 %v9210_v51, %v723_v1  ;;  %v10361_v33 = vld [vmem:[#allocation35_spill] sm:$0xff]  ;;  %v10371_v48 = vld [vmem:[#allocation36_spill] sm:$0xff] }
 0x1c7   : > { %v2437_v3 = vpop.f32.mrf.mxu3  ;;  %v953_v38 = vadd.f32 %v9235_v31, %v931_v22  ;;  %v1361_v13 = vadd.f32 %v10364_v18, %v1337_v9  ;;  %v1868_v7 = vadd.f32 %v10366_v53, %v1846_v32  ;;  %v10374_v20 = vld [vmem:[#allocation28_spill] sm:$0xff]  ;;  %v10383_v18 = vld [vmem:[#allocation30_spill] sm:$0xff] }
 0x1c8   : > { %v2389_v63 = vpop.f32.mrf.mxu1  ;;  %v1538_v41 = vadd.f32 %v9274_v12, %v1514_v59  ;;  %v1261_v50 = vadd.f32 %v9260_v47, %v1239_v4  ;;  %v1053_v46 = vadd.f32 %v9245_v8, %v1029_v26  ;;  %v1920_v47 = vadd.f32 %v10362_v49, %v10361_v33  ;;  %v10367_v12 = vld [vmem:[#allocation43_spill] sm:$0xff] }
 0x1c9   : > { %v2413_v55 = vpop.f32.mrf.mxu2  ;;  %v2461_v56 = vpop.f32.mrf.mxu0  ;;  %v2390_v28 = vadd.f32 %v2389_v63, %v2363_v19  ;;  %v1101_v39 = vadd.f32 %v953_v38, %v647_v60  ;;  %v2228_v6 = vadd.f32 %v10368_v45, %v10367_v12  ;;  %v771_v35 = vadd.f32 %v10373_v52, %v747_v27  ;;  %v10382_v27 = vld [vmem:[#allocation39_spill] sm:$0xff] }
 0x1ca   : > { %v1560_v24 = vadd.f32 %v9278_v29, %v1538_v41  ;;  %v1077_v44 = vadd.f32 %v10369_v43, %v1053_v46  ;;  %v1944_v23 = vadd.f32 %v10371_v48, %v1920_v47  ;;  %v1385_v4 = vadd.f32 %v10374_v20, %v1361_v13  ;;  %v10377_v41 = vld [vmem:[#allocation24_spill] sm:$0xff]  ;;  %v10381_v46 = vld [vmem:[#allocation26_spill] sm:$0xff] }
 0x1cb   : > { %v2414_v14 = vadd.f32 %v2413_v55, %v2390_v28  ;;  %v2154_v55 = vadd.f32 %v10363_v16, %v2130_v25  ;;  %v1409_v57 = vadd.f32 %v1261_v50, %v1101_v39  ;;  %v10378_v25 = vld [vmem:[#allocation32_spill] sm:$0xff] }
 0x1cc   : > { %v1099_v60 = vadd.f32 %v10377_v41, %v1077_v44  ;;  %v1407_v9 = vadd.f32 %v10381_v46, %v1385_v4 }
 0x1cd   : > { %v2438_v31 = vadd.f32 %v2437_v3, %v2414_v14  ;;  %v1636_v3 = vadd.f32 %v10365_v42, %v1612_v36  ;;  %v1708_v5 = vadd.f32 %v1560_v24, %v1409_v57  ;;  %v2176_v28 = vadd.f32 %v10372_v11, %v2154_v55  ;;  %v10376_v14 = vld [vmem:[#allocation44_spill] sm:$0xff]  ;;  %v10379_v36 = vld [vmem:[#allocation46_spill] sm:$0xff]  ;;  %v10384_v42 = vld [vmem:[#allocation47_spill] sm:$0xff] }
 0x1cf   : > { %v2535_v17 = vpop.f32.mrf.mxu3  ;;  %v2462_v29 = vadd.f32 %v2461_v56, %v2438_v31  ;;  %v1660_v54 = vadd.f32 %v10370_v61, %v1636_v3  ;;  %v2016_v21 = vadd.f32 %v1868_v7, %v1708_v5  ;;  %v10375_v56 = vld [vmem:[#allocation38_spill] sm:$0xff]  ;;  %v10385_v7 = vld [vmem:[#allocation37_spill] sm:$0xff] }
 0x1d0   : > { %v9332_v2 = vpop.f32.mrf.mxu1  ;;  %v1968_v10 = vadd.f32 %v10375_v56, %v1944_v23  ;;  %v10380_v31 = vld [vmem:[#allocation22_spill] sm:$0xff] }
 0x1d1   : > { %v2509_v62 = vpop.f32.mrf.mxu2  ;;  %v9334_v34 = vpop.f32.mrf.mxu0  ;;  %v2484_v38 = vadd.f32 %v9332_v2, %v2462_v29  ;;  %v1684_v26 = vadd.f32 %v10378_v25, %v1660_v54  ;;  %v2324_v50 = vadd.f32 %v2176_v28, %v2016_v21  ;;  %v793_v39 = vadd.f32 %v10380_v31, %v771_v35 }
 0x1d2   : > { %v2536_v22 = vadd.f32 %v2535_v17, %v2509_v62  ;;  %v1992_v33 = vadd.f32 %v10382_v27, %v1968_v10 }
 0x1d3   : > { %v2632_v2 = vadd.f32 %v2484_v38, %v2324_v50  ;;  %v1102_v55 = vadd.f32 %v1099_v60, %v793_v39  ;;  %v1706_v13 = vadd.f32 %v10383_v18, %v1684_v26 }
 0x1d4   : > { %v2560_v62 = vadd.f32 %v9334_v34, %v2536_v22 }
 0x1d5   : > { %v1410_v53 = vadd.f32 %v1407_v9, %v1102_v55  ;;  %v10391_v55 = vld [vmem:[#allocation11_spill] sm:$0xff] }
 0x1d7   : > { %v9344_v37 = vpop.f32.mrf.mxu3  ;;  %v1709_v29 = vadd.f32 %v1706_v13, %v1410_v53 }
 0x1d8   : > { %v2583_v58 = vpop.f32.mrf.mxu1 }
 0x1d9   : > { %v9350_v19 = vpop.f32.mrf.mxu2  ;;  %v2671_v0 = vpop.f32.mrf.mxu0  ;;  %v2584_v49 = vadd.f32 %v2583_v58, %v2560_v62  ;;  %v10386_v58 = vld [vmem:[#allocation45_spill] sm:$0xff] }
 0x1db   : > { %v2608_v12 = vadd.f32 %v9350_v19, %v2584_v49 }
 0x1dd   : > { %v2630_v43 = vadd.f32 %v9344_v37, %v2608_v12  ;;  %v8552_v37 = vld [vmem:[%s10279_s1 + $0x50] sm:$0xff] }
 0x1de   : > { %v2965_v22 = vsel %vm204_vm0, %v8552_v37, 0 }
 0x1df   : > { %v2745_v30 = vpop.f32.mrf.mxu3 }
 0x1e0   : > { %v2697_v8 = vpop.f32.mrf.mxu1 }
 0x1e1   : > { %v2698_v63 = vadd.f32 %v2697_v8, %v2671_v0  ;;  %v2721_v51 = vpop.f32.mrf.mxu2  ;;  %v2769_v40 = vpop.f32.mrf.mxu0  ;;  %v2252_v0 = vadd.f32 %v10376_v14, %v2228_v6  ;;  %v2014_v8 = vadd.f32 %v10385_v7, %v1992_v33 }
 0x1e3   : > { %v2722_v59 = vadd.f32 %v2721_v51, %v2698_v63  ;;  %v2276_v17 = vadd.f32 %v10379_v36, %v2252_v0  ;;  %v10388_v0 = vld [vmem:[#allocation8_spill] sm:$0xff] }
 0x1e5   : > { %v2746_v15 = vadd.f32 %v2745_v30, %v2722_v59  ;;  %v2300_v34 = vadd.f32 %v10384_v42, %v2276_v17  ;;  %v9437_v59 = vand.u32 4294901760, %v2965_v22  ;;  %v8551_v17 = vld [vmem:[%s10279_s1 + $0x48] sm:$0xff] }
 0x1e7   : > { %v2770_v32 = vadd.f32 %v2769_v40, %v2746_v15  ;;  %v2843_v1 = vpop.f32.mrf.mxu3  ;;  %v2322_v63 = vadd.f32 %v10386_v58, %v2300_v34  ;;  %v2017_v40 = vadd.f32 %v2014_v8, %v1709_v29  ;;  %v9440_v52 = vsub.f32 %v2965_v22, %v9437_v59  ;;  %v10389_v15 = vld [vmem:[#allocation9_spill] sm:$0xff] }
 0x1e8   : > { %v2791_v24 = vpop.f32.mrf.mxu1 }
 0x1e9   : > { %v2792_v47 = vadd.f32 %v2791_v24, %v2770_v32  ;;  %v2817_v16 = vpop.f32.mrf.mxu2  ;;  %v2867_v57 = vpop.f32.mrf.mxu0  ;;  %v2325_v19 = vadd.f32 %v2322_v63, %v2017_v40  ;;  %v9443_v35 = vand.u32 4294901760, %v9440_v52 }
 0x1ea   : > { %v2844_v30 = vadd.f32 %v2843_v1, %v2817_v16  ;;  %v3260_v1 = vsel %vm204_vm0, %v8551_v17, 0  ;;  %v10394_v17 = vld [vmem:[#allocation6_spill] sm:$0xff] }
 0x1eb   : > { %v2940_v3 = vadd.f32 %v2792_v47, %v2632_v2  ;;  %v2633_v48 = vadd.f32 %v2630_v43, %v2325_v19  ;;  %v2987_v20 = vsub.f32 %v9440_v52, %v9443_v35  ;;  %v9459_v27 = vand.u32 4294901760, %v3260_v1  ;;  %v10390_v47 = vld [vmem:[#allocation10_spill] sm:$0xff] }
 0x1ec   : > { %v2868_v6 = vadd.f32 %v2867_v57, %v2844_v30 }
 0x1ed   : > { %v9395_v45 = vmax.f32 %v2940_v3, 0.0  ;;  %v2988_v60 = vand.u32 4294901760, %v2987_v20  ;;  %v9470_v57 = vsub.f32 %v3260_v1, %v9459_v27 }
 0x1ef   : > { %2944 = vrot.lane.b32.xlu0 %v9395_v45, %s8689_s27  ;;  %2954 = vrot.lane.b32.xlu1 %v9395_v45, %s8688_s26  ;;  %v2937_v61 = vpop.f32.mrf.mxu3  ;;  %v9474_v53 = vand.u32 4294901760, %v9470_v57 }
 0x1f0   : > { %v2891_v51 = vpop.f32.mrf.mxu1 }
 0x1f1   : > { %v2892_v44 = vadd.f32 %v2891_v51, %v2868_v6  ;;  %v2915_v5 = vpop.f32.mrf.mxu2  ;;  %v3282_v63 = vsub.f32 %v9470_v57, %v9474_v53 }
 0x1f3   : > { %v2916_v54 = vadd.f32 %v2915_v5, %v2892_v44  ;;  %v10392_v44 = vld [vmem:[#allocation14_spill] sm:$0xff] }
 0x1f5   : > { %v2938_v23 = vadd.f32 %v2937_v61, %v2916_v54  ;;  %v10393_v61 = vld [vmem:[#allocation15_spill] sm:$0xff]  ;;  %v3283_v54 = vand.u32 4294901760, %v3282_v63 }
 0x1f7   : > { %v2941_v11 = vadd.f32 %v2938_v23, %v2633_v48  ;;  %v8553_v23 = vld [vmem:[%s10279_s1 + $0x58] sm:$0xff] }
 0x1f8   : > { %v3565_v37 = vsel %vm204_vm0, %v8553_v23, 0 }
 0x1f9   : > { %v9403_v28 = vmax.f32 %v2941_v11, 0.0 }
 0x1fb   : > { %2956 = vrot.lane.b32.xlu2 %v9403_v28, %s8688_s26  ;;  %3556 = vrot.lane.b32.xlu0 %v9403_v28, %s8690_s28 }
 0x1fc   : > { %2946 = vrot.lane.b32.xlu1 %v9403_v28, %s8689_s27 }
 0x203   : > { %3554 = vrot.lane.b32.xlu2 %v9395_v45, %s8690_s28  ;;  %4467 = vrot.lane.b32.xlu0 %v9395_v45, %s8692_s30 }
 0x204   : > { %3861 = vrot.lane.b32.xlu1 %v9395_v45, %s8691_s29 }
 0x20b   : > { %3863 = vrot.lane.b32.xlu2 %v9403_v28, %s8691_s29  ;;  %4776 = vrot.lane.b32.xlu0 %v9403_v28, %s8693_s3 }
 0x20c   : > { %4469 = vrot.lane.b32.xlu1 %v9403_v28, %s8692_s30 }
 0x213   : > { %4774 = vrot.lane.b32.xlu2 %v9395_v45, %s8693_s3  ;;  %5388 = vrot.lane.b32.xlu0 %v9395_v45, %s8695_s5 }
 0x214   : > { %5081 = vrot.lane.b32.xlu1 %v9395_v45, %s8694_s4 }
 0x21b   : > { %5083 = vrot.lane.b32.xlu2 %v9403_v28, %s8694_s4 }
 0x21c   : > { %5390 = vrot.lane.b32.xlu1 %v9403_v28, %s8695_s5 }
 0x255   : > { %v2957_v4 = vpop.permute.xlu2 %2956 }
 0x25d   : > { %v3555_v12 = vpop.permute.xlu2 %3554 }
 0x261   : > { %v2955_v21 = vpop.permute.xlu1 %2954  ;;  %v2945_v46 = vpop.permute.xlu0 %2944 }
 0x262   : > { %v2958_v10 = vsel %vm197_vm5, %v2955_v21, %v2957_v4  ;;  %v2959_v14 = vsel %vm197_vm5, %v2957_v4, %v2955_v21 }
 0x263   : > { %v2960_v38 = vmul.f32 %v10388_v0, %v2959_v14  ;;  %v2961_v41 = vmul.f32 %v10389_v15, %v2958_v10 }
 0x265   : > { %v2982_v25 = vand.u32 4294901760, %v2960_v38  ;;  %v3128_v26 = vand.u32 4294901760, %v2961_v41 }
 0x267   : > { %v3009_v50 = vsub.f32 %v2960_v38, %v2982_v25  ;;  %v3155_v36 = vsub.f32 %v2961_v41, %v3128_v26  ;;  %2983 = vmatpush.msrb.mxu0 %v2982_v25  ;;  %3059 = vmatpush.msrb.mxu3 %v2982_v25  ;;  %v3864_v41 = vpop.permute.xlu2 %3863 }
 0x268   : > { %2989 = vmatmul.f32.vlgmr.msrb.gmra.mxu0 %v2988_v60  ;;  %3063 = vmatmul.f32.vlgmr.msrb.gmra.mxu3 %v9443_v35 }
 0x269   : > { %3036 = vmatpush.msrb.mxu2 %v3009_v50  ;;  %v3010_v62 = vand.u32 4294901760, %v3009_v50  ;;  %v3156_v32 = vand.u32 4294901760, %v3155_v36 }
 0x26a   : > { %3039 = vmatmul.f32.vlgmr.msrb.gmra.mxu2 %v9440_v52 }
 0x26b   : > { %3129 = vmatpush.msra.mxu2 %v3128_v26  ;;  %3085 = vmatpush.msra.mxu0 %v3010_v62  ;;  %v3011_v31 = vsub.f32 %v3009_v50, %v3010_v62  ;;  %v3157_v39 = vsub.f32 %v3155_v36, %v3156_v32 }
 0x26d   : > { %3231 = vmatpush.msrb.mxu2 %v3156_v32  ;;  %3182 = vmatpush.msrb.mxu0 %v3155_v36  ;;  %v3012_v9 = vand.u32 4294901760, %v3011_v31  ;;  %v3158_v24 = vand.u32 4294901760, %v3157_v39  ;;  %v3557_v3 = vpop.permute.xlu0 %3556  ;;  %v10395_v32 = vld [vmem:[#allocation7_spill] sm:$0xff] }
 0x26e   : > { %v2947_v33 = vpop.permute.xlu1 %2946  ;;  %v3559_v6 = vsel %vm799_vm9, %v3557_v3, %v3555_v12  ;;  %v3558_v51 = vsel %vm799_vm9, %v3555_v12, %v3557_v3  ;;  %v4334_v12 = vand.u32 4294901760, %v9403_v28 }
 0x26f   : > { %v2948_v2 = vsel %vm187_vm6, %v2945_v46, %v2947_v33  ;;  %v2949_v49 = vsel %vm187_vm6, %v2947_v33, %v2945_v46  ;;  %3013 = vmatpush.msrb.mxu1 %v3012_v9  ;;  %3159 = vmatpush.msra.mxu3 %v3158_v24  ;;  %v3560_v5 = vmul.f32 %v3559_v6, %v10392_v44  ;;  %v8554_v46 = vld [vmem:[%s10279_s1 + $0x60] sm:$0xff] }
 0x270   : > { %v2950_v16 = vmul.f32 %v2949_v49, %v10390_v47  ;;  %v2951_v30 = vmul.f32 %v2948_v2, %v10391_v55  ;;  %3015 = vmatmul.f32.vlgmr.msrb.gmra.mxu1 %v9437_v59  ;;  %3087 = vmatmul.f32.vlgmr.msra.gmra.mxu0 %v9437_v59  ;;  %v3561_v19 = vmul.f32 %v3558_v51, %v10393_v61  ;;  %v3872_v24 = vsel %vm204_vm0, %v8554_v46, 0  ;;  %v4775_v46 = vpop.permute.xlu2 %4774 }
 0x271   : > { %3107 = vmatpush.msra.mxu1 %v2982_v25  ;;  %3161 = vmatmul.f32.vlgmr.msra.gmra.mxu3 %v9437_v59  ;;  %v3582_v48 = vand.u32 4294901760, %v3560_v5  ;;  %v9516_v2 = vand.u32 4294901760, %v3872_v24 }
 0x272   : > { %v3277_v18 = vand.u32 4294901760, %v2950_v16  ;;  %v3423_v13 = vand.u32 4294901760, %v2951_v30  ;;  %3253 = vmatpush.msrb.mxu3 %v3128_v26  ;;  %3135 = vmatmul.f32.vlgmr.msra.gmra.mxu2 %v2988_v60  ;;  %v3728_v11 = vand.u32 4294901760, %v3561_v19 }
 0x273   : > { %3205 = vmatpush.msrb.mxu1 %v3128_v26  ;;  %v3609_v22 = vsub.f32 %v3560_v5, %v3582_v48 }
 0x274   : > { %v3304_v42 = vsub.f32 %v2950_v16, %v3277_v18  ;;  %v3450_v34 = vsub.f32 %v2951_v30, %v3423_v13  ;;  %3278 = vmatpush.msra.mxu0 %v3277_v18  ;;  %3354 = vmatpush.msra.mxu3 %v3277_v18  ;;  %v3892_v30 = vsub.f32 %v3872_v24, %v9516_v2 }
 0x275   : > { %v3610_v20 = vand.u32 4294901760, %v3609_v22 }
 0x276   : > { %v3451_v7 = vand.u32 4294901760, %v3450_v34  ;;  %3331 = vmatpush.msra.mxu2 %v3304_v42  ;;  %v3305_v8 = vand.u32 4294901760, %v3304_v42  ;;  %v3862_v10 = vpop.permute.xlu1 %3861 }
 0x277   : > { %v3611_v21 = vsub.f32 %v3609_v22, %v3610_v20  ;;  %v3866_v25 = vsel %vm1107_vm10, %v3864_v41, %v3862_v10  ;;  %v3865_v36 = vsel %vm1107_vm10, %v3862_v10, %v3864_v41  ;;  %v8556_v10 = vld [vmem:[%s10279_s1 + $0x70] sm:$0xff] }
 0x278   : > { %3109 = vmatmul.f32.vlgmr.msra.gmra.mxu1 %v9437_v59  ;;  %v3306_v29 = vsub.f32 %v3304_v42, %v3305_v8  ;;  %v3452_v58 = vsub.f32 %v3450_v34, %v3451_v7  ;;  %3185 = vmatmul.f32.vlgmr.msrb.gmra.mxu0 %v9440_v52  ;;  %v9495_v52 = vand.u32 4294901760, %v3565_v37  ;;  %v3867_v62 = vmul.f32 %v10394_v17, %v3866_v25 }
 0x279   : > { %3255 = vmatmul.f32.vlgmr.msrb.gmra.mxu3 %v9437_v59  ;;  %3380 = vmatpush.msrb.mxu0 %v3305_v8  ;;  %v3612_v60 = vand.u32 4294901760, %v3611_v21  ;;  %v3868_v1 = vmul.f32 %v10395_v32, %v3865_v36  ;;  %v8555_v8 = vld [vmem:[%s10279_s1 + $0x68] sm:$0xff] }
 0x27a   : > { %v3307_v40 = vand.u32 4294901760, %v3306_v29  ;;  %v3453_v43 = vand.u32 4294901760, %v3452_v58  ;;  %3233 = vmatmul.f32.vlgmr.msrb.gmra.mxu2 %v9437_v59  ;;  %v3755_v59 = vsub.f32 %v3561_v19, %v3728_v11  ;;  %v3585_v4 = vsub.f32 %v3565_v37, %v9495_v52 }
 0x27b   : > { %3424 = vmatpush.msrb.mxu2 %v3423_v13  ;;  %v3889_v39 = vand.u32 4294901760, %v3867_v62  ;;  %v4035_v9 = vand.u32 4294901760, %v3868_v1  ;;  %v4171_v6 = vsel %vm204_vm0, %v8555_v8, 0  ;;  %v4361_v58 = vsub.f32 %v9403_v28, %v4334_v12 }
 0x27c   : > { %3308 = vmatpush.msra.mxu1 %v3307_v40  ;;  %3454 = vmatpush.msrb.mxu3 %v3453_v43  ;;  %v3586_v38 = vand.u32 4294901760, %v3585_v4  ;;  %v9533_v63 = vand.u32 4294901760, %v4171_v6 }
 0x27d   : > { %v3916_v33 = vsub.f32 %v3867_v62, %v3889_v39  ;;  %v4362_v40 = vand.u32 4294901760, %v4361_v58 }
 0x27e   : > { %v3587_v50 = vsub.f32 %v3585_v4, %v3586_v38  ;;  %v4191_v43 = vsub.f32 %v4171_v6, %v9533_v63  ;;  %v4470_v5 = vpop.permute.xlu1 %4469 }
 0x27f   : > { %v3917_v49 = vand.u32 4294901760, %v3916_v33  ;;  %v4363_v28 = vsub.f32 %v4361_v58, %v4362_v40 }
 0x280   : > { %3209 = vmatmul.f32.vlgmr.msrb.gmra.mxu1 %v9443_v35  ;;  %3284 = vmatmul.f32.vlgmr.msra.gmra.mxu0 %v3283_v54  ;;  %v3756_v35 = vand.u32 4294901760, %v3755_v59  ;;  %v3588_v31 = vand.u32 4294901760, %v3587_v50  ;;  %v9539_v19 = vand.u32 4294901760, %v4191_v43 }
 0x281   : > { %3402 = vmatpush.msrb.mxu1 %v3277_v18  ;;  %3358 = vmatmul.f32.vlgmr.msra.gmra.mxu3 %v9474_v53 }
 0x282   : > { %3477 = vmatpush.msra.mxu0 %v3450_v34  ;;  %3548 = vmatpush.msra.mxu3 %v3423_v13  ;;  %v3757_v14 = vsub.f32 %v3755_v59, %v3756_v35  ;;  %v4193_v37 = vsub.f32 %v4191_v43, %v9539_v19 }
 0x283   : > { %3334 = vmatmul.f32.vlgmr.msra.gmra.mxu2 %v9470_v57 }
 0x284   : > { %3526 = vmatpush.msra.mxu2 %v3451_v7  ;;  %v3758_v26 = vand.u32 4294901760, %v3757_v14  ;;  %v4188_v7 = vand.u32 4294901760, %v9395_v45 }
 0x286   : > { %v4215_v29 = vsub.f32 %v9395_v45, %v4188_v7 }
 0x288   : > { %3310 = vmatmul.f32.vlgmr.msra.gmra.mxu1 %v9459_v27  ;;  %3382 = vmatmul.f32.vlgmr.msrb.gmra.mxu0 %v9459_v27  ;;  %v4216_v51 = vand.u32 4294901760, %v4215_v29 }
 0x289   : > { %3500 = vmatpush.msra.mxu1 %v3423_v13  ;;  %3456 = vmatmul.f32.vlgmr.msrb.gmra.mxu3 %v9459_v27  ;;  %v3893_v13 = vand.u32 4294901760, %v3892_v30 }
 0x28a   : > { %3583 = vmatpush.msrb.mxu0 %v3582_v48  ;;  %3659 = vmatpush.msrb.mxu3 %v3582_v48  ;;  %v4217_v45 = vsub.f32 %v4215_v29, %v4216_v51 }
 0x28b   : > { %3430 = vmatmul.f32.vlgmr.msrb.gmra.mxu2 %v3283_v54  ;;  %v3894_v3 = vsub.f32 %v3892_v30, %v3893_v13  ;;  %v4468_v54 = vpop.permute.xlu0 %4467 }
 0x28c   : > { %3636 = vmatpush.msrb.mxu2 %v3609_v22  ;;  %v4471_v23 = vsel %vm1714_vm11, %v4468_v54, %v4470_v5  ;;  %v4472_v22 = vsel %vm1714_vm11, %v4470_v5, %v4468_v54 }
 0x290   : > { %3404 = vmatmul.f32.vlgmr.msrb.gmra.mxu1 %v9459_v27  ;;  %3480 = vmatmul.f32.vlgmr.msra.gmra.mxu0 %v9470_v57  ;;  %v3918_v57 = vsub.f32 %v3916_v33, %v3917_v49 }
 0x291   : > { %3613 = vmatpush.msrb.mxu1 %v3612_v60  ;;  %3550 = vmatmul.f32.vlgmr.msra.gmra.mxu3 %v9459_v27 }
 0x292   : > { %3685 = vmatpush.msra.mxu0 %v3610_v20  ;;  %3759 = vmatpush.msra.mxu3 %v3758_v26  ;;  %v3919_v42 = vand.u32 4294901760, %v3918_v57  ;;  %v10397_v20 = vld [vmem:[#allocation13_spill] sm:$0xff] }
 0x293   : > { %3528 = vmatmul.f32.vlgmr.msra.gmra.mxu2 %v9459_v27  ;;  %v4062_v27 = vsub.f32 %v3868_v1, %v4035_v9  ;;  %v4777_v1 = vpop.permute.xlu0 %4776 }
 0x294   : > { %3729 = vmatpush.msra.mxu2 %v3728_v11  ;;  %v4778_v24 = vsel %vm2022_vm14, %v4775_v46, %v4777_v1 }
 0x295   : > { %v4063_v16 = vand.u32 4294901760, %v4062_v27 }
 0x297   : > { %v4064_v18 = vsub.f32 %v4062_v27, %v4063_v16 }
 0x298   : > { %3504 = vmatmul.f32.vlgmr.msra.gmra.mxu1 %v9474_v53  ;;  %3589 = vmatmul.f32.vlgmr.msrb.gmra.mxu0 %v3588_v31  ;;  %v3895_v53 = vand.u32 4294901760, %v3894_v3 }
 0x299   : > { %3707 = vmatpush.msra.mxu1 %v3582_v48  ;;  %3663 = vmatmul.f32.vlgmr.msrb.gmra.mxu3 %v3586_v38  ;;  %v4065_v34 = vand.u32 4294901760, %v4064_v18  ;;  %v4218_v48 = vand.u32 4294901760, %v4217_v45 }
 0x29a   : > { %3782 = vmatpush.msrb.mxu0 %v3755_v59  ;;  %3853 = vmatpush.msrb.mxu3 %v3728_v11  ;;  %v10396_v59 = vld [vmem:[#allocation12_spill] sm:$0xff] }
 0x29b   : > { %3639 = vmatmul.f32.vlgmr.msrb.gmra.mxu2 %v3585_v4 }
 0x29c   : > { %3831 = vmatpush.msrb.mxu2 %v3756_v35  ;;  %v4474_v35 = vmul.f32 %v10397_v20, %v4472_v22 }
 0x29e   : > { %v9554_v14 = vand.u32 4294901760, %v4474_v35 }
 0x2a0   : > { %3615 = vmatmul.f32.vlgmr.msrb.gmra.mxu1 %v9495_v52  ;;  %3687 = vmatmul.f32.vlgmr.msra.gmra.mxu0 %v9495_v52  ;;  %v4668_v60 = vsub.f32 %v4474_v35, %v9554_v14 }
 0x2a1   : > { %3805 = vmatpush.msrb.mxu1 %v3728_v11  ;;  %3761 = vmatmul.f32.vlgmr.msra.gmra.mxu3 %v9495_v52  ;;  %v4364_v11 = vand.u32 4294901760, %v4363_v28 }
 0x2a2   : > { %3890 = vmatpush.msra.mxu0 %v3889_v39  ;;  %3966 = vmatpush.msra.mxu3 %v3889_v39  ;;  %v4669_v50 = vand.u32 4294901760, %v4668_v60 }
 0x2a3   : > { %3735 = vmatmul.f32.vlgmr.msra.gmra.mxu2 %v3588_v31 }
 0x2a4   : > { %3943 = vmatpush.msra.mxu2 %v3916_v33  ;;  %v4670_v31 = vsub.f32 %v4668_v60, %v4669_v50 }
 0x2a6   : > { %v4671_v33 = vand.u32 4294901760, %v4670_v31 }
 0x2a8   : > { %3709 = vmatmul.f32.vlgmr.msra.gmra.mxu1 %v9495_v52  ;;  %3785 = vmatmul.f32.vlgmr.msrb.gmra.mxu0 %v3585_v4  ;;  %v4194_v4 = vand.u32 4294901760, %v4193_v37 }
 0x2a9   : > { %3920 = vmatpush.msra.mxu1 %v3919_v42  ;;  %3855 = vmatmul.f32.vlgmr.msrb.gmra.mxu3 %v9495_v52  ;;  %v8557_v42 = vld [vmem:[%s10279_s1 + $0x78] sm:$0xff] }
 0x2aa   : > { %3992 = vmatpush.msrb.mxu0 %v3917_v49  ;;  %4066 = vmatpush.msrb.mxu3 %v4065_v34  ;;  %v10398_v49 = vld [vmem:[#allocation18_spill] sm:$0xff]  ;;  %v4785_v3 = vsel %vm204_vm0, %v8557_v42, 0 }
 0x2ab   : > { %3833 = vmatmul.f32.vlgmr.msrb.gmra.mxu2 %v9495_v52  ;;  %v4473_v52 = vmul.f32 %v10396_v59, %v4471_v23 }
 0x2ac   : > { %4036 = vmatpush.msrb.mxu2 %v4035_v9 }
 0x2ad   : > { %v4495_v21 = vand.u32 4294901760, %v4473_v52 }
 0x2af   : > { %v4522_v41 = vsub.f32 %v4473_v52, %v4495_v21 }
 0x2b0   : > { %3809 = vmatmul.f32.vlgmr.msrb.gmra.mxu1 %v3586_v38  ;;  %3896 = vmatmul.f32.vlgmr.msra.gmra.mxu0 %v3895_v53  ;;  %v4478_v38 = vsel %vm204_vm0, %v8556_v10, 0 }
 0x2b1   : > { %4014 = vmatpush.msrb.mxu1 %v3889_v39  ;;  %3970 = vmatmul.f32.vlgmr.msra.gmra.mxu3 %v3893_v13  ;;  %v9559_v25 = vand.u32 4294901760, %v4478_v38  ;;  %v4523_v26 = vand.u32 4294901760, %v4522_v41 }
 0x2b2   : > { %4089 = vmatpush.msra.mxu0 %v4062_v27  ;;  %4160 = vmatpush.msra.mxu3 %v4035_v9 }
 0x2b3   : > { %3946 = vmatmul.f32.vlgmr.msra.gmra.mxu2 %v3892_v30  ;;  %v9564_v36 = vsub.f32 %v4478_v38, %v9559_v25  ;;  %v4524_v62 = vsub.f32 %v4522_v41, %v4523_v26  ;;  %v10401_v38 = vld [vmem:[#allocation17_spill] sm:$0xff] }
 0x2b4   : > { %4138 = vmatpush.msra.mxu2 %v4063_v16  ;;  %v4780_v16 = vmul.f32 %v4778_v24, %v10398_v49 }
 0x2b5   : > { %v9568_v39 = vand.u32 4294901760, %v9564_v36 }
 0x2b7   : > { %v4500_v27 = vsub.f32 %v9564_v36, %v9568_v39 }
 0x2b8   : > { %3922 = vmatmul.f32.vlgmr.msra.gmra.mxu1 %v9516_v2  ;;  %3994 = vmatmul.f32.vlgmr.msrb.gmra.mxu0 %v9516_v2 }
 0x2b9   : > { %4112 = vmatpush.msra.mxu1 %v4035_v9  ;;  %4068 = vmatmul.f32.vlgmr.msrb.gmra.mxu3 %v9516_v2  ;;  %v4525_v9 = vand.u32 4294901760, %v4524_v62  ;;  %v4501_v18 = vand.u32 4294901760, %v4500_v27 }
 0x2ba   : > { %4189 = vmatpush.msrb.mxu0 %v4188_v7  ;;  %4265 = vmatpush.msrb.mxu3 %v4188_v7 }
 0x2bb   : > { %4042 = vmatmul.f32.vlgmr.msrb.gmra.mxu2 %v3895_v53 }
 0x2bc   : > { %4242 = vmatpush.msrb.mxu2 %v4215_v29 }
 0x2c0   : > { %4016 = vmatmul.f32.vlgmr.msrb.gmra.mxu1 %v9516_v2  ;;  %4092 = vmatmul.f32.vlgmr.msra.gmra.mxu0 %v3892_v30  ;;  %v10399_v30 = vld [vmem:[#allocation19_spill] sm:$0xff] }
 0x2c1   : > { %4219 = vmatpush.msrb.mxu1 %v4218_v48  ;;  %4162 = vmatmul.f32.vlgmr.msra.gmra.mxu3 %v9516_v2  ;;  %v5084_v48 = vpop.permute.xlu2 %5083 }
 0x2c2   : > { %4291 = vmatpush.msra.mxu0 %v4216_v51  ;;  %4365 = vmatpush.msra.mxu3 %v4364_v11 }
 0x2c3   : > { %4140 = vmatmul.f32.vlgmr.msra.gmra.mxu2 %v9516_v2  ;;  %v4779_v2 = vsel %vm2022_vm14, %v4777_v1, %v4775_v46  ;;  %v8558_v46 = vld [vmem:[%s10279_s1 + $0x80] sm:$0xff] }
 0x2c4   : > { %4335 = vmatpush.msra.mxu2 %v4334_v12  ;;  %v4781_v57 = vmul.f32 %v4779_v2, %v10399_v30  ;;  %v5092_v24 = vsel %vm204_vm0, %v8558_v46, 0 }
 0x2c6   : > { %v9588_v34 = vand.u32 4294901760, %v4781_v57 }
 0x2c8   : > { %4116 = vmatmul.f32.vlgmr.msra.gmra.mxu1 %v3893_v13  ;;  %4195 = vmatmul.f32.vlgmr.msrb.gmra.mxu0 %v4194_v4  ;;  %v9582_v13 = vand.u32 4294901760, %v4780_v16 }
 0x2c9   : > { %4313 = vmatpush.msra.mxu1 %v4188_v7  ;;  %4269 = vmatmul.f32.vlgmr.msrb.gmra.mxu3 %v9539_v19  ;;  %v4975_v7 = vsub.f32 %v4781_v57, %v9588_v34 }
 0x2ca   : > { %4388 = vmatpush.msrb.mxu0 %v4361_v58  ;;  %4459 = vmatpush.msrb.mxu3 %v4334_v12  ;;  %v4829_v53 = vsub.f32 %v4780_v16, %v9582_v13  ;;  %v9642_v16 = vand.u32 4294901760, %v5092_v24 }
 0x2cb   : > { %4245 = vmatmul.f32.vlgmr.msrb.gmra.mxu2 %v4191_v43  ;;  %v4976_v29 = vand.u32 4294901760, %v4975_v7 }
 0x2cc   : > { %4437 = vmatpush.msrb.mxu2 %v4362_v40  ;;  %v4830_v6 = vand.u32 4294901760, %v4829_v53  ;;  %v5082_v40 = vpop.permute.xlu1 %5081 }
 0x2cd   : > { %v4977_v5 = vsub.f32 %v4975_v7, %v4976_v29  ;;  %v5085_v11 = vsel %vm2330_vm15, %v5082_v40, %v5084_v48  ;;  %v5086_v35 = vsel %vm2330_vm15, %v5084_v48, %v5082_v40 }
 0x2ce   : > { %v4831_v51 = vsub.f32 %v4829_v53, %v4830_v6 }
 0x2cf   : > { %v4978_v22 = vand.u32 4294901760, %v4977_v5  ;;  %v5389_v5 = vpop.permute.xlu0 %5388 }
 0x2d0   : > { %4221 = vmatmul.f32.vlgmr.msrb.gmra.mxu1 %v9533_v63  ;;  %4293 = vmatmul.f32.vlgmr.msra.gmra.mxu0 %v9533_v63  ;;  %v4832_v23 = vand.u32 4294901760, %v4831_v51 }
 0x2d1   : > { %4411 = vmatpush.msrb.mxu1 %v4334_v12  ;;  %4367 = vmatmul.f32.vlgmr.msra.gmra.mxu3 %v9533_v63  ;;  %v9596_v12 = vand.u32 4294901760, %v4785_v3 }
 0x2d2   : > { %4496 = vmatpush.msra.mxu0 %v4495_v21  ;;  %4572 = vmatpush.msra.mxu3 %v4495_v21 }
 0x2d3   : > { %4341 = vmatmul.f32.vlgmr.msra.gmra.mxu2 %v4194_v4  ;;  %v9602_v58 = vsub.f32 %v4785_v3, %v9596_v12 }
 0x2d4   : > { %4549 = vmatpush.msra.mxu2 %v4522_v41  ;;  %v5088_v41 = vmul.f32 %v10401_v38, %v5086_v35 }
 0x2d5   : > { %v9608_v28 = vand.u32 4294901760, %v9602_v58 }
 0x2d7   : > { %v4807_v52 = vsub.f32 %v9602_v58, %v9608_v28 }
 0x2d8   : > { %4315 = vmatmul.f32.vlgmr.msra.gmra.mxu1 %v9533_v63  ;;  %4391 = vmatmul.f32.vlgmr.msrb.gmra.mxu0 %v4191_v43 }
 0x2d9   : > { %4526 = vmatpush.msra.mxu1 %v4525_v9  ;;  %4461 = vmatmul.f32.vlgmr.msrb.gmra.mxu3 %v9533_v63 }
 0x2da   : > { %4598 = vmatpush.msrb.mxu0 %v4523_v26  ;;  %4672 = vmatpush.msrb.mxu3 %v4671_v33 }
 0x2db   : > { %4439 = vmatmul.f32.vlgmr.msrb.gmra.mxu2 %v9533_v63 }
 0x2dc   : > { %4642 = vmatpush.msrb.mxu2 %v9554_v14 }
 0x2e0   : > { %4415 = vmatmul.f32.vlgmr.msrb.gmra.mxu1 %v9539_v19  ;;  %4502 = vmatmul.f32.vlgmr.msra.gmra.mxu0 %v4501_v18 }
 0x2e1   : > { %4620 = vmatpush.msrb.mxu1 %v4495_v21  ;;  %4576 = vmatmul.f32.vlgmr.msra.gmra.mxu3 %v9568_v39  ;;  %v10400_v21 = vld [vmem:[#allocation16_spill] sm:$0xff] }
 0x2e2   : > { %4695 = vmatpush.msra.mxu0 %v4668_v60  ;;  %4766 = vmatpush.msra.mxu3 %v9554_v14  ;;  %v5087_v10 = vmul.f32 %v10400_v21, %v5085_v11 }
 0x2e3   : > { %4552 = vmatmul.f32.vlgmr.msra.gmra.mxu2 %v9564_v36 }
 0x2e4   : > { %4744 = vmatpush.msra.mxu2 %v4669_v50  ;;  %v4808_v50 = vand.u32 4294901760, %v4807_v52  ;;  %v9627_v1 = vand.u32 4294901760, %v5087_v10  ;;  %v10403_v52 = vld [vmem:[#allocation21_spill] sm:$0xff] }
 0x2e5   : > { %v2990_v8 = vpop.f32.mrf.mxu0 }
 0x2e6   : > { %v5136_v33 = vsub.f32 %v5087_v10, %v9627_v1 }
 0x2e8   : > { %4528 = vmatmul.f32.vlgmr.msra.gmra.mxu1 %v9559_v25  ;;  %4600 = vmatmul.f32.vlgmr.msrb.gmra.mxu0 %v9559_v25  ;;  %v5137_v42 = vand.u32 4294901760, %v5136_v33 }
 0x2e9   : > { %4718 = vmatpush.msra.mxu1 %v9554_v14  ;;  %4674 = vmatmul.f32.vlgmr.msrb.gmra.mxu3 %v9559_v25 }
 0x2ea   : > { %4803 = vmatpush.msrb.mxu0 %v9582_v13  ;;  %4879 = vmatpush.msrb.mxu3 %v9582_v13 }
 0x2eb   : > { %4648 = vmatmul.f32.vlgmr.msrb.gmra.mxu2 %v4501_v18  ;;  %v3064_v63 = vpop.f32.mrf.mxu3 }
 0x2ec   : > { %4856 = vmatpush.msrb.mxu2 %v4829_v53 }
 0x2ed   : > { %v3016_v43 = vpop.f32.mrf.mxu1  ;;  %v3040_v45 = vpop.f32.mrf.mxu2 }
 0x2ee   : > { %v3017_v19 = vadd.f32 %v3016_v43, %v2990_v8  ;;  %v3088_v54 = vpop.f32.mrf.mxu0 }
 0x2f0   : > { %v3041_v37 = vadd.f32 %v3040_v45, %v3017_v19  ;;  %4622 = vmatmul.f32.vlgmr.msrb.gmra.mxu1 %v9559_v25  ;;  %4698 = vmatmul.f32.vlgmr.msra.gmra.mxu0 %v9564_v36 }
 0x2f1   : > { %4833 = vmatpush.msrb.mxu1 %v4832_v23  ;;  %4768 = vmatmul.f32.vlgmr.msra.gmra.mxu3 %v9559_v25 }
 0x2f2   : > { %v3065_v4 = vadd.f32 %v3064_v63, %v3041_v37  ;;  %4905 = vmatpush.msra.mxu0 %v4830_v6  ;;  %4979 = vmatpush.msra.mxu3 %v4978_v22  ;;  %v5138_v6 = vsub.f32 %v5136_v33, %v5137_v42  ;;  %v10402_v37 = vld [vmem:[#allocation20_spill] sm:$0xff] }
 0x2f3   : > { %4746 = vmatmul.f32.vlgmr.msra.gmra.mxu2 %v9559_v25  ;;  %v9633_v25 = vand.u32 4294901760, %v5088_v41 }
 0x2f4   : > { %4949 = vmatpush.msra.mxu2 %v9588_v34  ;;  %v9622_v14 = vadd.f32 %v3088_v54, %v3065_v4  ;;  %v3162_v26 = vpop.f32.mrf.mxu3  ;;  %v5139_v19 = vand.u32 4294901760, %v5138_v6 }
 0x2f5   : > { %v9625_v60 = vpop.f32.mrf.mxu1  ;;  %v3136_v36 = vpop.f32.mrf.mxu2 }
 0x2f6   : > { %v3186_v62 = vpop.f32.mrf.mxu0  ;;  %v3163_v31 = vadd.f32 %v3162_v26, %v3136_v36  ;;  %v8559_v36 = vld [vmem:[%s10279_s1 + $0x88] sm:$0xff] }
 0x2f8   : > { %4722 = vmatmul.f32.vlgmr.msra.gmra.mxu1 %v9568_v39  ;;  %4809 = vmatmul.f32.vlgmr.msrb.gmra.mxu0 %v4808_v50  ;;  %v3187_v9 = vadd.f32 %v3186_v62, %v3163_v31  ;;  %v5282_v39 = vsub.f32 %v5088_v41, %v9633_v25  ;;  %v5399_v62 = vsel %vm204_vm0, %v8559_v36, 0 }
 0x2f9   : > { %4927 = vmatpush.msra.mxu1 %v9582_v13  ;;  %4883 = vmatmul.f32.vlgmr.msrb.gmra.mxu3 %v9608_v28 }
 0x2fa   : > { %5002 = vmatpush.msrb.mxu0 %v4975_v7  ;;  %5073 = vmatpush.msrb.mxu3 %v9588_v34  ;;  %v5283_v53 = vand.u32 4294901760, %v5282_v39  ;;  %v9650_v7 = vsub.f32 %v5092_v24, %v9642_v16 }
 0x2fb   : > { %4859 = vmatmul.f32.vlgmr.msrb.gmra.mxu2 %v9602_v58 }
 0x2fc   : > { %5051 = vmatpush.msrb.mxu2 %v4976_v29  ;;  %v3256_v2 = vpop.f32.mrf.mxu3  ;;  %v5391_v29 = vpop.permute.xlu1 %5390  ;;  %v9662_v40 = vand.u32 4294901760, %v9650_v7 }
 0x2fd   : > { %v3210_v27 = vpop.f32.mrf.mxu1  ;;  %v3234_v18 = vpop.f32.mrf.mxu2  ;;  %v5392_v54 = vsel %vm2638_vm1, %v5389_v5, %v5391_v29  ;;  %v5393_v11 = vsel %vm2638_vm1, %v5391_v29, %v5389_v5 }
 0x2fe   : > { %v3211_v57 = vadd.f32 %v3210_v27, %v3187_v9  ;;  %v9644_v13 = vpop.f32.mrf.mxu0  ;;  %v5114_v23 = vsub.f32 %v9650_v7, %v9662_v40  ;;  %v5394_v22 = vmul.f32 %v5392_v54, %v10402_v37 }
 0x300   : > { %v3235_v3 = vadd.f32 %v3234_v18, %v3211_v57  ;;  %4835 = vmatmul.f32.vlgmr.msrb.gmra.mxu1 %v9596_v12  ;;  %4907 = vmatmul.f32.vlgmr.msra.gmra.mxu0 %v9596_v12  ;;  %v5115_v10 = vand.u32 4294901760, %v5114_v23 }
 0x301   : > { %5025 = vmatpush.msrb.mxu1 %v9588_v34  ;;  %4981 = vmatmul.f32.vlgmr.msra.gmra.mxu3 %v9596_v12  ;;  %v5284_v34 = vsub.f32 %v5282_v39, %v5283_v53 }
 0x302   : > { %v9652_v8 = vadd.f32 %v3256_v2, %v3235_v3  ;;  %5110 = vmatpush.msra.mxu0 %v9627_v1  ;;  %5186 = vmatpush.msra.mxu3 %v9627_v1 }
 0x303   : > { %4955 = vmatmul.f32.vlgmr.msra.gmra.mxu2 %v4808_v50  ;;  %v5285_v48 = vand.u32 4294901760, %v5284_v34  ;;  %v5416_v50 = vand.u32 4294901760, %v5394_v22 }
 0x304   : > { %5163 = vmatpush.msra.mxu2 %v5136_v33  ;;  %v9659_v51 = vpop.f32.mrf.mxu3 }
 0x305   : > { %v9657_v63 = vpop.f32.mrf.mxu1  ;;  %v5443_v31 = vsub.f32 %v5394_v22, %v5416_v50 }
 0x306   : > { %v9664_v43 = vpop.f32.mrf.mxu2  ;;  %v9666_v45 = vpop.f32.mrf.mxu0 }
 0x307   : > { %v5444_v27 = vand.u32 4294901760, %v5443_v31 }
 0x308   : > { %4929 = vmatmul.f32.vlgmr.msra.gmra.mxu1 %v9596_v12  ;;  %5005 = vmatmul.f32.vlgmr.msrb.gmra.mxu0 %v9602_v58  ;;  %v5395_v58 = vmul.f32 %v5393_v11, %v10403_v52 }
 0x309   : > { %5140 = vmatpush.msra.mxu1 %v5139_v19  ;;  %5075 = vmatmul.f32.vlgmr.msrb.gmra.mxu3 %v9596_v12  ;;  %v5445_v57 = vsub.f32 %v5443_v31, %v5444_v27 }
 0x30a   : > { %5212 = vmatpush.msrb.mxu0 %v5137_v42  ;;  %5286 = vmatpush.msrb.mxu3 %v5285_v48 }
 0x30b   : > { %5053 = vmatmul.f32.vlgmr.msrb.gmra.mxu2 %v9596_v12  ;;  %v5562_v12 = vand.u32 4294901760, %v5395_v58  ;;  %v5446_v34 = vand.u32 4294901760, %v5445_v57 }
 0x30c   : > { %5256 = vmatpush.msrb.mxu2 %v9633_v25  ;;  %v9683_v4 = vpop.f32.mrf.mxu3 }
 0x30d   : > { %v9681_v35 = vpop.f32.mrf.mxu1  ;;  %v5589_v46 = vsub.f32 %v5395_v58, %v5562_v12 }
 0x30e   : > { %v9685_v41 = vpop.f32.mrf.mxu2  ;;  %v9687_v26 = vpop.f32.mrf.mxu0 }
 0x310   : > { %5029 = vmatmul.f32.vlgmr.msrb.gmra.mxu1 %v9608_v28  ;;  %5116 = vmatmul.f32.vlgmr.msra.gmra.mxu0 %v5115_v10  ;;  %v5418_v28 = vand.u32 4294901760, %v5399_v62 }
 0x311   : > { %5234 = vmatpush.msrb.mxu1 %v9627_v1  ;;  %5190 = vmatmul.f32.vlgmr.msra.gmra.mxu3 %v9662_v40 }
 0x312   : > { %5309 = vmatpush.msra.mxu0 %v5282_v39  ;;  %5380 = vmatpush.msra.mxu3 %v9633_v25  ;;  %v5590_v39 = vand.u32 4294901760, %v5589_v46  ;;  %v5419_v2 = vsub.f32 %v5399_v62, %v5418_v28 }
 0x313   : > { %5166 = vmatmul.f32.vlgmr.msra.gmra.mxu2 %v9650_v7 }
 0x314   : > { %5358 = vmatpush.msra.mxu2 %v5283_v53  ;;  %v9700_v24 = vpop.f32.mrf.mxu3  ;;  %v5591_v3 = vsub.f32 %v5589_v46, %v5590_v39  ;;  %v5420_v53 = vand.u32 4294901760, %v5419_v2 }
 0x315   : > { %v9698_v9 = vpop.f32.mrf.mxu1  ;;  %10404 = vst [vmem:[#allocation35_spill] sm:$0xff] %v9700_v24 }
 0x316   : > { %v9702_v33 = vpop.f32.mrf.mxu2  ;;  %v9704_v1 = vpop.f32.mrf.mxu0  ;;  %v5421_v5 = vsub.f32 %v5419_v2, %v5420_v53 }
 0x317   : > { %10405 = vst [vmem:[#allocation33_spill] sm:$0xff] %v9702_v33 }
 0x318   : > { %5142 = vmatmul.f32.vlgmr.msra.gmra.mxu1 %v9642_v16  ;;  %5214 = vmatmul.f32.vlgmr.msrb.gmra.mxu0 %v9642_v16  ;;  %v5422_v48 = vand.u32 4294901760, %v5421_v5 }
 0x319   : > { %5332 = vmatpush.msra.mxu1 %v9633_v25  ;;  %5288 = vmatmul.f32.vlgmr.msrb.gmra.mxu3 %v9642_v16  ;;  %v5592_v25 = vand.u32 4294901760, %v5591_v3 }
 0x31a   : > { %5417 = vmatpush.msrb.mxu0 %v5416_v50  ;;  %5493 = vmatpush.msrb.mxu3 %v5416_v50 }
 0x31b   : > { %5262 = vmatmul.f32.vlgmr.msrb.gmra.mxu2 %v5115_v10 }
 0x31c   : > { %5470 = vmatpush.msrb.mxu2 %v5443_v31  ;;  %v9712_v42 = vpop.f32.mrf.mxu3 }
 0x31d   : > { %v9710_v18 = vpop.f32.mrf.mxu1 }
 0x31e   : > { %v9714_v6 = vpop.f32.mrf.mxu2  ;;  %v9716_v29 = vpop.f32.mrf.mxu0 }
 0x320   : > { %5236 = vmatmul.f32.vlgmr.msrb.gmra.mxu1 %v9642_v16  ;;  %5312 = vmatmul.f32.vlgmr.msra.gmra.mxu0 %v9650_v7 }
 0x321   : > { %5447 = vmatpush.msrb.mxu1 %v5446_v34  ;;  %5382 = vmatmul.f32.vlgmr.msra.gmra.mxu3 %v9642_v16 }
 0x322   : > { %5519 = vmatpush.msra.mxu0 %v5444_v27  ;;  %5593 = vmatpush.msra.mxu3 %v5592_v25 }
 0x323   : > { %5360 = vmatmul.f32.vlgmr.msra.gmra.mxu2 %v9642_v16 }
 0x324   : > { %5563 = vmatpush.msra.mxu2 %v5562_v12  ;;  %v9724_v54 = vpop.f32.mrf.mxu3 }
 0x325   : > { %v9722_v19 = vpop.f32.mrf.mxu1 }
 0x326   : > { %v9726_v23 = vpop.f32.mrf.mxu2  ;;  %v9728_v11 = vpop.f32.mrf.mxu0 }
 0x328   : > { %5336 = vmatmul.f32.vlgmr.msra.gmra.mxu1 %v9662_v40  ;;  %5423 = vmatmul.f32.vlgmr.msrb.gmra.mxu0 %v5422_v48 }
 0x329   : > { %5541 = vmatpush.msra.mxu1 %v5416_v50  ;;  %5497 = vmatmul.f32.vlgmr.msrb.gmra.mxu3 %v5420_v53 }
 0x32a   : > { %5616 = vmatpush.msrb.mxu0 %v5589_v46  ;;  %5687 = vmatpush.msrb.mxu3 %v5562_v12 }
 0x32b   : > { %5473 = vmatmul.f32.vlgmr.msrb.gmra.mxu2 %v5419_v2 }
 0x32c   : > { %5665 = vmatpush.msrb.mxu2 %v5590_v39  ;;  %v9733_v7 = vpop.f32.mrf.mxu3 }
 0x32d   : > { %v9731_v16 = vpop.f32.mrf.mxu1  ;;  %10406 = vst [vmem:[#allocation40_spill] sm:$0xff] %v9733_v7 }
 0x32e   : > { %v9735_v22 = vpop.f32.mrf.mxu2  ;;  %v9737_v58 = vpop.f32.mrf.mxu0 }
 0x32f   : > { %10407 = vst [vmem:[#allocation27_spill] sm:$0xff] %v9735_v22  ;;  %v3111_v22 = vadd.f32 %v9625_v60, %v9622_v14 }
 0x330   : > { %5449 = vmatmul.f32.vlgmr.msrb.gmra.mxu1 %v5418_v28  ;;  %5521 = vmatmul.f32.vlgmr.msra.gmra.mxu0 %v5418_v28 }
 0x331   : > { %5639 = vmatpush.msrb.mxu1 %v5562_v12  ;;  %5595 = vmatmul.f32.vlgmr.msra.gmra.mxu3 %v5418_v28 }
 0x333   : > { %5569 = vmatmul.f32.vlgmr.msra.gmra.mxu2 %v5422_v48 }
 0x334   : > { %v9739_v10 = vpop.f32.mrf.mxu3 }
 0x335   : > { %v3923_v40 = vpop.f32.mrf.mxu1 }
 0x336   : > { %v9741_v50 = vpop.f32.mrf.mxu2  ;;  %v9743_v36 = vpop.f32.mrf.mxu0 }
 0x338   : > { %5543 = vmatmul.f32.vlgmr.msra.gmra.mxu1 %v5418_v28  ;;  %5619 = vmatmul.f32.vlgmr.msrb.gmra.mxu0 %v5419_v2 }
 0x339   : > { %5689 = vmatmul.f32.vlgmr.msrb.gmra.mxu3 %v5418_v28 }
 0x33b   : > { %5667 = vmatmul.f32.vlgmr.msrb.gmra.mxu2 %v5418_v28 }
 0x33c   : > { %v9747_v31 = vpop.f32.mrf.mxu3 }
 0x33d   : > { %v9745_v62 = vpop.f32.mrf.mxu1 }
 0x33e   : > { %v9749_v46 = vpop.f32.mrf.mxu2  ;;  %v9751_v12 = vpop.f32.mrf.mxu0 }
 0x340   : > { %5643 = vmatmul.f32.vlgmr.msrb.gmra.mxu1 %v5420_v53 }
 0x344   : > { %v9755_v39 = vpop.f32.mrf.mxu3 }
 0x345   : > { %v9753_v27 = vpop.f32.mrf.mxu1  ;;  %10409 = vst [vmem:[#allocation34_spill] sm:$0xff] %v9755_v39 }
 0x346   : > { %10408 = vst [vmem:[#allocation29_spill] sm:$0xff] %v9753_v27  ;;  %v9757_v57 = vpop.f32.mrf.mxu2  ;;  %v4196_v3 = vpop.f32.mrf.mxu0 }
 0x347   : > { %10410 = vst [vmem:[#allocation43_spill] sm:$0xff] %v9757_v57 }
 0x34c   : > { %v4270_v2 = vpop.f32.mrf.mxu3 }
 0x34d   : > { %v4222_v34 = vpop.f32.mrf.mxu1 }
 0x34e   : > { %v4246_v25 = vpop.f32.mrf.mxu2  ;;  %v9759_v28 = vpop.f32.mrf.mxu0 }
 0x354   : > { %v9763_v48 = vpop.f32.mrf.mxu3 }
 0x355   : > { %v9761_v5 = vpop.f32.mrf.mxu1 }
 0x356   : > { %v9765_v52 = vpop.f32.mrf.mxu2  ;;  %v9767_v37 = vpop.f32.mrf.mxu0 }
 0x357   : > { %10411 = vst [vmem:[#allocation41_spill] sm:$0xff] %v9767_v37 }
 0x35c   : > { %v9771_v38 = vpop.f32.mrf.mxu3 }
 0x35d   : > { %v9769_v53 = vpop.f32.mrf.mxu1  ;;  %10413 = vst [vmem:[#allocation31_spill] sm:$0xff] %v9771_v38 }
 0x35e   : > { %10412 = vst [vmem:[#allocation25_spill] sm:$0xff] %v9769_v53  ;;  %v9773_v21 = vpop.f32.mrf.mxu2  ;;  %v4503_v30 = vpop.f32.mrf.mxu0 }
 0x35f   : > { %10414 = vst [vmem:[#allocation36_spill] sm:$0xff] %v9773_v21 }
 0x364   : > { %v4577_v20 = vpop.f32.mrf.mxu3 }
 0x365   : > { %v4529_v49 = vpop.f32.mrf.mxu1 }
 0x366   : > { %v4553_v59 = vpop.f32.mrf.mxu2  ;;  %v9775_v32 = vpop.f32.mrf.mxu0  ;;  %v4530_v60 = vadd.f32 %v4529_v49, %v4503_v30 }
 0x36c   : > { %v9779_v61 = vpop.f32.mrf.mxu3 }
 0x36d   : > { %v9777_v17 = vpop.f32.mrf.mxu1  ;;  %10416 = vst [vmem:[#allocation23_spill] sm:$0xff] %v9779_v61 }
 0x36e   : > { %10415 = vst [vmem:[#allocation42_spill] sm:$0xff] %v9777_v17  ;;  %v9781_v44 = vpop.f32.mrf.mxu2  ;;  %v9783_v55 = vpop.f32.mrf.mxu0 }
 0x36f   : > { %10417 = vst [vmem:[#allocation28_spill] sm:$0xff] %v9781_v44 }
 0x370   : > { %10418 = vst [vmem:[#allocation38_spill] sm:$0xff] %v9783_v55 }
 0x374   : > { %v9787_v15 = vpop.f32.mrf.mxu3 }
 0x375   : > { %v9785_v47 = vpop.f32.mrf.mxu1  ;;  %10420 = vst [vmem:[#allocation24_spill] sm:$0xff] %v9787_v15 }
 0x376   : > { %10419 = vst [vmem:[#allocation44_spill] sm:$0xff] %v9785_v47  ;;  %v9789_v0 = vpop.f32.mrf.mxu2  ;;  %v4810_v56 = vpop.f32.mrf.mxu0 }
 0x377   : > { %10421 = vst [vmem:[#allocation32_spill] sm:$0xff] %v9789_v0 }
 0x37c   : > { %v4884_v39 = vpop.f32.mrf.mxu3 }
 0x37d   : > { %v4836_v38 = vpop.f32.mrf.mxu1 }
 0x37e   : > { %v4860_v24 = vpop.f32.mrf.mxu2  ;;  %v9791_v21 = vpop.f32.mrf.mxu0 }
 0x37f   : > { %10422 = vst [vmem:[#allocation46_spill] sm:$0xff] %v9791_v21 }
 0x384   : > { %v9795_v57 = vpop.f32.mrf.mxu3 }
 0x385   : > { %v9793_v7 = vpop.f32.mrf.mxu1  ;;  %10424 = vst [vmem:[#allocation26_spill] sm:$0xff] %v9795_v57 }
 0x386   : > { %10423 = vst [vmem:[#allocation22_spill] sm:$0xff] %v9793_v7  ;;  %v9797_v33 = vpop.f32.mrf.mxu2  ;;  %v9799_v53 = vpop.f32.mrf.mxu0  ;;  %v3286_v7 = vadd.f32 %v9644_v13, %v3111_v22 }
 0x387   : > { %10425 = vst [vmem:[#allocation39_spill] sm:$0xff] %v9797_v33  ;;  %v3617_v33 = vadd.f32 %v9710_v18, %v9704_v1 }
 0x388   : > { %10426 = vst [vmem:[#allocation30_spill] sm:$0xff] %v9799_v53  ;;  %v3312_v53 = vadd.f32 %v9657_v63, %v3286_v7  ;;  %v4837_v7 = vadd.f32 %v4836_v38, %v4810_v56 }
 0x38a   : > { %v3336_v21 = vadd.f32 %v9664_v43, %v3312_v53  ;;  %v3432_v43 = vadd.f32 %v9685_v41, %v9652_v8 }
 0x38c   : > { %v9803_v47 = vpop.f32.mrf.mxu3  ;;  %v3360_v63 = vadd.f32 %v9659_v51, %v3336_v21 }
 0x38d   : > { %v9801_v55 = vpop.f32.mrf.mxu1  ;;  %10428 = vst [vmem:[#allocation37_spill] sm:$0xff] %v9803_v47  ;;  %v3641_v47 = vadd.f32 %v9714_v6, %v3617_v33  ;;  %v4554_v6 = vadd.f32 %v4553_v59, %v4530_v60  ;;  %v3458_v59 = vadd.f32 %v9683_v4, %v3432_v43  ;;  %v4369_v4 = vadd.f32 %v9763_v48, %v9765_v52  ;;  %v10441_v43 = vld [vmem:[#allocation22_spill] sm:$0xff] }
 0x38e   : > { %10427 = vst [vmem:[#allocation47_spill] sm:$0xff] %v9801_v55  ;;  %v9805_v15 = vpop.f32.mrf.mxu2  ;;  %v5117_v0 = vpop.f32.mrf.mxu0  ;;  %v3924_v55 = vadd.f32 %v3923_v40, %v9737_v58  ;;  %v3384_v58 = vadd.f32 %v9666_v45, %v3360_v63  ;;  %v4861_v40 = vadd.f32 %v4860_v24, %v4837_v7  ;;  %v4070_v45 = vadd.f32 %v9747_v31, %v9749_v46  ;;  %v10431_v46 = vld [vmem:[#allocation23_spill] sm:$0xff] }
 0x38f   : > { %10429 = vst [vmem:[#allocation45_spill] sm:$0xff] %v9805_v15  ;;  %v4223_v15 = vadd.f32 %v4222_v34, %v4196_v3  ;;  %v3665_v1 = vadd.f32 %v9712_v42, %v3641_v47  ;;  %v3763_v47 = vadd.f32 %v9724_v54, %v9726_v23  ;;  %v4578_v21 = vadd.f32 %v4577_v20, %v4554_v6  ;;  %v10433_v3 = vld [vmem:[#allocation29_spill] sm:$0xff] }
 0x390   : > { %v3948_v14 = vadd.f32 %v9741_v50, %v3924_v55  ;;  %v3406_v24 = vadd.f32 %v9681_v35, %v3384_v58  ;;  %v4885_v42 = vadd.f32 %v4884_v39, %v4861_v40  ;;  %v3482_v23 = vadd.f32 %v9687_v26, %v3458_v59  ;;  %v10434_v34 = vld [vmem:[#allocation41_spill] sm:$0xff] }
 0x391   : > { %v4247_v18 = vadd.f32 %v4246_v25, %v4223_v15  ;;  %v3689_v49 = vadd.f32 %v9716_v29, %v3665_v1  ;;  %v3787_v20 = vadd.f32 %v9728_v11, %v3763_v47  ;;  %v4602_v54 = vadd.f32 %v9775_v32, %v4578_v21  ;;  %v10430_v11 = vld [vmem:[#allocation28_spill] sm:$0xff]  ;;  %v10442_v58 = vld [vmem:[#allocation33_spill] sm:$0xff]  ;;  %v10443_v47 = vld [vmem:[#allocation43_spill] sm:$0xff] }
 0x392   : > { %v3972_v33 = vadd.f32 %v9739_v10, %v3948_v14  ;;  %v3506_v31 = vadd.f32 %v9698_v9, %v3482_v23  ;;  %v4393_v26 = vadd.f32 %v10434_v34, %v4369_v4  ;;  %v10438_v14 = vld [vmem:[#allocation27_spill] sm:$0xff] }
 0x393   : > { %v4271_v30 = vadd.f32 %v4270_v2, %v4247_v18  ;;  %v3811_v50 = vadd.f32 %v9731_v16, %v3787_v20  ;;  %v10439_v18 = vld [vmem:[#allocation25_spill] sm:$0xff]  ;;  %v10449_v23 = vld [vmem:[#allocation35_spill] sm:$0xff] }
 0x394   : > { %v5191_v37 = vpop.f32.mrf.mxu3  ;;  %v3996_v15 = vadd.f32 %v9743_v36, %v3972_v33  ;;  %v4094_v36 = vadd.f32 %v9751_v12, %v4070_v45  ;;  %v10437_v12 = vld [vmem:[#allocation26_spill] sm:$0xff]  ;;  %v4417_v63 = vadd.f32 %v10439_v18, %v4393_v26  ;;  %v3530_v40 = vadd.f32 %v10442_v58, %v3506_v31  ;;  %v10451_v31 = vld [vmem:[#allocation32_spill] sm:$0xff] }
 0x395   : > { %v5143_v17 = vpop.f32.mrf.mxu1  ;;  %v4295_v41 = vadd.f32 %v9759_v28, %v4271_v30  ;;  %v10436_v28 = vld [vmem:[#allocation39_spill] sm:$0xff]  ;;  %v3835_v60 = vadd.f32 %v10438_v14, %v3811_v50  ;;  %v10440_v33 = vld [vmem:[#allocation38_spill] sm:$0xff] }
 0x396   : > { %v5167_v27 = vpop.f32.mrf.mxu2  ;;  %v5215_v57 = vpop.f32.mrf.mxu0  ;;  %v5144_v55 = vadd.f32 %v5143_v17, %v5117_v0  ;;  %v3711_v17 = vadd.f32 %v9722_v19, %v3689_v49  ;;  %v4018_v29 = vadd.f32 %v9745_v62, %v3996_v15  ;;  %v4676_v62 = vadd.f32 %v10431_v46, %v10430_v11  ;;  %v10448_v4 = vld [vmem:[#allocation47_spill] sm:$0xff] }
 0x397   : > { %v4317_v35 = vadd.f32 %v9761_v5, %v4295_v41  ;;  %v4118_v32 = vadd.f32 %v10433_v3, %v4094_v36  ;;  %v4983_v48 = vadd.f32 %v10437_v12, %v10436_v28  ;;  %v10446_v41 = vld [vmem:[#allocation40_spill] sm:$0xff] }
 0x398   : > { %v5168_v51 = vadd.f32 %v5167_v27, %v5144_v55  ;;  %v3859_v10 = vadd.f32 %v3711_v17, %v3406_v24  ;;  %v10432_v27 = vld [vmem:[#allocation46_spill] sm:$0xff]  ;;  %v4700_v6 = vadd.f32 %v10440_v33, %v4676_v62  ;;  %v3857_v24 = vadd.f32 %v10446_v41, %v3835_v60 }
 0x399   : > { %v4909_v39 = vadd.f32 %v10432_v27, %v4885_v42  ;;  %v4142_v15 = vadd.f32 %v10443_v47, %v4118_v32  ;;  %v10447_v42 = vld [vmem:[#allocation36_spill] sm:$0xff]  ;;  %v10453_v32 = vld [vmem:[#allocation45_spill] sm:$0xff] }
 0x39a   : > { %v5192_v19 = vadd.f32 %v5191_v37, %v5168_v51  ;;  %v4166_v52 = vadd.f32 %v4018_v29, %v3859_v10  ;;  %v10435_v37 = vld [vmem:[#allocation42_spill] sm:$0xff]  ;;  %v4441_v20 = vadd.f32 %v10447_v42, %v4417_v63 }
 0x39b   : > { %v4624_v2 = vadd.f32 %v10435_v37, %v4602_v54  ;;  %v4931_v55 = vadd.f32 %v10441_v43, %v4909_v39  ;;  %v10445_v51 = vld [vmem:[#allocation30_spill] sm:$0xff] }
 0x39c   : > { %v5289_v13 = vpop.f32.mrf.mxu3  ;;  %v5216_v5 = vadd.f32 %v5215_v57, %v5192_v19  ;;  %v4465_v1 = vadd.f32 %v4317_v35, %v4166_v52  ;;  %v10444_v57 = vld [vmem:[#allocation44_spill] sm:$0xff]  ;;  %v3552_v19 = vadd.f32 %v10449_v23, %v3530_v40  ;;  %v10450_v10 = vld [vmem:[#allocation34_spill] sm:$0xff]  ;;  %v10452_v52 = vld [vmem:[#allocation31_spill] sm:$0xff] }
 0x39d   : > { %v9817_v61 = vpop.f32.mrf.mxu1  ;;  %v4724_v59 = vadd.f32 %v10444_v57, %v4700_v6  ;;  %v4164_v50 = vadd.f32 %v10450_v10, %v4142_v15  ;;  %v4463_v3 = vadd.f32 %v10452_v52, %v4441_v20  ;;  %v10458_v20 = vld [vmem:[#allocation9_spill] sm:$0xff] }
 0x39e   : > { %v5263_v22 = vpop.f32.mrf.mxu2  ;;  %v9819_v44 = vpop.f32.mrf.mxu0  ;;  %v4772_v21 = vadd.f32 %v4624_v2, %v4465_v1  ;;  %v5238_v17 = vadd.f32 %v9817_v61, %v5216_v5  ;;  %v3860_v39 = vadd.f32 %v3857_v24, %v3552_v19  ;;  %v10455_v5 = vld [vmem:[#allocation37_spill] sm:$0xff]  ;;  %v10457_v24 = vld [vmem:[#allocation8_spill] sm:$0xff] }
 0x39f   : > { %v5290_v49 = vadd.f32 %v5289_v13, %v5263_v22  ;;  %v4748_v11 = vadd.f32 %v10451_v31, %v4724_v59 }
 0x3a0   : > { %v5079_v29 = vadd.f32 %v4931_v55, %v4772_v21  ;;  %v4167_v2 = vadd.f32 %v4164_v50, %v3860_v39 }
 0x3a1   : > { %v5314_v22 = vadd.f32 %v9819_v44, %v5290_v49 }
 0x3a2   : > { %v5386_v61 = vadd.f32 %v5238_v17, %v5079_v29 }
 0x3a4   : > { %v9831_v38 = vpop.f32.mrf.mxu3 }
 0x3a5   : > { %v5337_v56 = vpop.f32.mrf.mxu1 }
 0x3a6   : > { %v9834_v8 = vpop.f32.mrf.mxu2  ;;  %v5424_v0 = vpop.f32.mrf.mxu0  ;;  %v5338_v46 = vadd.f32 %v5337_v56, %v5314_v22 }
 0x3a8   : > { %v5362_v28 = vadd.f32 %v9834_v8, %v5338_v46 }
 0x3aa   : > { %v5384_v60 = vadd.f32 %v9831_v38, %v5362_v28  ;;  %v8561_v38 = vld [vmem:[%s10279_s1 + $0x98] sm:$0xff] }
 0x3ab   : > { %v5718_v49 = vsel %vm204_vm0, %v8561_v38, 0 }
 0x3ac   : > { %v5498_v16 = vpop.f32.mrf.mxu3 }
 0x3ad   : > { %v5450_v25 = vpop.f32.mrf.mxu1 }
 0x3ae   : > { %v5451_v53 = vadd.f32 %v5450_v25, %v5424_v0  ;;  %v5474_v9 = vpop.f32.mrf.mxu2  ;;  %v5522_v7 = vpop.f32.mrf.mxu0  ;;  %v5007_v0 = vadd.f32 %v10445_v51, %v4983_v48  ;;  %v10454_v25 = vld [vmem:[#allocation24_spill] sm:$0xff]  ;;  %v4466_v48 = vadd.f32 %v4463_v3, %v4167_v2 }
 0x3b0   : > { %v5475_v30 = vadd.f32 %v5474_v9, %v5451_v53  ;;  %v5031_v13 = vadd.f32 %v10448_v4, %v5007_v0  ;;  %v10459_v4 = vld [vmem:[#allocation10_spill] sm:$0xff] }
 0x3b2   : > { %v5499_v45 = vadd.f32 %v5498_v16, %v5475_v30  ;;  %v5055_v34 = vadd.f32 %v10453_v32, %v5031_v13  ;;  %v4770_v16 = vadd.f32 %v10454_v25, %v4748_v11  ;;  %v9921_v30 = vand.u32 4294901760, %v5718_v49 }
 0x3b4   : > { %v5523_v54 = vadd.f32 %v5522_v7, %v5499_v45  ;;  %v5596_v35 = vpop.f32.mrf.mxu3  ;;  %v5077_v56 = vadd.f32 %v10455_v5, %v5055_v34  ;;  %v4773_v14 = vadd.f32 %v4770_v16, %v4466_v48  ;;  %v9924_v40 = vsub.f32 %v5718_v49, %v9921_v30 }
 0x3b5   : > { %v5544_v36 = vpop.f32.mrf.mxu1 }
 0x3b6   : > { %v5545_v62 = vadd.f32 %v5544_v36, %v5523_v54  ;;  %v5570_v27 = vpop.f32.mrf.mxu2  ;;  %v5620_v37 = vpop.f32.mrf.mxu0  ;;  %v5080_v8 = vadd.f32 %v5077_v56, %v4773_v14  ;;  %v9927_v47 = vand.u32 4294901760, %v9924_v40  ;;  %v10460_v54 = vld [vmem:[#allocation11_spill] sm:$0xff] }
 0x3b7   : > { %v5597_v44 = vadd.f32 %v5596_v35, %v5570_v27  ;;  %v8560_v35 = vld [vmem:[%s10279_s1 + $0x90] sm:$0xff] }
 0x3b8   : > { %v5693_v26 = vadd.f32 %v5545_v62, %v5386_v61  ;;  %v5387_v33 = vadd.f32 %v5384_v60, %v5080_v8  ;;  %v5740_v57 = vsub.f32 %v9924_v40, %v9927_v47  ;;  %v6013_v62 = vsel %vm204_vm0, %v8560_v35, 0 }
 0x3b9   : > { %v5621_v53 = vadd.f32 %v5620_v37, %v5597_v44  ;;  %v9952_v32 = vand.u32 4294901760, %v6013_v62 }
 0x3ba   : > { %v9879_v12 = vmax.f32 %v5693_v26, 0.0  ;;  %v5741_v22 = vand.u32 4294901760, %v5740_v57 }
 0x3bb   : > { %v9957_v2 = vsub.f32 %v6013_v62, %v9952_v32 }
 0x3bc   : > { %5697 = vrot.lane.b32.xlu1 %v9879_v12, %s8689_s27  ;;  %5707 = vrot.lane.b32.xlu2 %v9879_v12, %s8688_s26  ;;  %v5690_v63 = vpop.f32.mrf.mxu3 }
 0x3bd   : > { %v5644_v9 = vpop.f32.mrf.mxu1  ;;  %v9961_v28 = vand.u32 4294901760, %v9957_v2 }
 0x3be   : > { %v5645_v1 = vadd.f32 %v5644_v9, %v5621_v53  ;;  %v5668_v18 = vpop.f32.mrf.mxu2 }
 0x3bf   : > { %v6035_v14 = vsub.f32 %v9957_v2, %v9961_v28 }
 0x3c0   : > { %v5669_v7 = vadd.f32 %v5668_v18, %v5645_v1  ;;  %v10461_v1 = vld [vmem:[#allocation14_spill] sm:$0xff] }
 0x3c2   : > { %v5691_v6 = vadd.f32 %v5690_v63, %v5669_v7  ;;  %v10462_v63 = vld [vmem:[#allocation15_spill] sm:$0xff]  ;;  %v6036_v7 = vand.u32 4294901760, %v6035_v14 }
 0x3c4   : > { %v5694_v43 = vadd.f32 %v5691_v6, %v5387_v33  ;;  %v8562_v33 = vld [vmem:[%s10279_s1 + $0xa0] sm:$0xff] }
 0x3c5   : > { %v6318_v38 = vsel %vm204_vm0, %v8562_v33, 0 }
 0x3c6   : > { %v9887_v55 = vmax.f32 %v5694_v43, 0.0 }
 0x3c8   : > { %5709 = vrot.lane.b32.xlu0 %v9887_v55, %s8688_s26  ;;  %6309 = vrot.lane.b32.xlu1 %v9887_v55, %s8690_s28  ;;  %s8532_s26 = sshll.u32 %s134_s8, 4 }
 0x3c9   : > { %5699 = vrot.lane.b32.xlu2 %v9887_v55, %s8689_s27  ;;  %s136_s27 = scalar_lea.vmem [#allocation2], %s8532_s26 }
 0x3d0   : > { %6307 = vrot.lane.b32.xlu0 %v9879_v12, %s8690_s28  ;;  %7220 = vrot.lane.b32.xlu1 %v9879_v12, %s8692_s30  ;;  %s8575_s28 = sshll.u32 %s8733_s13, 4  ;;  %s8453_s13 = scalar_lea.sflag [#allocation3], %s134_s8 }
 0x3d1   : > { %6614 = vrot.lane.b32.xlu2 %v9879_v12, %s8691_s29 }
 0x3d8   : > { %6616 = vrot.lane.b32.xlu0 %v9887_v55, %s8691_s29  ;;  %7529 = vrot.lane.b32.xlu1 %v9887_v55, %s8693_s3 }
 0x3d9   : > { %7222 = vrot.lane.b32.xlu2 %v9887_v55, %s8692_s30 }
 0x3e0   : > { %7527 = vrot.lane.b32.xlu0 %v9879_v12, %s8693_s3  ;;  %8141 = vrot.lane.b32.xlu1 %v9879_v12, %s8695_s5  ;;  %s8464_s3 = scalar_lea.hbm %s10280_s2, %s8575_s28 }
 0x3e1   : > { %7834 = vrot.lane.b32.xlu2 %v9879_v12, %s8694_s4 }
 0x3e8   : > { %7836 = vrot.lane.b32.xlu0 %v9887_v55, %s8694_s4  ;;  %s8466_s4 = sshll.u32 %s136_s27, 4  ;;  %s8467_s4 = int_to_ptr.vmem [resolvable:$true] %s8466_s4 }
 0x3e9   : > { %8143 = vrot.lane.b32.xlu2 %v9887_v55, %s8695_s5  ;;  %s8468_s5 = sshll.u32 %s8464_s3, 4  ;;  %s8469_s5 = int_to_ptr.hbm [resolvable:$true] %s8468_s5 }
 0x3ea   : > { %s8638_s14 = sshra.s32 %s8469_s5, 4  ;;  %s8639_s14 = int_to_ptr.hbm [resolvable:$true] %s8638_s14 }
 0x3eb   : > { %s8640_s16 = scalar_lea.hbm %s8639_s14, 16  ;;  %p8645_p0 = scmp.lt.s32.totalorder %s8639_s14, %s10280_s2 }
 0x3ec   : > { %p8641_p11 = scmp.ne.s32.totalorder %s8639_s14, %s8640_s16  ;;  %p8646_p1 = scmp.lt.s32.totalorder %s8644_s22, %s8640_s16 }
 0x3ee   : > { %p8642_p12 = pnand %p8641_p11, %p8750_p5  ;;  %p8647_p2 = por %p8646_p1, %p8645_p0 }
 0x3f0   : > { %p8643_p13 = pneg %p8642_p12 }
 0x3f2   : > { %p8648_p3 = pnand %p8647_p2, %p8643_p13 }
 0x416   : > { %v5708_v58 = vpop.permute.xlu2 %5707 }
 0x423   : > { %v5700_v21 = vpop.permute.xlu2 %5699 }
 0x42e   : > { %v5698_v15 = vpop.permute.xlu1 %5697 }
 0x42f   : > { %v5702_v51 = vsel %vm187_vm6, %v5700_v21, %v5698_v15  ;;  %v5701_v17 = vsel %vm187_vm6, %v5698_v15, %v5700_v21 }
 0x430   : > { %v5703_v13 = vmul.f32 %v5702_v51, %v10459_v4  ;;  %v5704_v23 = vmul.f32 %v5701_v17, %v10460_v54  ;;  %v6615_v17 = vpop.permute.xlu2 %6614 }
 0x432   : > { %v6030_v31 = vand.u32 4294901760, %v5703_v13  ;;  %v9947_v11 = vand.u32 4294901760, %v5704_v23 }
 0x434   : > { %v6057_v27 = vsub.f32 %v5703_v13, %v6030_v31  ;;  %v6203_v3 = vsub.f32 %v5704_v23, %v9947_v11  ;;  %v10464_v13 = vld [vmem:[#allocation7_spill] sm:$0xff]  ;;  %v8563_v23 = vld [vmem:[%s10279_s1 + $0xa8] sm:$0xff] }
 0x436   : > { %v6058_v44 = vand.u32 4294901760, %v6057_v27  ;;  %v6204_v37 = vand.u32 4294901760, %v6203_v3 }
 0x438   : > { %v6059_v25 = vsub.f32 %v6057_v27, %v6058_v44  ;;  %v6205_v16 = vsub.f32 %v6203_v3, %v6204_v37  ;;  %v7223_v14 = vpop.permute.xlu2 %7222 }
 0x43a   : > { %v5710_v0 = vpop.permute.xlu0 %5709  ;;  %v6310_v5 = vpop.permute.xlu1 %6309  ;;  %v6060_v56 = vand.u32 4294901760, %v6059_v25  ;;  %v6206_v9 = vand.u32 4294901760, %v6205_v16 }
 0x43b   : > { %v5711_v45 = vsel %vm197_vm5, %v5708_v58, %v5710_v0  ;;  %v5712_v41 = vsel %vm197_vm5, %v5710_v0, %v5708_v58  ;;  %v9987_v58 = vand.u32 4294901760, %v6318_v38 }
 0x43c   : > { %v5713_v42 = vmul.f32 %v10457_v24, %v5712_v41  ;;  %v5714_v29 = vmul.f32 %v10458_v20, %v5711_v45 }
 0x43e   : > { %v5735_v19 = vand.u32 4294901760, %v5713_v42  ;;  %v5881_v10 = vand.u32 4294901760, %v5714_v29 }
 0x440   : > { %v5762_v50 = vsub.f32 %v5713_v42, %v5735_v19  ;;  %v5908_v36 = vsub.f32 %v5714_v29, %v5881_v10  ;;  %5736 = vmatpush.msra.mxu0 %v5735_v19  ;;  %5812 = vmatpush.msra.mxu3 %v5735_v19  ;;  %v10463_v29 = vld [vmem:[#allocation6_spill] sm:$0xff] }
 0x441   : > { %5742 = vmatmul.f32.vlgmr.msra.gmra.mxu0 %v5741_v22  ;;  %5816 = vmatmul.f32.vlgmr.msra.gmra.mxu3 %v9927_v47 }
 0x442   : > { %5789 = vmatpush.msra.mxu2 %v5762_v50  ;;  %v5763_v61 = vand.u32 4294901760, %v5762_v50  ;;  %v5909_v46 = vand.u32 4294901760, %v5908_v36  ;;  %v6308_v48 = vpop.permute.xlu0 %6307 }
 0x443   : > { %5792 = vmatmul.f32.vlgmr.msra.gmra.mxu2 %v9924_v40  ;;  %v6312_v53 = vsel %vm799_vm9, %v6310_v5, %v6308_v48  ;;  %v6311_v60 = vsel %vm799_vm9, %v6308_v48, %v6310_v5 }
 0x444   : > { %5882 = vmatpush.msrb.mxu2 %v5881_v10  ;;  %5838 = vmatpush.msrb.mxu0 %v5763_v61  ;;  %v5764_v39 = vsub.f32 %v5762_v50, %v5763_v61  ;;  %v5910_v52 = vsub.f32 %v5908_v36, %v5909_v46  ;;  %v6313_v18 = vmul.f32 %v6312_v53, %v10461_v1  ;;  %v6625_v50 = vsel %vm204_vm0, %v8563_v23, 0 }
 0x445   : > { %v6314_v8 = vmul.f32 %v6311_v60, %v10462_v63 }
 0x446   : > { %5984 = vmatpush.msra.mxu2 %v5909_v46  ;;  %5935 = vmatpush.msra.mxu0 %v5908_v36  ;;  %v5765_v34 = vand.u32 4294901760, %v5764_v39  ;;  %v5911_v26 = vand.u32 4294901760, %v5910_v52  ;;  %v6335_v6 = vand.u32 4294901760, %v6313_v18 }
 0x447   : > { %v9979_v43 = vand.u32 4294901760, %v6314_v8 }
 0x448   : > { %5766 = vmatpush.msra.mxu1 %v5765_v34  ;;  %5912 = vmatpush.msrb.mxu3 %v5911_v26  ;;  %v6362_v49 = vsub.f32 %v6313_v18, %v6335_v6  ;;  %v8564_v26 = vld [vmem:[%s10279_s1 + $0xb0] sm:$0xff] }
 0x449   : > { %5768 = vmatmul.f32.vlgmr.msra.gmra.mxu1 %v9921_v30  ;;  %5840 = vmatmul.f32.vlgmr.msrb.gmra.mxu0 %v9921_v30 }
 0x44a   : > { %5860 = vmatpush.msrb.mxu1 %v5735_v19  ;;  %5914 = vmatmul.f32.vlgmr.msrb.gmra.mxu3 %v9921_v30  ;;  %v6617_v0 = vpop.permute.xlu0 %6616 }
 0x44b   : > { %6006 = vmatpush.msra.mxu3 %v5881_v10  ;;  %6031 = vmatpush.msrb.mxu0 %v6030_v31  ;;  %v6619_v41 = vsel %vm1107_vm10, %v6617_v0, %v6615_v17  ;;  %v6618_v20 = vsel %vm1107_vm10, %v6615_v17, %v6617_v0 }
 0x44c   : > { %5958 = vmatpush.msra.mxu1 %v5881_v10  ;;  %5888 = vmatmul.f32.vlgmr.msrb.gmra.mxu2 %v5741_v22  ;;  %v6620_v4 = vmul.f32 %v10463_v29, %v6619_v41  ;;  %v6621_v22 = vmul.f32 %v10464_v13, %v6618_v20 }
 0x44d   : > { %6107 = vmatpush.msrb.mxu3 %v6030_v31  ;;  %6084 = vmatpush.msrb.mxu2 %v6057_v27 }
 0x44e   : > { %v6642_v19 = vand.u32 4294901760, %v6620_v4  ;;  %v6788_v10 = vand.u32 4294901760, %v6621_v22 }
 0x450   : > { %v6669_v36 = vsub.f32 %v6620_v4, %v6642_v19  ;;  %v6815_v35 = vsub.f32 %v6621_v22, %v6788_v10 }
 0x451   : > { %5862 = vmatmul.f32.vlgmr.msrb.gmra.mxu1 %v9921_v30  ;;  %5938 = vmatmul.f32.vlgmr.msra.gmra.mxu0 %v9924_v40  ;;  %v6363_v40 = vand.u32 4294901760, %v6362_v49 }
 0x452   : > { %6008 = vmatmul.f32.vlgmr.msra.gmra.mxu3 %v9921_v30  ;;  %6061 = vmatpush.msrb.mxu1 %v6060_v56  ;;  %v6816_v61 = vand.u32 4294901760, %v6815_v35 }
 0x453   : > { %6133 = vmatpush.msra.mxu0 %v6058_v44  ;;  %6207 = vmatpush.msra.mxu3 %v6206_v9  ;;  %v6364_v21 = vsub.f32 %v6362_v49, %v6363_v40  ;;  %v6941_v44 = vand.u32 4294901760, %v9879_v12  ;;  %v7221_v9 = vpop.permute.xlu1 %7220 }
 0x454   : > { %5986 = vmatmul.f32.vlgmr.msra.gmra.mxu2 %v9921_v30  ;;  %v6508_v30 = vsub.f32 %v6314_v8, %v9979_v43  ;;  %v6817_v27 = vsub.f32 %v6815_v35, %v6816_v61  ;;  %v7224_v1 = vsel %vm1714_vm11, %v7221_v9, %v7223_v14  ;;  %v7225_v8 = vsel %vm1714_vm11, %v7223_v14, %v7221_v9 }
 0x455   : > { %6177 = vmatpush.msra.mxu2 %v9947_v11  ;;  %v6365_v45 = vand.u32 4294901760, %v6364_v21  ;;  %v6968_v25 = vsub.f32 %v9879_v12, %v6941_v44 }
 0x456   : > { %v6509_v15 = vand.u32 4294901760, %v6508_v30 }
 0x457   : > { %v6969_v48 = vand.u32 4294901760, %v6968_v25 }
 0x458   : > { %v6510_v57 = vsub.f32 %v6508_v30, %v6509_v15 }
 0x459   : > { %5962 = vmatmul.f32.vlgmr.msra.gmra.mxu1 %v9927_v47  ;;  %6037 = vmatmul.f32.vlgmr.msrb.gmra.mxu0 %v6036_v7  ;;  %v6338_v47 = vsub.f32 %v6318_v38, %v9987_v58  ;;  %v6970_v12 = vsub.f32 %v6968_v25, %v6969_v48 }
 0x45a   : > { %6111 = vmatmul.f32.vlgmr.msrb.gmra.mxu3 %v9961_v28  ;;  %6155 = vmatpush.msra.mxu1 %v6030_v31  ;;  %v6511_v24 = vand.u32 4294901760, %v6510_v57  ;;  %v10011_v31 = vand.u32 4294901760, %v6625_v50 }
 0x45b   : > { %6230 = vmatpush.msrb.mxu0 %v6203_v3  ;;  %6301 = vmatpush.msrb.mxu3 %v9947_v11  ;;  %v6339_v51 = vand.u32 4294901760, %v6338_v47  ;;  %v6818_v3 = vand.u32 4294901760, %v6817_v27  ;;  %v6971_v60 = vand.u32 4294901760, %v6970_v12 }
 0x45c   : > { %6087 = vmatmul.f32.vlgmr.msrb.gmra.mxu2 %v9957_v2  ;;  %v6645_v46 = vsub.f32 %v6625_v50, %v10011_v31 }
 0x45d   : > { %6279 = vmatpush.msrb.mxu2 %v6204_v37  ;;  %v6340_v42 = vsub.f32 %v6338_v47, %v6339_v51  ;;  %v10029_v37 = vand.u32 4294901760, %v9887_v55 }
 0x45e   : > { %v10018_v39 = vand.u32 4294901760, %v6645_v46 }
 0x45f   : > { %v6341_v54 = vand.u32 4294901760, %v6340_v42  ;;  %v7114_v16 = vsub.f32 %v9887_v55, %v10029_v37  ;;  %v7530_v42 = vpop.permute.xlu1 %7529 }
 0x461   : > { %6063 = vmatmul.f32.vlgmr.msrb.gmra.mxu1 %v9952_v32  ;;  %6135 = vmatmul.f32.vlgmr.msra.gmra.mxu0 %v9952_v32  ;;  %v7115_v5 = vand.u32 4294901760, %v7114_v16 }
 0x462   : > { %6209 = vmatmul.f32.vlgmr.msra.gmra.mxu3 %v9952_v32  ;;  %6253 = vmatpush.msrb.mxu1 %v9947_v11  ;;  %v6670_v11 = vand.u32 4294901760, %v6669_v36 }
 0x463   : > { %6336 = vmatpush.msra.mxu0 %v6335_v6  ;;  %6412 = vmatpush.msra.mxu3 %v6335_v6  ;;  %v7116_v53 = vsub.f32 %v7114_v16, %v7115_v5 }
 0x464   : > { %6183 = vmatmul.f32.vlgmr.msra.gmra.mxu2 %v6036_v7  ;;  %v6671_v62 = vsub.f32 %v6669_v36, %v6670_v11  ;;  %v10465_v7 = vld [vmem:[#allocation12_spill] sm:$0xff] }
 0x465   : > { %6389 = vmatpush.msra.mxu2 %v6362_v49  ;;  %v7117_v18 = vand.u32 4294901760, %v7116_v53  ;;  %v7226_v33 = vmul.f32 %v10465_v7, %v7224_v1  ;;  %v8565_v49 = vld [vmem:[%s10279_s1 + $0xb8] sm:$0xff] }
 0x466   : > { %v6672_v52 = vand.u32 4294901760, %v6671_v62 }
 0x469   : > { %6157 = vmatmul.f32.vlgmr.msra.gmra.mxu1 %v9952_v32  ;;  %6233 = vmatmul.f32.vlgmr.msrb.gmra.mxu0 %v9957_v2  ;;  %v6924_v2 = vsel %vm204_vm0, %v8564_v26, 0 }
 0x46a   : > { %6303 = vmatmul.f32.vlgmr.msrb.gmra.mxu3 %v9952_v32  ;;  %6366 = vmatpush.msra.mxu1 %v6365_v45 }
 0x46b   : > { %6438 = vmatpush.msrb.mxu0 %v6363_v40  ;;  %6512 = vmatpush.msrb.mxu3 %v6511_v24  ;;  %v7231_v40 = vsel %vm204_vm0, %v8565_v49, 0  ;;  %v7528_v24 = vpop.permute.xlu0 %7527 }
 0x46c   : > { %6281 = vmatmul.f32.vlgmr.msrb.gmra.mxu2 %v9952_v32  ;;  %v6647_v32 = vsub.f32 %v6645_v46, %v10018_v39  ;;  %v10065_v21 = vand.u32 4294901760, %v7231_v40  ;;  %v7531_v29 = vsel %vm2022_vm14, %v7528_v24, %v7530_v42  ;;  %v7532_v22 = vsel %vm2022_vm14, %v7530_v42, %v7528_v24 }
 0x46d   : > { %6482 = vmatpush.msrb.mxu2 %v9979_v43 }
 0x46e   : > { %v6648_v34 = vand.u32 4294901760, %v6647_v32  ;;  %v10070_v0 = vsub.f32 %v7231_v40, %v10065_v21 }
 0x470   : > { %v10075_v41 = vand.u32 4294901760, %v10070_v0 }
 0x471   : > { %6257 = vmatmul.f32.vlgmr.msrb.gmra.mxu1 %v9961_v28  ;;  %6342 = vmatmul.f32.vlgmr.msra.gmra.mxu0 %v6341_v54  ;;  %v10036_v28 = vand.u32 4294901760, %v6924_v2 }
 0x472   : > { %6416 = vmatmul.f32.vlgmr.msra.gmra.mxu3 %v6339_v51  ;;  %6460 = vmatpush.msrb.mxu1 %v6335_v6  ;;  %v10466_v6 = vld [vmem:[#allocation13_spill] sm:$0xff]  ;;  %v7253_v13 = vsub.f32 %v10070_v0, %v10075_v41 }
 0x473   : > { %6535 = vmatpush.msra.mxu0 %v6508_v30  ;;  %6606 = vmatpush.msra.mxu3 %v9979_v43  ;;  %v6944_v56 = vsub.f32 %v6924_v2, %v10036_v28  ;;  %v7248_v30 = vand.u32 4294901760, %v7226_v33  ;;  %v7837_v26 = vpop.permute.xlu0 %7836 }
 0x474   : > { %6392 = vmatmul.f32.vlgmr.msra.gmra.mxu2 %v6338_v47  ;;  %v7254_v50 = vand.u32 4294901760, %v7253_v13 }
 0x475   : > { %6584 = vmatpush.msra.mxu2 %v6509_v15  ;;  %v10042_v55 = vand.u32 4294901760, %v6944_v56  ;;  %v7275_v15 = vsub.f32 %v7226_v33, %v7248_v30 }
 0x477   : > { %v6946_v63 = vsub.f32 %v6944_v56, %v10042_v55  ;;  %v7276_v57 = vand.u32 4294901760, %v7275_v15 }
 0x479   : > { %6368 = vmatmul.f32.vlgmr.msra.gmra.mxu1 %v9987_v58  ;;  %6440 = vmatmul.f32.vlgmr.msrb.gmra.mxu0 %v9987_v58  ;;  %v6947_v38 = vand.u32 4294901760, %v6946_v63  ;;  %v7277_v17 = vsub.f32 %v7275_v15, %v7276_v57 }
 0x47a   : > { %6514 = vmatmul.f32.vlgmr.msrb.gmra.mxu3 %v9987_v58  ;;  %6558 = vmatpush.msra.mxu1 %v9979_v43  ;;  %v7227_v43 = vmul.f32 %v10466_v6, %v7225_v8 }
 0x47b   : > { %6643 = vmatpush.msrb.mxu0 %v6642_v19  ;;  %6719 = vmatpush.msrb.mxu3 %v6642_v19  ;;  %v7278_v20 = vand.u32 4294901760, %v7277_v17 }
 0x47c   : > { %6488 = vmatmul.f32.vlgmr.msrb.gmra.mxu2 %v6341_v54  ;;  %v10467_v54 = vld [vmem:[#allocation18_spill] sm:$0xff] }
 0x47d   : > { %6696 = vmatpush.msrb.mxu2 %v6669_v36  ;;  %v7533_v23 = vmul.f32 %v7531_v29, %v10467_v54  ;;  %v8566_v36 = vld [vmem:[%s10279_s1 + $0xc0] sm:$0xff] }
 0x481   : > { %6462 = vmatmul.f32.vlgmr.msrb.gmra.mxu1 %v9987_v58  ;;  %6538 = vmatmul.f32.vlgmr.msra.gmra.mxu0 %v6338_v47 }
 0x482   : > { %6608 = vmatmul.f32.vlgmr.msra.gmra.mxu3 %v9987_v58  ;;  %6673 = vmatpush.msrb.mxu1 %v6672_v52 }
 0x483   : > { %6745 = vmatpush.msra.mxu0 %v6670_v11  ;;  %6819 = vmatpush.msra.mxu3 %v6818_v3  ;;  %v7538_v11 = vsel %vm204_vm0, %v8566_v36, 0 }
 0x484   : > { %6586 = vmatmul.f32.vlgmr.msra.gmra.mxu2 %v9987_v58  ;;  %v10058_v58 = vand.u32 4294901760, %v7227_v43  ;;  %v10105_v27 = vand.u32 4294901760, %v7538_v11 }
 0x485   : > { %6789 = vmatpush.msra.mxu2 %v6788_v10 }
 0x486   : > { %v7421_v47 = vsub.f32 %v7227_v43, %v10058_v58  ;;  %v10111_v3 = vsub.f32 %v7538_v11, %v10105_v27 }
 0x488   : > { %v10119_v2 = vand.u32 4294901760, %v10111_v3 }
 0x489   : > { %6562 = vmatmul.f32.vlgmr.msra.gmra.mxu1 %v6339_v51  ;;  %6649 = vmatmul.f32.vlgmr.msrb.gmra.mxu0 %v6648_v34  ;;  %v7422_v51 = vand.u32 4294901760, %v7421_v47 }
 0x48a   : > { %6723 = vmatmul.f32.vlgmr.msrb.gmra.mxu3 %v10018_v39  ;;  %6767 = vmatpush.msra.mxu1 %v6642_v19  ;;  %v10468_v19 = vld [vmem:[#allocation19_spill] sm:$0xff] }
 0x48b   : > { %6842 = vmatpush.msrb.mxu0 %v6815_v35  ;;  %6913 = vmatpush.msrb.mxu3 %v6788_v10  ;;  %v7423_v45 = vsub.f32 %v7421_v47, %v7422_v51  ;;  %v10092_v35 = vand.u32 4294901760, %v7533_v23 }
 0x48c   : > { %6699 = vmatmul.f32.vlgmr.msrb.gmra.mxu2 %v6645_v46 }
 0x48d   : > { %6891 = vmatpush.msrb.mxu2 %v6816_v61  ;;  %v7424_v4 = vand.u32 4294901760, %v7423_v45  ;;  %v7582_v61 = vsub.f32 %v7533_v23, %v10092_v35 }
 0x491   : > { %6675 = vmatmul.f32.vlgmr.msrb.gmra.mxu1 %v10011_v31  ;;  %6747 = vmatmul.f32.vlgmr.msra.gmra.mxu0 %v10011_v31 }
 0x492   : > { %6821 = vmatmul.f32.vlgmr.msra.gmra.mxu3 %v10011_v31  ;;  %6865 = vmatpush.msrb.mxu1 %v6788_v10  ;;  %v7534_v10 = vmul.f32 %v7532_v22, %v10468_v19  ;;  %v8142_v19 = vpop.permute.xlu1 %8141 }
 0x493   : > { %6942 = vmatpush.msra.mxu0 %v6941_v44  ;;  %7018 = vmatpush.msra.mxu3 %v6941_v44 }
 0x494   : > { %6795 = vmatmul.f32.vlgmr.msra.gmra.mxu2 %v6648_v34 }
 0x495   : > { %6995 = vmatpush.msra.mxu2 %v6968_v25 }
 0x499   : > { %6769 = vmatmul.f32.vlgmr.msra.gmra.mxu1 %v10011_v31  ;;  %6845 = vmatmul.f32.vlgmr.msrb.gmra.mxu0 %v6645_v46 }
 0x49a   : > { %6915 = vmatmul.f32.vlgmr.msrb.gmra.mxu3 %v10011_v31  ;;  %6972 = vmatpush.msra.mxu1 %v6971_v60  ;;  %v10469_v60 = vld [vmem:[#allocation16_spill] sm:$0xff] }
 0x49b   : > { %7044 = vmatpush.msrb.mxu0 %v6969_v48  ;;  %7118 = vmatpush.msrb.mxu3 %v7117_v18  ;;  %v7835_v48 = vpop.permute.xlu2 %7834  ;;  %v10470_v18 = vld [vmem:[#allocation17_spill] sm:$0xff] }
 0x49c   : > { %6893 = vmatmul.f32.vlgmr.msrb.gmra.mxu2 %v10011_v31  ;;  %v10094_v31 = vand.u32 4294901760, %v7534_v10  ;;  %v7839_v9 = vsel %vm2330_vm15, %v7837_v26, %v7835_v48 }
 0x49d   : > { %7088 = vmatpush.msrb.mxu2 %v10029_v37  ;;  %v7841_v63 = vmul.f32 %v10470_v18, %v7839_v9 }
 0x49e   : > { %v10102_v46 = vsub.f32 %v7534_v10, %v10094_v31 }
 0x4a0   : > { %v7729_v52 = vand.u32 4294901760, %v10102_v46 }
 0x4a1   : > { %6869 = vmatmul.f32.vlgmr.msrb.gmra.mxu1 %v10018_v39  ;;  %6948 = vmatmul.f32.vlgmr.msra.gmra.mxu0 %v6947_v38  ;;  %v7583_v39 = vand.u32 4294901760, %v7582_v61 }
 0x4a2   : > { %7022 = vmatmul.f32.vlgmr.msra.gmra.mxu3 %v10042_v55  ;;  %7066 = vmatpush.msrb.mxu1 %v6941_v44 }
 0x4a3   : > { %7141 = vmatpush.msra.mxu0 %v7114_v16  ;;  %7212 = vmatpush.msra.mxu3 %v10029_v37  ;;  %v7584_v34 = vsub.f32 %v7582_v61, %v7583_v39 }
 0x4a4   : > { %6998 = vmatmul.f32.vlgmr.msra.gmra.mxu2 %v6944_v56 }
 0x4a5   : > { %7190 = vmatpush.msra.mxu2 %v7115_v5  ;;  %v7585_v5 = vand.u32 4294901760, %v7584_v34 }
 0x4a9   : > { %6974 = vmatmul.f32.vlgmr.msra.gmra.mxu1 %v10036_v28  ;;  %7046 = vmatmul.f32.vlgmr.msrb.gmra.mxu0 %v10036_v28 }
 0x4aa   : > { %7120 = vmatmul.f32.vlgmr.msrb.gmra.mxu3 %v10036_v28  ;;  %7164 = vmatpush.msra.mxu1 %v10029_v37  ;;  %v7730_v37 = vsub.f32 %v10102_v46, %v7729_v52 }
 0x4ab   : > { %7249 = vmatpush.msrb.mxu0 %v7248_v30  ;;  %7325 = vmatpush.msrb.mxu3 %v7248_v30 }
 0x4ac   : > { %7094 = vmatmul.f32.vlgmr.msrb.gmra.mxu2 %v6947_v38  ;;  %v7731_v53 = vand.u32 4294901760, %v7730_v37  ;;  %v8567_v38 = vld [vmem:[%s10279_s1 + $0xc8] sm:$0xff]  ;;  %v10471_v37 = vld [vmem:[#allocation20_spill] sm:$0xff] }
 0x4ad   : > { %7302 = vmatpush.msrb.mxu2 %v7275_v15  ;;  %v7845_v15 = vsel %vm204_vm0, %v8567_v38, 0 }
 0x4ae   : > { %v10152_v17 = vand.u32 4294901760, %v7845_v15 }
 0x4b0   : > { %v10158_v22 = vsub.f32 %v7845_v15, %v10152_v17 }
 0x4b1   : > { %7068 = vmatmul.f32.vlgmr.msrb.gmra.mxu1 %v10036_v28  ;;  %7144 = vmatmul.f32.vlgmr.msra.gmra.mxu0 %v6944_v56  ;;  %v7838_v56 = vsel %vm2330_vm15, %v7835_v48, %v7837_v26 }
 0x4b2   : > { %7214 = vmatmul.f32.vlgmr.msra.gmra.mxu3 %v10036_v28  ;;  %7279 = vmatpush.msrb.mxu1 %v7278_v20  ;;  %v7840_v1 = vmul.f32 %v10469_v60, %v7838_v56  ;;  %v10168_v36 = vand.u32 4294901760, %v10158_v22 }
 0x4b3   : > { %7351 = vmatpush.msra.mxu0 %v7276_v57  ;;  %7425 = vmatpush.msra.mxu3 %v7424_v4 }
 0x4b4   : > { %7192 = vmatmul.f32.vlgmr.msra.gmra.mxu2 %v10036_v28  ;;  %v10137_v49 = vand.u32 4294901760, %v7840_v1  ;;  %v7867_v34 = vsub.f32 %v10158_v22, %v10168_v36 }
 0x4b5   : > { %7395 = vmatpush.msra.mxu2 %v10058_v58 }
 0x4b9   : > { %7168 = vmatmul.f32.vlgmr.msra.gmra.mxu1 %v10042_v55  ;;  %7255 = vmatmul.f32.vlgmr.msrb.gmra.mxu0 %v7254_v50  ;;  %v7560_v55 = vsub.f32 %v10111_v3, %v10119_v2 }
 0x4ba   : > { %7329 = vmatmul.f32.vlgmr.msrb.gmra.mxu3 %v10075_v41  ;;  %7373 = vmatpush.msra.mxu1 %v7248_v30 }
 0x4bb   : > { %7448 = vmatpush.msrb.mxu0 %v7421_v47  ;;  %7519 = vmatpush.msrb.mxu3 %v10058_v58  ;;  %v7561_v33 = vand.u32 4294901760, %v7560_v55 }
 0x4bc   : > { %7305 = vmatmul.f32.vlgmr.msrb.gmra.mxu2 %v10070_v0 }
 0x4bd   : > { %7497 = vmatpush.msrb.mxu2 %v7422_v51 }
 0x4be   : > { %v5743_v62 = vpop.f32.mrf.mxu0 }
 0x4c1   : > { %7281 = vmatmul.f32.vlgmr.msrb.gmra.mxu1 %v10065_v21  ;;  %7353 = vmatmul.f32.vlgmr.msra.gmra.mxu0 %v10065_v21 }
 0x4c2   : > { %7427 = vmatmul.f32.vlgmr.msra.gmra.mxu3 %v10065_v21  ;;  %7471 = vmatpush.msrb.mxu1 %v10058_v58  ;;  %v10139_v58 = vand.u32 4294901760, %v7841_v63 }
 0x4c3   : > { %7556 = vmatpush.msra.mxu0 %v10092_v35  ;;  %7632 = vmatpush.msra.mxu3 %v10092_v35 }
 0x4c4   : > { %v5817_v32 = vpop.f32.mrf.mxu3  ;;  %7401 = vmatmul.f32.vlgmr.msra.gmra.mxu2 %v7254_v50  ;;  %v10149_v57 = vsub.f32 %v7841_v63, %v10139_v58 }
 0x4c5   : > { %7609 = vmatpush.msra.mxu2 %v7582_v61  ;;  %v8144_v61 = vpop.permute.xlu2 %8143 }
 0x4c6   : > { %v5793_v44 = vpop.f32.mrf.mxu2  ;;  %v5769_v25 = vpop.f32.mrf.mxu1  ;;  %v8036_v4 = vand.u32 4294901760, %v10149_v57  ;;  %v8146_v26 = vsel %vm2638_vm1, %v8144_v61, %v8142_v19 }
 0x4c7   : > { %v5841_v16 = vpop.f32.mrf.mxu0  ;;  %v5770_v28 = vadd.f32 %v5769_v25, %v5743_v62 }
 0x4c8   : > { %v8037_v50 = vsub.f32 %v10149_v57, %v8036_v4 }
 0x4c9   : > { %v5794_v12 = vadd.f32 %v5793_v44, %v5770_v28  ;;  %7375 = vmatmul.f32.vlgmr.msra.gmra.mxu1 %v10065_v21  ;;  %7451 = vmatmul.f32.vlgmr.msrb.gmra.mxu0 %v10070_v0 }
 0x4ca   : > { %7521 = vmatmul.f32.vlgmr.msrb.gmra.mxu3 %v10065_v21  ;;  %7586 = vmatpush.msra.mxu1 %v7585_v5  ;;  %v7868_v5 = vand.u32 4294901760, %v7867_v34 }
 0x4cb   : > { %v5818_v14 = vadd.f32 %v5817_v32, %v5794_v12  ;;  %7658 = vmatpush.msrb.mxu0 %v7583_v39  ;;  %7732 = vmatpush.msrb.mxu3 %v7731_v53  ;;  %v8145_v39 = vsel %vm2638_vm1, %v8142_v19, %v8144_v61  ;;  %v8038_v32 = vand.u32 4294901760, %v8037_v50  ;;  %v8568_v53 = vld [vmem:[%s10279_s1 + $0xd0] sm:$0xff] }
 0x4cc   : > { %7499 = vmatmul.f32.vlgmr.msrb.gmra.mxu2 %v10065_v21  ;;  %v7889_v21 = vsub.f32 %v7840_v1, %v10137_v49  ;;  %v8147_v25 = vmul.f32 %v8145_v39, %v10471_v37 }
 0x4cd   : > { %v5842_v8 = vadd.f32 %v5841_v16, %v5818_v14  ;;  %v5915_v7 = vpop.f32.mrf.mxu3  ;;  %7702 = vmatpush.msrb.mxu2 %v10094_v31  ;;  %v10472_v16 = vld [vmem:[#allocation21_spill] sm:$0xff] }
 0x4ce   : > { %v5863_v6 = vpop.f32.mrf.mxu1  ;;  %v7890_v20 = vand.u32 4294901760, %v7889_v21  ;;  %v8148_v28 = vmul.f32 %v8146_v26, %v10472_v16  ;;  %v10188_v55 = vand.u32 4294901760, %v8147_v25 }
 0x4cf   : > { %v5939_v43 = vpop.f32.mrf.mxu0  ;;  %v5889_v30 = vpop.f32.mrf.mxu2  ;;  %v5864_v51 = vadd.f32 %v5863_v6, %v5842_v8 }
 0x4d0   : > { %v5916_v40 = vadd.f32 %v5915_v7, %v5889_v30  ;;  %v7891_v23 = vsub.f32 %v7889_v21, %v7890_v20  ;;  %v10190_v14 = vand.u32 4294901760, %v8148_v28  ;;  %v8196_v18 = vsub.f32 %v8147_v25, %v10188_v55 }
 0x4d1   : > { %7475 = vmatmul.f32.vlgmr.msrb.gmra.mxu1 %v10075_v41  ;;  %7562 = vmatmul.f32.vlgmr.msra.gmra.mxu0 %v7561_v33 }
 0x4d2   : > { %7636 = vmatmul.f32.vlgmr.msra.gmra.mxu3 %v10119_v2  ;;  %7680 = vmatpush.msrb.mxu1 %v10092_v35  ;;  %v5940_v47 = vadd.f32 %v5939_v43, %v5916_v40  ;;  %v7892_v62 = vand.u32 4294901760, %v7891_v23  ;;  %v8342_v63 = vsub.f32 %v8148_v28, %v10190_v14  ;;  %v8197_v38 = vand.u32 4294901760, %v8196_v18 }
 0x4d3   : > { %7755 = vmatpush.msra.mxu0 %v10102_v46  ;;  %7826 = vmatpush.msra.mxu3 %v10094_v31 }
 0x4d4   : > { %7612 = vmatmul.f32.vlgmr.msra.gmra.mxu2 %v10111_v3  ;;  %v8343_v30 = vand.u32 4294901760, %v8342_v63 }
 0x4d5   : > { %v6009_v0 = vpop.f32.mrf.mxu3  ;;  %7804 = vmatpush.msra.mxu2 %v7729_v52 }
 0x4d6   : > { %v5963_v45 = vpop.f32.mrf.mxu1 }
 0x4d7   : > { %v6038_v41 = vpop.f32.mrf.mxu0  ;;  %v5964_v24 = vadd.f32 %v5963_v45, %v5940_v47  ;;  %v5987_v29 = vpop.f32.mrf.mxu2 }
 0x4d8   : > { %v6039_v42 = vadd.f32 %v6038_v41, %v5864_v51 }
 0x4d9   : > { %v5988_v13 = vadd.f32 %v5987_v29, %v5964_v24  ;;  %7588 = vmatmul.f32.vlgmr.msra.gmra.mxu1 %v10105_v27  ;;  %7660 = vmatmul.f32.vlgmr.msrb.gmra.mxu0 %v10105_v27 }
 0x4da   : > { %7734 = vmatmul.f32.vlgmr.msrb.gmra.mxu3 %v10105_v27  ;;  %7778 = vmatpush.msra.mxu1 %v10094_v31 }
 0x4db   : > { %v6010_v54 = vadd.f32 %v6009_v0, %v5988_v13  ;;  %7863 = vmatpush.msrb.mxu0 %v10137_v49  ;;  %7939 = vmatpush.msrb.mxu3 %v10137_v49 }
 0x4dc   : > { %7708 = vmatmul.f32.vlgmr.msrb.gmra.mxu2 %v7561_v33 }
 0x4dd   : > { %v6112_v10 = vpop.f32.mrf.mxu3  ;;  %7916 = vmatpush.msrb.mxu2 %v7889_v21  ;;  %v8198_v21 = vsub.f32 %v8196_v18, %v8197_v38 }
 0x4de   : > { %v6064_v35 = vpop.f32.mrf.mxu1 }
 0x4df   : > { %v6136_v11 = vpop.f32.mrf.mxu0  ;;  %v6065_v31 = vadd.f32 %v6064_v35, %v6039_v42  ;;  %v6088_v46 = vpop.f32.mrf.mxu2 }
 0x4e1   : > { %v6089_v52 = vadd.f32 %v6088_v46, %v6065_v31  ;;  %7682 = vmatmul.f32.vlgmr.msrb.gmra.mxu1 %v10105_v27  ;;  %7758 = vmatmul.f32.vlgmr.msra.gmra.mxu0 %v10111_v3 }
 0x4e2   : > { %7828 = vmatmul.f32.vlgmr.msra.gmra.mxu3 %v10105_v27  ;;  %7893 = vmatpush.msrb.mxu1 %v7892_v62 }
 0x4e3   : > { %v6113_v44 = vadd.f32 %v6112_v10, %v6089_v52  ;;  %7965 = vmatpush.msra.mxu0 %v7890_v20  ;;  %8039 = vmatpush.msra.mxu3 %v8038_v32  ;;  %v8199_v20 = vand.u32 4294901760, %v8198_v21 }
 0x4e4   : > { %7806 = vmatmul.f32.vlgmr.msra.gmra.mxu2 %v10105_v27  ;;  %v8152_v27 = vsel %vm204_vm0, %v8568_v53, 0 }
 0x4e5   : > { %v6137_v48 = vadd.f32 %v6136_v11, %v6113_v44  ;;  %v6210_v3 = vpop.f32.mrf.mxu3  ;;  %8009 = vmatpush.msra.mxu2 %v10139_v58  ;;  %v10201_v7 = vand.u32 4294901760, %v8152_v27 }
 0x4e6   : > { %v6158_v56 = vpop.f32.mrf.mxu1 }
 0x4e7   : > { %v6234_v59 = vpop.f32.mrf.mxu0  ;;  %v10183_v12 = vadd.f32 %v6158_v56, %v6137_v48  ;;  %v6184_v9 = vpop.f32.mrf.mxu2  ;;  %v10208_v15 = vsub.f32 %v8152_v27, %v10201_v7 }
 0x4e8   : > { %v6185_v60 = vadd.f32 %v6184_v9, %v6010_v54 }
 0x4e9   : > { %7782 = vmatmul.f32.vlgmr.msra.gmra.mxu1 %v10119_v2  ;;  %7869 = vmatmul.f32.vlgmr.msrb.gmra.mxu0 %v7868_v5  ;;  %v10215_v0 = vand.u32 4294901760, %v10208_v15 }
 0x4ea   : > { %7943 = vmatmul.f32.vlgmr.msrb.gmra.mxu3 %v10168_v36  ;;  %7987 = vmatpush.msra.mxu1 %v10137_v49  ;;  %v6211_v1 = vadd.f32 %v6210_v3, %v6185_v60 }
 0x4eb   : > { %8062 = vmatpush.msrb.mxu0 %v10149_v57  ;;  %8133 = vmatpush.msrb.mxu3 %v10139_v58  ;;  %v8344_v57 = vsub.f32 %v8342_v63, %v8343_v30 }
 0x4ec   : > { %v6235_v8 = vadd.f32 %v6234_v59, %v6211_v1  ;;  %7919 = vmatmul.f32.vlgmr.msrb.gmra.mxu2 %v10158_v22 }
 0x4ed   : > { %v6304_v2 = vpop.f32.mrf.mxu3  ;;  %8111 = vmatpush.msrb.mxu2 %v8036_v4  ;;  %v8174_v4 = vsub.f32 %v10208_v15, %v10215_v0 }
 0x4ee   : > { %v6258_v33 = vpop.f32.mrf.mxu1 }
 0x4ef   : > { %v6343_v6 = vpop.f32.mrf.mxu0  ;;  %v6259_v43 = vadd.f32 %v6258_v33, %v6235_v8  ;;  %v6282_v49 = vpop.f32.mrf.mxu2  ;;  %v8175_v23 = vand.u32 4294901760, %v8174_v4 }
 0x4f1   : > { %v6283_v40 = vadd.f32 %v6282_v49, %v6259_v43  ;;  %7895 = vmatmul.f32.vlgmr.msrb.gmra.mxu1 %v10152_v17  ;;  %7967 = vmatmul.f32.vlgmr.msra.gmra.mxu0 %v10152_v17 }
 0x4f2   : > { %8041 = vmatmul.f32.vlgmr.msra.gmra.mxu3 %v10152_v17  ;;  %8085 = vmatpush.msrb.mxu1 %v10139_v58  ;;  %v8345_v58 = vand.u32 4294901760, %v8344_v57 }
 0x4f3   : > { %8170 = vmatpush.msra.mxu0 %v10188_v55  ;;  %8246 = vmatpush.msra.mxu3 %v10188_v55  ;;  %v6305_v47 = vadd.f32 %v6304_v2, %v6283_v40 }
 0x4f4   : > { %8015 = vmatmul.f32.vlgmr.msra.gmra.mxu2 %v7868_v5 }
 0x4f5   : > { %v6417_v51 = vpop.f32.mrf.mxu3  ;;  %8223 = vmatpush.msra.mxu2 %v8196_v18 }
 0x4f6   : > { %v6369_v45 = vpop.f32.mrf.mxu1 }
 0x4f7   : > { %v6441_v41 = vpop.f32.mrf.mxu0  ;;  %v6370_v24 = vadd.f32 %v6369_v45, %v6343_v6  ;;  %v6393_v42 = vpop.f32.mrf.mxu2 }
 0x4f9   : > { %v6394_v29 = vadd.f32 %v6393_v42, %v6370_v24  ;;  %7989 = vmatmul.f32.vlgmr.msra.gmra.mxu1 %v10152_v17  ;;  %8065 = vmatmul.f32.vlgmr.msrb.gmra.mxu0 %v10158_v22 }
 0x4fa   : > { %8135 = vmatmul.f32.vlgmr.msrb.gmra.mxu3 %v10152_v17  ;;  %8200 = vmatpush.msra.mxu1 %v8199_v20 }
 0x4fb   : > { %8272 = vmatpush.msrb.mxu0 %v8197_v38  ;;  %8346 = vmatpush.msrb.mxu3 %v8345_v58  ;;  %v6418_v13 = vadd.f32 %v6417_v51, %v6394_v29 }
 0x4fc   : > { %8113 = vmatmul.f32.vlgmr.msrb.gmra.mxu2 %v10152_v17 }
 0x4fd   : > { %v6442_v54 = vadd.f32 %v6441_v41, %v6418_v13  ;;  %v6515_v19 = vpop.f32.mrf.mxu3  ;;  %8316 = vmatpush.msrb.mxu2 %v10190_v14 }
 0x4fe   : > { %v6463_v10 = vpop.f32.mrf.mxu1 }
 0x4ff   : > { %v6539_v50 = vpop.f32.mrf.mxu0  ;;  %v6464_v22 = vadd.f32 %v6463_v10, %v6442_v54  ;;  %v6489_v35 = vpop.f32.mrf.mxu2 }
 0x500   : > { %v6516_v31 = vadd.f32 %v6515_v19, %v6489_v35 }
 0x501   : > { %v6612_v11 = vadd.f32 %v6464_v22, %v10183_v12  ;;  %8089 = vmatmul.f32.vlgmr.msrb.gmra.mxu1 %v10168_v36  ;;  %8176 = vmatmul.f32.vlgmr.msra.gmra.mxu0 %v8175_v23 }
 0x502   : > { %8250 = vmatmul.f32.vlgmr.msra.gmra.mxu3 %v10215_v0  ;;  %8294 = vmatpush.msrb.mxu1 %v10188_v55  ;;  %v6540_v17 = vadd.f32 %v6539_v50, %v6516_v31 }
 0x503   : > { %8369 = vmatpush.msra.mxu0 %v8342_v63  ;;  %8440 = vmatpush.msra.mxu3 %v10190_v14 }
 0x504   : > { %8226 = vmatmul.f32.vlgmr.msra.gmra.mxu2 %v10208_v15 }
 0x505   : > { %v6609_v61 = vpop.f32.mrf.mxu3  ;;  %8418 = vmatpush.msra.mxu2 %v8343_v30 }
 0x506   : > { %v6563_v46 = vpop.f32.mrf.mxu1 }
 0x507   : > { %v6650_v62 = vpop.f32.mrf.mxu0  ;;  %v6564_v39 = vadd.f32 %v6563_v46, %v6540_v17  ;;  %v6587_v52 = vpop.f32.mrf.mxu2 }
 0x509   : > { %v6588_v32 = vadd.f32 %v6587_v52, %v6564_v39  ;;  %8202 = vmatmul.f32.vlgmr.msra.gmra.mxu1 %v10201_v7  ;;  %8274 = vmatmul.f32.vlgmr.msrb.gmra.mxu0 %v10201_v7 }
 0x50a   : > { %8392 = vmatpush.msra.mxu1 %v10190_v14  ;;  %8348 = vmatmul.f32.vlgmr.msrb.gmra.mxu3 %v10201_v7 }
 0x50b   : > { %v6610_v36 = vadd.f32 %v6609_v61, %v6588_v32 }
 0x50c   : > { %8322 = vmatmul.f32.vlgmr.msrb.gmra.mxu2 %v8175_v23 }
 0x50d   : > { %v6613_v34 = vadd.f32 %v6610_v36, %v6305_v47  ;;  %v6724_v26 = vpop.f32.mrf.mxu3 }
 0x50e   : > { %v6676_v44 = vpop.f32.mrf.mxu1 }
 0x50f   : > { %v6748_v37 = vpop.f32.mrf.mxu0  ;;  %v6677_v25 = vadd.f32 %v6676_v44, %v6650_v62  ;;  %v6700_v16 = vpop.f32.mrf.mxu2 }
 0x511   : > { %v6701_v28 = vadd.f32 %v6700_v16, %v6677_v25  ;;  %8296 = vmatmul.f32.vlgmr.msrb.gmra.mxu1 %v10201_v7  ;;  %8372 = vmatmul.f32.vlgmr.msra.gmra.mxu0 %v10208_v15 }
 0x512   : > { %8442 = vmatmul.f32.vlgmr.msra.gmra.mxu3 %v10201_v7 }
 0x513   : > { %v6725_v48 = vadd.f32 %v6724_v26, %v6701_v28 }
 0x514   : > { %8420 = vmatmul.f32.vlgmr.msra.gmra.mxu2 %v10201_v7 }
 0x515   : > { %v6749_v3 = vadd.f32 %v6748_v37, %v6725_v48  ;;  %v6822_v5 = vpop.f32.mrf.mxu3 }
 0x516   : > { %v6770_v56 = vpop.f32.mrf.mxu1 }
 0x517   : > { %v6846_v59 = vpop.f32.mrf.mxu0  ;;  %v6771_v12 = vadd.f32 %v6770_v56, %v6749_v3  ;;  %v6796_v53 = vpop.f32.mrf.mxu2 }
 0x518   : > { %v6823_v9 = vadd.f32 %v6822_v5, %v6796_v53 }
 0x519   : > { %v6919_v55 = vadd.f32 %v6771_v12, %v6612_v11  ;;  %8396 = vmatmul.f32.vlgmr.msra.gmra.mxu1 %v10215_v0 }
 0x51a   : > { %v6847_v14 = vadd.f32 %v6846_v59, %v6823_v9 }
 0x51d   : > { %v6916_v60 = vpop.f32.mrf.mxu3 }
 0x51e   : > { %v6870_v27 = vpop.f32.mrf.mxu1 }
 0x51f   : > { %v6949_v1 = vpop.f32.mrf.mxu0  ;;  %v6871_v18 = vadd.f32 %v6870_v27, %v6847_v14  ;;  %v6894_v63 = vpop.f32.mrf.mxu2 }
 0x521   : > { %v6895_v8 = vadd.f32 %v6894_v63, %v6871_v18 }
 0x523   : > { %v6917_v2 = vadd.f32 %v6916_v60, %v6895_v8 }
 0x525   : > { %v6920_v33 = vadd.f32 %v6917_v2, %v6613_v34  ;;  %v7023_v6 = vpop.f32.mrf.mxu3 }
 0x526   : > { %v6975_v7 = vpop.f32.mrf.mxu1 }
 0x527   : > { %v7047_v43 = vpop.f32.mrf.mxu0  ;;  %v6976_v38 = vadd.f32 %v6975_v7, %v6949_v1  ;;  %v6999_v49 = vpop.f32.mrf.mxu2 }
 0x529   : > { %v7000_v30 = vadd.f32 %v6999_v49, %v6976_v38 }
 0x52b   : > { %v7024_v40 = vadd.f32 %v7023_v6, %v7000_v30 }
 0x52d   : > { %v7048_v15 = vadd.f32 %v7047_v43, %v7024_v40  ;;  %v7121_v47 = vpop.f32.mrf.mxu3 }
 0x52e   : > { %v7069_v21 = vpop.f32.mrf.mxu1 }
 0x52f   : > { %v7145_v57 = vpop.f32.mrf.mxu0  ;;  %v7070_v51 = vadd.f32 %v7069_v21, %v7048_v15  ;;  %v7095_v0 = vpop.f32.mrf.mxu2 }
 0x530   : > { %v7122_v41 = vadd.f32 %v7121_v47, %v7095_v0 }
 0x531   : > { %v7218_v45 = vadd.f32 %v7070_v51, %v6919_v55 }
 0x532   : > { %v7146_v24 = vadd.f32 %v7145_v57, %v7122_v41 }
 0x535   : > { %v7215_v42 = vpop.f32.mrf.mxu3 }
 0x536   : > { %v7169_v20 = vpop.f32.mrf.mxu1 }
 0x537   : > { %v7256_v29 = vpop.f32.mrf.mxu0  ;;  %v7170_v58 = vadd.f32 %v7169_v20, %v7146_v24  ;;  %v7193_v4 = vpop.f32.mrf.mxu2 }
 0x539   : > { %v7194_v13 = vadd.f32 %v7193_v4, %v7170_v58 }
 0x53b   : > { %v7216_v54 = vadd.f32 %v7215_v42, %v7194_v13 }
 0x53d   : > { %v7219_v23 = vadd.f32 %v7216_v54, %v6920_v33  ;;  %v7330_v19 = vpop.f32.mrf.mxu3 }
 0x53e   : > { %v7282_v10 = vpop.f32.mrf.mxu1 }
 0x53f   : > { %v7354_v50 = vpop.f32.mrf.mxu0  ;;  %v7283_v22 = vadd.f32 %v7282_v10, %v7256_v29  ;;  %v7306_v35 = vpop.f32.mrf.mxu2 }
 0x541   : > { %v7307_v11 = vadd.f32 %v7306_v35, %v7283_v22 }
 0x543   : > { %v7331_v31 = vadd.f32 %v7330_v19, %v7307_v11 }
 0x545   : > { %v7355_v17 = vadd.f32 %v7354_v50, %v7331_v31  ;;  %v7428_v61 = vpop.f32.mrf.mxu3 }
 0x546   : > { %v7376_v46 = vpop.f32.mrf.mxu1 }
 0x547   : > { %v7452_v62 = vpop.f32.mrf.mxu0  ;;  %v7377_v39 = vadd.f32 %v7376_v46, %v7355_v17  ;;  %v7402_v52 = vpop.f32.mrf.mxu2 }
 0x548   : > { %v7429_v36 = vadd.f32 %v7428_v61, %v7402_v52 }
 0x549   : > { %v7525_v32 = vadd.f32 %v7377_v39, %v7218_v45 }
 0x54a   : > { %v7453_v34 = vadd.f32 %v7452_v62, %v7429_v36 }
 0x54d   : > { %v7522_v26 = vpop.f32.mrf.mxu3 }
 0x54e   : > { %v7476_v44 = vpop.f32.mrf.mxu1 }
 0x54f   : > { %v7563_v37 = vpop.f32.mrf.mxu0  ;;  %v7477_v25 = vadd.f32 %v7476_v44, %v7453_v34  ;;  %v7500_v16 = vpop.f32.mrf.mxu2 }
 0x551   : > { %v7501_v28 = vadd.f32 %v7500_v16, %v7477_v25 }
 0x553   : > { %v7523_v48 = vadd.f32 %v7522_v26, %v7501_v28 }
 0x555   : > { %v10239_v3 = vadd.f32 %v7523_v48, %v7219_v23  ;;  %v7637_v5 = vpop.f32.mrf.mxu3 }
 0x556   : > { %v7589_v56 = vpop.f32.mrf.mxu1 }
 0x557   : > { %v7661_v59 = vpop.f32.mrf.mxu0  ;;  %v7613_v12 = vpop.f32.mrf.mxu2  ;;  %v7590_v49 = vadd.f32 %v7589_v56, %v7563_v37 }
 0x559   : > { %v7614_v40 = vadd.f32 %v7613_v12, %v7590_v49 }
 0x55b   : > { %v7638_v0 = vadd.f32 %v7637_v5, %v7614_v40 }
 0x55d   : > { %v7735_v53 = vpop.f32.mrf.mxu3  ;;  %v7662_v41 = vadd.f32 %v7661_v59, %v7638_v0 }
 0x55e   : > { %v7683_v55 = vpop.f32.mrf.mxu1 }
 0x55f   : > { %v7759_v9 = vpop.f32.mrf.mxu0  ;;  %v7709_v14 = vpop.f32.mrf.mxu2  ;;  %v7684_v54 = vadd.f32 %v7683_v55, %v7662_v41 }
 0x560   : > { %v7736_v20 = vadd.f32 %v7735_v53, %v7709_v14 }
 0x561   : > { %v7832_v35 = vadd.f32 %v7684_v54, %v7525_v32 }
 0x562   : > { %v7760_v10 = vadd.f32 %v7759_v9, %v7736_v20 }
 0x565   : > { %v7829_v60 = vpop.f32.mrf.mxu3 }
 0x566   : > { %v7783_v27 = vpop.f32.mrf.mxu1 }
 0x567   : > { %v7870_v1 = vpop.f32.mrf.mxu0  ;;  %v7807_v18 = vpop.f32.mrf.mxu2  ;;  %v7784_v11 = vadd.f32 %v7783_v27, %v7760_v10 }
 0x569   : > { %v7808_v34 = vadd.f32 %v7807_v18, %v7784_v11 }
 0x56b   : > { %v7830_v28 = vadd.f32 %v7829_v60, %v7808_v34 }
 0x56d   : > { %v7944_v63 = vpop.f32.mrf.mxu3  ;;  %v7833_v53 = vadd.f32 %v7830_v28, %v10239_v3 }
 0x56e   : > { %v7896_v8 = vpop.f32.mrf.mxu1 }
 0x56f   : > { %v7968_v2 = vpop.f32.mrf.mxu0  ;;  %v7920_v33 = vpop.f32.mrf.mxu2  ;;  %v7897_v30 = vadd.f32 %v7896_v8, %v7870_v1 }
 0x571   : > { %v7921_v57 = vadd.f32 %v7920_v33, %v7897_v30 }
 0x573   : > { %v7945_v45 = vadd.f32 %v7944_v63, %v7921_v57 }
 0x575   : > { %v8042_v6 = vpop.f32.mrf.mxu3  ;;  %v7969_v29 = vadd.f32 %v7968_v2, %v7945_v45 }
 0x576   : > { %v7990_v7 = vpop.f32.mrf.mxu1 }
 0x577   : > { %v8066_v43 = vpop.f32.mrf.mxu0  ;;  %v8016_v38 = vpop.f32.mrf.mxu2  ;;  %v7991_v50 = vadd.f32 %v7990_v7, %v7969_v29 }
 0x578   : > { %v8043_v23 = vadd.f32 %v8042_v6, %v8016_v38 }
 0x579   : > { %v8139_v62 = vadd.f32 %v7991_v50, %v7832_v35 }
 0x57a   : > { %v8067_v31 = vadd.f32 %v8066_v43, %v8043_v23 }
 0x57d   : > { %v8136_v15 = vpop.f32.mrf.mxu3 }
 0x57e   : > { %v8090_v47 = vpop.f32.mrf.mxu1 }
 0x57f   : > { %v8177_v21 = vpop.f32.mrf.mxu0  ;;  %v8114_v51 = vpop.f32.mrf.mxu2  ;;  %v8091_v39 = vadd.f32 %v8090_v47, %v8067_v31 }
 0x581   : > { %v8115_v25 = vadd.f32 %v8114_v51, %v8091_v39 }
 0x583   : > { %v8137_v5 = vadd.f32 %v8136_v15, %v8115_v25 }
 0x585   : > { %v8251_v24 = vpop.f32.mrf.mxu3  ;;  %v8140_v9 = vadd.f32 %v8137_v5, %v7833_v53 }
 0x586   : > { %v8203_v42 = vpop.f32.mrf.mxu1 }
 0x587   : > { %v8204_v58 = vadd.f32 %v8203_v42, %v8177_v21  ;;  %v8227_v4 = vpop.f32.mrf.mxu2  ;;  %v8275_v13 = vpop.f32.mrf.mxu0 }
 0x589   : > { %v8228_v19 = vadd.f32 %v8227_v4, %v8204_v58 }
 0x58b   : > { %v8252_v22 = vadd.f32 %v8251_v24, %v8228_v19 }
 0x58d   : > { %v8276_v17 = vadd.f32 %v8275_v13, %v8252_v22  ;;  %v8349_v46 = vpop.f32.mrf.mxu3 }
 0x58e   : > { %v8297_v61 = vpop.f32.mrf.mxu1 }
 0x58f   : > { %v8298_v52 = vadd.f32 %v8297_v61, %v8276_v17  ;;  %v8323_v36 = vpop.f32.mrf.mxu2  ;;  %v8373_v37 = vpop.f32.mrf.mxu0 }
 0x590   : > { %v8350_v44 = vadd.f32 %v8349_v46, %v8323_v36 }
 0x591   : > { %v8446_v26 = vadd.f32 %v8298_v52, %v8139_v62 }
 0x592   : > { %v8374_v32 = vadd.f32 %v8373_v37, %v8350_v44 }
 0x593   : > { %v8448_v16 = vmax.f32 %v8446_v26, 0.0 }
 0x595   : > { %8450 = vst [vmem:[%s136_s27] sm:$0xff] %v8448_v16  ;;  %v8443_v12 = vpop.f32.mrf.mxu3 }
 0x596   : > { %v8397_v48 = vpop.f32.mrf.mxu1 }
 0x597   : > { %v8398_v56 = vadd.f32 %v8397_v48, %v8374_v32  ;;  %v8421_v59 = vpop.f32.mrf.mxu2 }
 0x599   : > { %v8422_v55 = vadd.f32 %v8421_v59, %v8398_v56 }
 0x59b   : > { %v8444_v14 = vadd.f32 %v8443_v12, %v8422_v55 }
 0x59d   : > { %v8447_v60 = vadd.f32 %v8444_v14, %v8140_v9 }
 0x59f   : > { %v8449_v27 = vmax.f32 %v8447_v60, 0.0 }
 0x5a1   : > { %8451 = vst [vmem:[%s136_s27 + $0x8] sm:$0xff] %v8449_v27 }
 0x5a2   : > { %8651 = shalt.err (!%p8648_p3)
}
 0x5a3   : > { %8576 = dma.vmem_to_hbm [thread:$0]  (%p8750_p5), %s8467_s4, 256, %s8469_s5, %s8453_s13  }
 0x5a4 PF: > { %p8582_p4 = scmp.ge.s32.totalorder %s8686_s12, 2  ;;  %s8480_s25 = sand.u32 1, %s8674_s9  }
 0x5a5   : > { %s8481_s6 = scalar_lea.sflag [#allocation3], %s8480_s25 }
 0x5a6   : > { %p8579_p7 = pnand %p8582_p4, %p8754_p6 }
 0x5a8   : > { %p8580_p8 = pneg %p8579_p7 }
 0x5aa   : > { %8669 = dma.done.wait (%p8580_p8), %s8481_s6, 256  }
 0x5ab   : > { %8671 = vsyncadd (%p8580_p8), %s8481_s6, 4294967040  ;;  %p12_p9 = scmp.ge.s32.totalorder %s8737_s15, 4   ;;  %s10473_s9 = smov %s8678_s10 }
 0x5ac   : > { %s10474_s10 = smov %s8682_s11  ;;  %s10475_s11 = smov %s8748_s18 }
 0x5ad   : > { %s10476_s12 = smov %s8737_s15  ;;  %14 = sbr.rel (!%p12_p9) target bundleno = 3 (0x3), region = 89 }
 0x5b2   :  { %8487 = vsyncpa [#allocation3], 1 }
 0x5b3   :  { %8489 = vsyncpa [#allocation3 + $0x1], 1 }

</bundles_post_ra>
